<compile_context>
chip_gen: v7x
topology: tpu7x:2x2x1
jax: 0.10.0
libtpu: 0.0.40
codegen_flags: <defaults>
</compile_context>

<pallas_src>
import functools

import jax
import jax.numpy as jnp
from jax.experimental import pallas as pl
from jax.experimental.pallas import tpu as pltpu


def _gelu_exact(x):
    # PyTorch nn.GELU() default: exact erf-based GELU.
    inv_sqrt2 = jnp.float32(0.7071067811865476)
    return 0.5 * x * (1.0 + jax.lax.erf(x * inv_sqrt2))


def fused_basis_kernel(x_ref, w0_ref, b0_ref, w1_ref, b1_ref,
                       w2_ref, b2_ref, wo_ref, bo_ref, o_ref):
    """One batch tile: all modes fused via packed / block-diagonal weights."""
    mm_dtype = w1_ref.dtype                     # fp32 (default) or bf16 (opt-in)
    x = x_ref[...]                              # (tb, D)

    # Layer 0: (tb, D) @ (D, M*H) -- tiny-K MXU push.
    h = jnp.dot(x.astype(mm_dtype), w0_ref[...],
                preferred_element_type=jnp.float32) + b0_ref[...]
    h = _gelu_exact(h)

    # Layers 1/2: block-diagonal (tb, MH) @ (MH, MH), one MXU tile on v6e/v7x.
    h = _gelu_exact(jnp.dot(h.astype(mm_dtype), w1_ref[...],
                            preferred_element_type=jnp.float32) + b1_ref[...])
    h = _gelu_exact(jnp.dot(h.astype(mm_dtype), w2_ref[...],
                            preferred_element_type=jnp.float32) + b2_ref[...])

    # Output heads: packed (MH, M) projection -> lane-dense (tb, M) store.
    out = jnp.dot(h.astype(mm_dtype), wo_ref[...],
                  preferred_element_type=jnp.float32) + bo_ref[...]
    o_ref[...] = jnp.sin(out)


def pack_params(params, matmul_dtype=jnp.float32):
    """Pack per-mode weights into fused / block-diagonal matrices.

    Call ONCE at parameter creation/update time, not per forward call.
    Biases stay fp32; weight matrices are cast to `matmul_dtype` (fp32 default
    keeps 1e-5 parity; bf16 is the faster v6e/v7x MXU path).
    """
    w0, b0, w1, b1, w2, b2, wo, bo = params
    M, D, H = w0.shape
    MH = M * H
    eye = jnp.eye(M, dtype=jnp.float32)

    # Layer 0: concat along output dim -> (D, M*H); column order m*H + h.
    w0p = jnp.transpose(w0, (1, 0, 2)).reshape(D, MH)
    b0p = b0.reshape(1, MH)

    # Layers 1/2: block-diagonal (M*H, M*H) built with one einsum each.
    def block_diag(w):  # (M, H, H) -> (MH, MH)
        return jnp.einsum('mij,mn->minj', w, eye).reshape(MH, MH)

    w1p, b1p = block_diag(w1), b1.reshape(1, MH)
    w2p, b2p = block_diag(w2), b2.reshape(1, MH)

    # Output heads: (MH, M); mode m's weights live in column m, rows m*H:(m+1)*H.
    wop = jnp.einsum('mh,mn->mhn', wo[:, 0, :], eye).reshape(MH, M)
    bop = bo.reshape(1, M)

    cast = lambda w: w.astype(matmul_dtype)
    return (cast(w0p), b0p, cast(w1p), b1p, cast(w2p), b2p, cast(wop), bop)


@functools.partial(jax.jit, static_argnames=("block_b",))
def multi_mode_basis_forward(x, packed, block_b=128):
    """x: (B, D) float32; packed: output of pack_params.  Returns (B, M) f32."""
    w0p, b0p, w1p, b1p, w2p, b2p, wop, bop = packed
    B, D = x.shape
    MH = w1p.shape[0]
    M = wop.shape[1]

    # Pad batch to a multiple-of-8 tile (sublane constraint) if needed.
    b_pad8 = -(-B // 8) * 8
    tb = min(block_b, b_pad8)
    b_pad = -(-b_pad8 // tb) * tb
    if b_pad != B:
        x = jnp.pad(x, ((0, b_pad - B), (0, 0)))

    const = lambda i: (0, 0)          # weights: VMEM-resident across batch tiles
    batched = lambda i: (i, 0)        # x / output: tiled along batch

    out = pl.pallas_call(
        fused_basis_kernel,
        out_shape=jax.ShapeDtypeStruct((b_pad, M), jnp.float32),
        grid_spec=pl.GridSpec(
            grid=(b_pad // tb,),
            in_specs=[
                pl.BlockSpec((tb, D),   batched),   # x
                pl.BlockSpec((D, MH),   const),     # W0 packed
                pl.BlockSpec((1, MH),   const),     # b0
                pl.BlockSpec((MH, MH),  const),     # W1 block-diag
                pl.BlockSpec((1, MH),   const),     # b1
                pl.BlockSpec((MH, MH),  const),     # W2 block-diag
                pl.BlockSpec((1, MH),   const),     # b2
                pl.BlockSpec((MH, M),   const),     # Wo packed
                pl.BlockSpec((1, M),    const),     # bo
            ],
            out_specs=pl.BlockSpec((tb, M), batched),
        ),
        compiler_params=pltpu.CompilerParams(
            dimension_semantics=("parallel",)),
    )(x, w0p, b0p, w1p, b1p, w2p, b2p, wop, bop)

    return out[:B] if b_pad != B else out


def _reference_forward(x, params):
    """Pure-JAX reference (mirrors PyTorch forward) for a sanity check."""
    w0, b0, w1, b1, w2, b2, wo, bo = params
    outs = []
    for m in range(w0.shape[0]):
        h = _gelu_exact(x @ w0[m] + b0[m])
        h = _gelu_exact(h @ w1[m] + b1[m])
        h = _gelu_exact(h @ w2[m] + b2[m])
        o = jnp.sin(jnp.sum(h * wo[m], axis=-1) + bo[m, 0])
        outs.append(o)
    return jnp.stack(outs, axis=1)


def _make_params(key, num_modes, input_dim, hidden_dim):
    """Deterministic xavier_normal weights (stored as (in,out)), zero biases."""
    def xavier(k, fan_in, fan_out, shape):
        std = (2.0 / (fan_in + fan_out)) ** 0.5
        return std * jax.random.normal(k, shape, jnp.float32)

    M, D, H = num_modes, input_dim, hidden_dim
    keys = jax.random.split(key, 4 * M)
    w0 = jnp.stack([xavier(keys[4 * m + 0], D, H, (D, H)) for m in range(M)])
    w1 = jnp.stack([xavier(keys[4 * m + 1], H, H, (H, H)) for m in range(M)])
    w2 = jnp.stack([xavier(keys[4 * m + 2], H, H, (H, H)) for m in range(M)])
    wo = jnp.stack([xavier(keys[4 * m + 3], H, 1, (1, H)) for m in range(M)])
    b0 = jnp.zeros((M, 1, H), jnp.float32)
    b1 = jnp.zeros((M, 1, H), jnp.float32)
    b2 = jnp.zeros((M, 1, H), jnp.float32)
    bo = jnp.zeros((M, 1, 1), jnp.float32)
    return (w0, b0, w1, b1, w2, b2, wo, bo)


if __name__ == "__main__":
    # batch, input_dim, hidden_dim, num_modes (batch > block_b to exercise the
    # parallel batch grid axis / both v7x TensorCores).
    B, D, H, M = 256, 3, 64, 4

    key = jax.random.PRNGKey(0)
    kx, kp = jax.random.split(key)
    x = jax.random.normal(kx, (B, D), jnp.float32)
    params = _make_params(kp, M, D, H)

    # One-time packing, hoisted out of the forward path.
    packed = pack_params(params)                 # fp32 -> 1e-5 parity
    packed = jax.block_until_ready(packed)

    out = multi_mode_basis_forward(x, packed, block_b=128)
    out = jax.block_until_ready(out)

    assert out.shape == (B, M), out.shape
    ref = _reference_forward(x, params)
    assert jnp.allclose(out, ref, atol=1e-5, rtol=1e-5), (out, ref)

    print("KERNEL_OK")
</pallas_src>

<mosaic_0001>
module attributes {stable_mosaic.version = 11 : i64} {
  func.func @fused_basis_kernel(%arg0: i32, %arg1: memref<128x3xf32, #tpu.memory_space<vmem>>, %arg2: memref<3x256xf32, #tpu.memory_space<vmem>>, %arg3: memref<1x256xf32, #tpu.memory_space<vmem>>, %arg4: memref<256x256xf32, #tpu.memory_space<vmem>>, %arg5: memref<1x256xf32, #tpu.memory_space<vmem>>, %arg6: memref<256x256xf32, #tpu.memory_space<vmem>>, %arg7: memref<1x256xf32, #tpu.memory_space<vmem>>, %arg8: memref<256x4xf32, #tpu.memory_space<vmem>>, %arg9: memref<1x4xf32, #tpu.memory_space<vmem>>, %arg10: memref<128x4xf32, #tpu.memory_space<vmem>>) attributes {dimension_semantics = [#tpu.dimension_semantics<parallel>], iteration_bounds = array<i64: 2>, scalar_prefetch = 0 : i64, scratch_operands = 0 : i64, tpu.core_type = #tpu.core_type<tc>, window_params = [{transform_indices = @transform_0, window_bounds = array<i64: 128, 3>}, {pipeline_mode = #tpu.pipeline_mode<synchronous>, transform_indices = @transform_1, window_bounds = array<i64: 3, 256>}, {pipeline_mode = #tpu.pipeline_mode<synchronous>, transform_indices = @transform_2, window_bounds = array<i64: 1, 256>}, {pipeline_mode = #tpu.pipeline_mode<synchronous>, transform_indices = @transform_3, window_bounds = array<i64: 256, 256>}, {pipeline_mode = #tpu.pipeline_mode<synchronous>, transform_indices = @transform_4, window_bounds = array<i64: 1, 256>}, {pipeline_mode = #tpu.pipeline_mode<synchronous>, transform_indices = @transform_5, window_bounds = array<i64: 256, 256>}, {pipeline_mode = #tpu.pipeline_mode<synchronous>, transform_indices = @transform_6, window_bounds = array<i64: 1, 256>}, {pipeline_mode = #tpu.pipeline_mode<synchronous>, transform_indices = @transform_7, window_bounds = array<i64: 256, 4>}, {pipeline_mode = #tpu.pipeline_mode<synchronous>, transform_indices = @transform_8, window_bounds = array<i64: 1, 4>}, {transform_indices = @transform_9, window_bounds = array<i64: 128, 4>}]} {
    %c0 = arith.constant 0 : index
    %c0_0 = arith.constant 0 : index
    %0 = vector.load %arg1[%c0, %c0_0] : memref<128x3xf32, #tpu.memory_space<vmem>>, vector<128x3xf32>
    %c0_1 = arith.constant 0 : index
    %c0_2 = arith.constant 0 : index
    %1 = vector.load %arg2[%c0_1, %c0_2] : memref<3x256xf32, #tpu.memory_space<vmem>>, vector<3x256xf32>
    %cst = arith.constant dense<0.000000e+00> : vector<128x256xf32>
    %2 = tpu.matmul %0, %1, %cst {dimension_numbers = #tpu.dot_dimension_numbers<[1], [0], [0], [1], [0, 0, 1, 1], [], []>} : vector<128x3xf32>, vector<3x256xf32>, vector<128x256xf32> -> vector<128x256xf32>
    %c0_3 = arith.constant 0 : index
    %c0_4 = arith.constant 0 : index
    %3 = vector.load %arg3[%c0_3, %c0_4] : memref<1x256xf32, #tpu.memory_space<vmem>>, vector<1x256xf32>
    %4 = vector.broadcast %3 : vector<1x256xf32> to vector<128x256xf32>
    %5 = arith.addf %2, %4 : vector<128x256xf32>
    %cst_5 = arith.constant 5.000000e-01 : f32
    %6 = vector.broadcast %cst_5 : f32 to vector<128x256xf32>
    %7 = arith.mulf %6, %5 : vector<128x256xf32>
    %cst_6 = arith.constant 0.707106769 : f32
    %8 = vector.broadcast %cst_6 : f32 to vector<128x256xf32>
    %9 = arith.mulf %5, %8 : vector<128x256xf32>
    %10 = math.erf %9 : vector<128x256xf32>
    %cst_7 = arith.constant 1.000000e+00 : f32
    %11 = vector.broadcast %cst_7 : f32 to vector<128x256xf32>
    %12 = arith.addf %11, %10 : vector<128x256xf32>
    %13 = arith.mulf %7, %12 : vector<128x256xf32>
    %c0_8 = arith.constant 0 : index
    %c0_9 = arith.constant 0 : index
    %14 = vector.load %arg4[%c0_8, %c0_9] : memref<256x256xf32, #tpu.memory_space<vmem>>, vector<256x256xf32>
    %cst_10 = arith.constant dense<0.000000e+00> : vector<128x256xf32>
    %15 = tpu.matmul %13, %14, %cst_10 {dimension_numbers = #tpu.dot_dimension_numbers<[1], [0], [0], [1], [0, 0, 1, 1], [], []>} : vector<128x256xf32>, vector<256x256xf32>, vector<128x256xf32> -> vector<128x256xf32>
    %c0_11 = arith.constant 0 : index
    %c0_12 = arith.constant 0 : index
    %16 = vector.load %arg5[%c0_11, %c0_12] : memref<1x256xf32, #tpu.memory_space<vmem>>, vector<1x256xf32>
    %17 = vector.broadcast %16 : vector<1x256xf32> to vector<128x256xf32>
    %18 = arith.addf %15, %17 : vector<128x256xf32>
    %cst_13 = arith.constant 5.000000e-01 : f32
    %19 = vector.broadcast %cst_13 : f32 to vector<128x256xf32>
    %20 = arith.mulf %19, %18 : vector<128x256xf32>
    %cst_14 = arith.constant 0.707106769 : f32
    %21 = vector.broadcast %cst_14 : f32 to vector<128x256xf32>
    %22 = arith.mulf %18, %21 : vector<128x256xf32>
    %23 = math.erf %22 : vector<128x256xf32>
    %cst_15 = arith.constant 1.000000e+00 : f32
    %24 = vector.broadcast %cst_15 : f32 to vector<128x256xf32>
    %25 = arith.addf %24, %23 : vector<128x256xf32>
    %26 = arith.mulf %20, %25 : vector<128x256xf32>
    %c0_16 = arith.constant 0 : index
    %c0_17 = arith.constant 0 : index
    %27 = vector.load %arg6[%c0_16, %c0_17] : memref<256x256xf32, #tpu.memory_space<vmem>>, vector<256x256xf32>
    %cst_18 = arith.constant dense<0.000000e+00> : vector<128x256xf32>
    %28 = tpu.matmul %26, %27, %cst_18 {dimension_numbers = #tpu.dot_dimension_numbers<[1], [0], [0], [1], [0, 0, 1, 1], [], []>} : vector<128x256xf32>, vector<256x256xf32>, vector<128x256xf32> -> vector<128x256xf32>
    %c0_19 = arith.constant 0 : index
    %c0_20 = arith.constant 0 : index
    %29 = vector.load %arg7[%c0_19, %c0_20] : memref<1x256xf32, #tpu.memory_space<vmem>>, vector<1x256xf32>
    %30 = vector.broadcast %29 : vector<1x256xf32> to vector<128x256xf32>
    %31 = arith.addf %28, %30 : vector<128x256xf32>
    %cst_21 = arith.constant 5.000000e-01 : f32
    %32 = vector.broadcast %cst_21 : f32 to vector<128x256xf32>
    %33 = arith.mulf %32, %31 : vector<128x256xf32>
    %cst_22 = arith.constant 0.707106769 : f32
    %34 = vector.broadcast %cst_22 : f32 to vector<128x256xf32>
    %35 = arith.mulf %31, %34 : vector<128x256xf32>
    %36 = math.erf %35 : vector<128x256xf32>
    %cst_23 = arith.constant 1.000000e+00 : f32
    %37 = vector.broadcast %cst_23 : f32 to vector<128x256xf32>
    %38 = arith.addf %37, %36 : vector<128x256xf32>
    %39 = arith.mulf %33, %38 : vector<128x256xf32>
    %c0_24 = arith.constant 0 : index
    %c0_25 = arith.constant 0 : index
    %40 = vector.load %arg8[%c0_24, %c0_25] : memref<256x4xf32, #tpu.memory_space<vmem>>, vector<256x4xf32>
    %cst_26 = arith.constant dense<0.000000e+00> : vector<128x4xf32>
    %41 = tpu.matmul %39, %40, %cst_26 {dimension_numbers = #tpu.dot_dimension_numbers<[1], [0], [0], [1], [0, 0, 1, 1], [], []>} : vector<128x256xf32>, vector<256x4xf32>, vector<128x4xf32> -> vector<128x4xf32>
    %c0_27 = arith.constant 0 : index
    %c0_28 = arith.constant 0 : index
    %42 = vector.load %arg9[%c0_27, %c0_28] : memref<1x4xf32, #tpu.memory_space<vmem>>, vector<1x4xf32>
    %43 = vector.broadcast %42 : vector<1x4xf32> to vector<128x4xf32>
    %44 = arith.addf %41, %43 : vector<128x4xf32>
    %45 = math.sin %44 : vector<128x4xf32>
    %c0_29 = arith.constant 0 : index
    %c0_30 = arith.constant 0 : index
    %46 = vector.load %arg10[%c0_29, %c0_30] : memref<128x4xf32, #tpu.memory_space<vmem>>, vector<128x4xf32>
    tpu.vector_store %arg10[%c0_29, %c0_30], %45 {strides = array<i32>} : memref<128x4xf32, #tpu.memory_space<vmem>>, vector<128x4xf32>,
    return
  }
  func.func @transform_0(%arg0: i32) -> (i32, i32) {
    %c0_i32 = arith.constant 0 : i32
    %c0_i32_0 = arith.constant 0 : i32
    return %arg0, %c0_i32 : i32, i32
  }
  func.func @transform_1(%arg0: i32) -> (i32, i32) {
    %c0_i32 = arith.constant 0 : i32
    %c0_i32_0 = arith.constant 0 : i32
    %c0_i32_1 = arith.constant 0 : i32
    return %c0_i32, %c0_i32_0 : i32, i32
  }
  func.func @transform_2(%arg0: i32) -> (i32, i32) {
    %c0_i32 = arith.constant 0 : i32
    %c0_i32_0 = arith.constant 0 : i32
    %c0_i32_1 = arith.constant 0 : i32
    return %c0_i32, %c0_i32_0 : i32, i32
  }
  func.func @transform_3(%arg0: i32) -> (i32, i32) {
    %c0_i32 = arith.constant 0 : i32
    %c0_i32_0 = arith.constant 0 : i32
    %c0_i32_1 = arith.constant 0 : i32
    return %c0_i32, %c0_i32_0 : i32, i32
  }
  func.func @transform_4(%arg0: i32) -> (i32, i32) {
    %c0_i32 = arith.constant 0 : i32
    %c0_i32_0 = arith.constant 0 : i32
    %c0_i32_1 = arith.constant 0 : i32
    return %c0_i32, %c0_i32_0 : i32, i32
  }
  func.func @transform_5(%arg0: i32) -> (i32, i32) {
    %c0_i32 = arith.constant 0 : i32
    %c0_i32_0 = arith.constant 0 : i32
    %c0_i32_1 = arith.constant 0 : i32
    return %c0_i32, %c0_i32_0 : i32, i32
  }
  func.func @transform_6(%arg0: i32) -> (i32, i32) {
    %c0_i32 = arith.constant 0 : i32
    %c0_i32_0 = arith.constant 0 : i32
    %c0_i32_1 = arith.constant 0 : i32
    return %c0_i32, %c0_i32_0 : i32, i32
  }
  func.func @transform_7(%arg0: i32) -> (i32, i32) {
    %c0_i32 = arith.constant 0 : i32
    %c0_i32_0 = arith.constant 0 : i32
    %c0_i32_1 = arith.constant 0 : i32
    return %c0_i32, %c0_i32_0 : i32, i32
  }
  func.func @transform_8(%arg0: i32) -> (i32, i32) {
    %c0_i32 = arith.constant 0 : i32
    %c0_i32_0 = arith.constant 0 : i32
    %c0_i32_1 = arith.constant 0 : i32
    return %c0_i32, %c0_i32_0 : i32, i32
  }
  func.func @transform_9(%arg0: i32) -> (i32, i32) {
    %c0_i32 = arith.constant 0 : i32
    %c0_i32_0 = arith.constant 0 : i32
    return %arg0, %c0_i32 : i32, i32
  }
}

</mosaic_0001>

<bundles_post_ra>
// kernel: multi_mode_basis_forward.1
= control target key start
LH: loop header
LB: loop body
LE: loop exit
PB: predicated region body
PF: predicated region fallthrough
CT: control target
= control target key end

     0   :  { %14 = vsyncpa [#allocation3], 0  ;;  %s4287_s30 = smov 0   ;;  %s6406_s0 = inlined_call_operand.vmem [shape: f32[256,3], index: 0, kind: input, shape index: {}]   ;;  %s6407_s1 = inlined_call_operand.vmem [shape: f32[3,256], index: 1, kind: input, shape index: {}]   ;;  %s6408_s2 = inlined_call_operand.vmem [shape: f32[1,256], index: 2, kind: input, shape index: {}]   ;;  %s6409_s3 = inlined_call_operand.vmem [shape: f32[256,256], index: 3, kind: input, shape index: {}]   ;;  %s6410_s4 = inlined_call_operand.vmem [shape: f32[1,256], index: 4, kind: input, shape index: {}]   ;;  %s6411_s5 = inlined_call_operand.hbm [shape: f32[256,256], index: 5, kind: input, shape index: {}]   ;;  %s6412_s6 = inlined_call_operand.vmem [shape: f32[1,256], index: 6, kind: input, shape index: {}]   ;;  %s6413_s7 = inlined_call_operand.vmem [shape: f32[256,4], index: 7, kind: input, shape index: {}]   ;;  %s6414_s8 = inlined_call_operand.vmem [shape: f32[1,4], index: 8, kind: input, shape index: {}]   ;;  %s6415_s9 = inlined_call_operand.vmem [shape: f32[256,4], index: 9, kind: output, shape index: {}]  }
   0x1 LB: > { %s3484_s10 = sadd.s32 4294967295, %s4225_s30   ;;  %p3486_p0 = scmp.ge.s32.totalorder %s4225_s30, 1  ;;  %s4225_s30 = sphi %s4287_s30, %s20_s30  }
   0x2   : > { %p245_p1 = scmp.lt.s32.totalorder %s4225_s30, 3  ;;  %s4227_s11 = smov [#allocation2]  }
   0x3   : > { %s269_s12 = sshll.u32 %s4227_s11, 4  ;;  %p4301_p3 = scmp.eq.s32.totalorder %s3484_s10, 0  ;;  %s270_s12 = int_to_ptr.vmem [resolvable:$true] %s269_s12 }
   0x4   : > { %p4295_p2 = pnand %p3486_p0, %p245_p1  ;;  %s4187_s18 = scalar_lea.hbm %s6411_s5, 8192 }
   0x5   : > { %s6420_s14 = scalar_select %p4301_p3, 1, 0 }
   0x6   : > { %s6419_s13 = scalar_select %p4295_p2, 1, 0 }
   0x7   : > { %p3904_p4 = pneg %p4295_p2  ;;  %p4188_p6 = scmp.ne.s32.totalorder %s6411_s5, %s4187_s18 }
   0x8   : > { %p4194_p10 = scmp.lt.u32.totalorder %s4187_s18, %s6411_s5 }
   0x9   : > { %p4309_p5 = pnand %p4301_p3, %p3904_p4 }
   0xb   : > { %p4189_p7 = pneg %p4309_p5 }
   0xd   : > { %p4190_p8 = pnand %p4189_p7, %p4188_p6 }
   0xf   : > { %p4191_p9 = pneg %p4190_p8 }
  0x11   : > { %p4196_p11 = pnand %p4194_p10, %p4191_p9 }
  0x13   : > { %4199 = shalt.err (!%p4196_p11)
}
  0x14   : > { %s4200_s23 = scalar_lea.vmem %s270_s12, 8192  ;;  %p4208_p1 = scmp.lt.s32.totalorder %s270_s12, %s270_s12 }
  0x15   : > { %p4201_p12 = scmp.ne.s32.totalorder %s270_s12, %s4200_s23  ;;  %p4209_p4 = scmp.lt.s32.totalorder %s4200_s23, %s4200_s23 }
  0x17   : > { %p4203_p13 = pnand %p4201_p12, %p4189_p7  ;;  %p4210_p3 = por %p4209_p4, %p4208_p1 }
  0x19   : > { %p4204_p0 = pneg %p4203_p13 }
  0x1b   : > { %p4211_p2 = pnand %p4210_p3, %p4204_p0 }
  0x1d   : > { %4214 = shalt.err (!%p4211_p2)
}
  0x1e   : > { %s4228_s24 = smov 256   ;;  %s4229_s25 = smov 16  }
  0x1f   : > { %3907 = dma.hbm_to_vmem [thread:$0]  (!%p4309_p5), %s6411_s5, 8192, %s270_s12, [#allocation3], %s4228_s24, %s4228_s24, %s4229_s25  }
  0x20   : > { %p6422_p6 = scmp.ne.s32.totalorder %s6419_s13, 0 }
  0x21   : > { %p6423_p8 = scmp.ne.s32.totalorder (!%p6422_p6), %s6420_s14, 0 }
  0x22   : > { %303 = sbr.rel (%p6422_p6) target bundleno = 1404 (0x57c), region = 56 }
  0x29   : > { %4220 = dma.done.wait (%p6423_p8), [#allocation3], 8192  }
  0x2a   : > { %4222 = vsyncadd (%p6423_p8), [#allocation3], 4294959104  ;;  %s3491_s28 = sshll.u32 %s3484_s10, 4  ;;  %v4230_v0 = vmov 0.0   ;;  %v367_v1 = vld [vmem:[%s6407_s1] sm:$0x77] }
  0x2b   : > { %500 = vmatprep.mubr.f32.mxu0 %v4230_v0  ;;  %p340_p2 = scmp.lt.s32.totalorder %s3491_s28, 31  ;;  %vm431_vm0 = vcmask 1042432   ;;  %v381_v2 = vcombine.high %v367_v1, %v367_v1  ;;  %vm382_vm1 = vcmask 23552   ;;  %v758_v5 = vld [vmem:[%s6409_s3 + $0x8] sm:$0xff]  ;;  %v760_v6 = vld [vmem:[%s6409_s3 + $0x18] sm:$0xff]  ;;  %v757_v7 = vld [vmem:[%s6409_s3] sm:$0xff] }
  0x2c   : > { %v759_v8 = vld [vmem:[%s6409_s3 + $0x10] sm:$0xff]  ;;  %v3660_v9 = vpack.c.bf16 %v760_v6, %v758_v5  ;;  %v762_v11 = vld [vmem:[%s6409_s3 + $0x28] sm:$0xff]  ;;  %v764_v12 = vld [vmem:[%s6409_s3 + $0x38] sm:$0xff] }
  0x2d   : > { %s6453_s28 = smov (!%p340_p2, %s3491_s28), 31  ;;  %3495 = vmatprep.subr.msk.mxu0 %vm431_vm0, %v381_v2  ;;  %v3662_v10 = vpack.c.bf16 %v759_v8, %v757_v7  ;;  %v761_v13 = vld [vmem:[%s6409_s3 + $0x20] sm:$0xff]  ;;  %v3664_v14 = vpack.c.bf16 %v764_v12, %v762_v11  ;;  %v763_v15 = vld [vmem:[%s6409_s3 + $0x30] sm:$0xff]  ;;  %v766_v16 = vld [vmem:[%s6409_s3 + $0x48] sm:$0xff] }
  0x2e   : > { %s3492_s29 = sshll.u32 %s6453_s28, 3  ;;  %3496 = vmatpush1.msk.msra.mxu0 %vm431_vm0, %v367_v1  ;;  %v768_v17 = vld [vmem:[%s6409_s3 + $0x58] sm:$0xff]  ;;  %3661 = vmatprep.subr.bf16.mxu1 %v3660_v9  ;;  %v3666_v19 = vpack.c.bf16 %v763_v15, %v761_v13  ;;  %v765_v21 = vld [vmem:[%s6409_s3 + $0x40] sm:$0xff]  ;;  %v767_v22 = vld [vmem:[%s6409_s3 + $0x50] sm:$0xff] }
  0x2f   : > { %s4346_s13 = scalar_lea.vmem %s6406_s0, %s3492_s29  ;;  %3663 = vmatpush1.bf16.msra.mxu1 %v3662_v10  ;;  %v3668_v20 = vpack.c.bf16 %v768_v17, %v766_v16  ;;  %v770_v23 = vld [vmem:[%s6409_s3 + $0x68] sm:$0xff]  ;;  %v772_v24 = vld [vmem:[%s6409_s3 + $0x78] sm:$0xff]  ;;  %v3670_v26 = vpack.c.bf16 %v767_v22, %v765_v21  ;;  %v769_v28 = vld [vmem:[%s6409_s3 + $0x60] sm:$0xff]  ;;  %s5359_s24 = scalar_lea.vmem %s6415_s9, %s3492_s29 }
  0x30   : > { %v351_v3 = vld [vmem:[%s4346_s13] sm:$0xff]  ;;  %v352_v4 = vld [vmem:[%s4346_s13 + $0x8] sm:$0xff]  ;;  %v353_v18 = vld [vmem:[%s4346_s13 + $0x10] sm:$0xff]  ;;  %3665 = vmatprep.subr.bf16.mxu1 %v3664_v14  ;;  %v3672_v27 = vpack.c.bf16 %v772_v24, %v770_v23 }
  0x31   : > { %3497 = vmatmul.mubr.msk.f32.vlgmr.msra.gmra.mrb[0].mxu0 %vm382_vm1, %v351_v3  ;;  %v354_v25 = vld [vmem:[%s4346_s13 + $0x18] sm:$0xff]  ;;  %v771_v29 = vld [vmem:[%s6409_s3 + $0x70] sm:$0xff]  ;;  %v774_v30 = vld [vmem:[%s6409_s3 + $0x88] sm:$0xff] }
  0x32   : > { %506 = vmatprep.mubr.f32.mxu0 %v4230_v0  ;;  %v776_v31 = vld [vmem:[%s6409_s3 + $0x98] sm:$0xff]  ;;  %v355_v32 = vld [vmem:[%s4346_s13 + $0x20] sm:$0xff]  ;;  %v3674_v33 = vpack.c.bf16 %v771_v29, %v769_v28  ;;  %v775_v36 = vld [vmem:[%s6409_s3 + $0x90] sm:$0xff] }
  0x33   : > { %3667 = vmatpush1.bf16.msra.mxu1 %v3666_v19  ;;  %v3676_v34 = vpack.c.bf16 %v776_v31, %v774_v30  ;;  %v773_v35 = vld [vmem:[%s6409_s3 + $0x80] sm:$0xff]  ;;  %v778_v37 = vld [vmem:[%s6409_s3 + $0xa8] sm:$0xff]  ;;  %v780_v38 = vld [vmem:[%s6409_s3 + $0xb8] sm:$0xff] }
  0x34   : > { %3669 = vmatprep.subr.bf16.mxu1 %v3668_v20  ;;  %v356_v39 = vld [vmem:[%s4346_s13 + $0x28] sm:$0xff]  ;;  %v3678_v40 = vpack.c.bf16 %v775_v36, %v773_v35  ;;  %v3680_v41 = vpack.c.bf16 %v780_v38, %v778_v37  ;;  %v777_v42 = vld [vmem:[%s6409_s3 + $0xa0] sm:$0xff]  ;;  %v779_v43 = vld [vmem:[%s6409_s3 + $0xb0] sm:$0xff] }
  0x35   : > { %3498 = vmatmul.mubr.msk.f32.gmra.mrb[2].mxu0 %vm382_vm1, %v352_v4  ;;  %v782_v44 = vld [vmem:[%s6409_s3 + $0xc8] sm:$0xff]  ;;  %v784_v45 = vld [vmem:[%s6409_s3 + $0xd8] sm:$0xff]  ;;  %v357_v46 = vld [vmem:[%s4346_s13 + $0x30] sm:$0xff]  ;;  %v3682_v47 = vpack.c.bf16 %v779_v43, %v777_v42 }
  0x36   : > { %512 = vmatprep.mubr.f32.mxu0 %v4230_v0  ;;  %v3684_v48 = vpack.c.bf16 %v784_v45, %v782_v44  ;;  %v781_v49 = vld [vmem:[%s6409_s3 + $0xc0] sm:$0xff]  ;;  %v783_v50 = vld [vmem:[%s6409_s3 + $0xd0] sm:$0xff]  ;;  %v786_v51 = vld [vmem:[%s6409_s3 + $0xe8] sm:$0xff] }
  0x37   : > { %3671 = vmatpush1.bf16.msra.mxu1 %v3670_v26  ;;  %v788_v52 = vld [vmem:[%s6409_s3 + $0xf8] sm:$0xff]  ;;  %v3686_v54 = vpack.c.bf16 %v783_v50, %v781_v49  ;;  %v785_v56 = vld [vmem:[%s6409_s3 + $0xe0] sm:$0xff]  ;;  %v787_v57 = vld [vmem:[%s6409_s3 + $0xf0] sm:$0xff] }
  0x38   : > { %3673 = vmatprep.subr.bf16.mxu1 %v3672_v27  ;;  %v358_v53 = vld [vmem:[%s4346_s13 + $0x38] sm:$0xff]  ;;  %v3688_v55 = vpack.c.bf16 %v788_v52, %v786_v51  ;;  %v790_v58 = vld [vmem:[%s6409_s3 + $0x108] sm:$0xff]  ;;  %v359_v60 = vld [vmem:[%s4346_s13 + $0x40] sm:$0xff]  ;;  %v3690_v61 = vpack.c.bf16 %v787_v57, %v785_v56 }
  0x39   : > { %3499 = vmatmul.mubr.msk.f32.gmra.mrb[4].mxu0 %vm382_vm1, %v353_v18  ;;  %v792_v59 = vld [vmem:[%s6409_s3 + $0x118] sm:$0xff]  ;;  %v789_v63 = vld [vmem:[%s6409_s3 + $0x100] sm:$0xff]  ;;  %v791_v1 = vld [vmem:[%s6409_s3 + $0x110] sm:$0xff] }
  0x3a   : > { %518 = vmatprep.mubr.f32.mxu0 %v4230_v0  ;;  %v3692_v62 = vpack.c.bf16 %v792_v59, %v790_v58  ;;  %v794_v2 = vld [vmem:[%s6409_s3 + $0x128] sm:$0xff]  ;;  %v796_v3 = vld [vmem:[%s6409_s3 + $0x138] sm:$0xff]  ;;  %v3694_v5 = vpack.c.bf16 %v791_v1, %v789_v63  ;;  %v793_v7 = vld [vmem:[%s6409_s3 + $0x120] sm:$0xff] }
  0x3b   : > { %3675 = vmatpush1.bf16.msra.mxu1 %v3674_v33  ;;  %v360_v4 = vld [vmem:[%s4346_s13 + $0x48] sm:$0xff]  ;;  %v3696_v6 = vpack.c.bf16 %v796_v3, %v794_v2  ;;  %v795_v8 = vld [vmem:[%s6409_s3 + $0x130] sm:$0xff]  ;;  %v800_v10 = vld [vmem:[%s6409_s3 + $0x158] sm:$0xff] }
  0x3c   : > { %3677 = vmatprep.subr.bf16.mxu1 %v3676_v34  ;;  %v798_v9 = vld [vmem:[%s6409_s3 + $0x148] sm:$0xff]  ;;  %v361_v11 = vld [vmem:[%s4346_s13 + $0x50] sm:$0xff]  ;;  %v3698_v12 = vpack.c.bf16 %v795_v8, %v793_v7  ;;  %v797_v14 = vld [vmem:[%s6409_s3 + $0x140] sm:$0xff] }
  0x3d   : > { %3500 = vmatmul.mubr.msk.f32.gmra.mrb[6].mxu0 %vm382_vm1, %v354_v25  ;;  %v3700_v13 = vpack.c.bf16 %v800_v10, %v798_v9  ;;  %v799_v15 = vld [vmem:[%s6409_s3 + $0x150] sm:$0xff]  ;;  %v362_v16 = vld [vmem:[%s4346_s13 + $0x58] sm:$0xff]  ;;  %v363_v18 = vld [vmem:[%s4346_s13 + $0x60] sm:$0xff] }
  0x3e   : > { %524 = vmatprep.mubr.f32.mxu0 %v4230_v0  ;;  %v3702_v17 = vpack.c.bf16 %v799_v15, %v797_v14  ;;  %v364_v19 = vld [vmem:[%s4346_s13 + $0x68] sm:$0xff]  ;;  %v365_v20 = vld [vmem:[%s4346_s13 + $0x70] sm:$0xff]  ;;  %v366_v21 = vld [vmem:[%s4346_s13 + $0x78] sm:$0xff] }
  0x3f   : > { %3679 = vmatpush1.bf16.msra.mxu1 %v3678_v40  ;;  %v802_v22 = vld [vmem:[%s6409_s3 + $0x168] sm:$0xff]  ;;  %v804_v23 = vld [vmem:[%s6409_s3 + $0x178] sm:$0xff]  ;;  %v801_v25 = vld [vmem:[%s6409_s3 + $0x160] sm:$0xff] }
  0x40   : > { %3681 = vmatprep.subr.bf16.mxu1 %v3680_v41  ;;  %v3704_v24 = vpack.c.bf16 %v804_v23, %v802_v22  ;;  %v806_v27 = vld [vmem:[%s6409_s3 + $0x188] sm:$0xff]  ;;  %v808_v28 = vld [vmem:[%s6409_s3 + $0x198] sm:$0xff]  ;;  %v805_v30 = vld [vmem:[%s6409_s3 + $0x180] sm:$0xff] }
  0x41   : > { %3501 = vmatmul.mubr.msk.f32.gmra.mrb[8].mxu0 %vm382_vm1, %v355_v32  ;;  %v3708_v29 = vpack.c.bf16 %v808_v28, %v806_v27  ;;  %v807_v31 = vld [vmem:[%s6409_s3 + $0x190] sm:$0xff]  ;;  %v810_v33 = vld [vmem:[%s6409_s3 + $0x1a8] sm:$0xff]  ;;  %v812_v34 = vld [vmem:[%s6409_s3 + $0x1b8] sm:$0xff] }
  0x42   : > { %530 = vmatprep.mubr.f32.mxu0 %v4230_v0  ;;  %v3710_v32 = vpack.c.bf16 %v807_v31, %v805_v30  ;;  %v3712_v35 = vpack.c.bf16 %v812_v34, %v810_v33  ;;  %v809_v36 = vld [vmem:[%s6409_s3 + $0x1a0] sm:$0xff]  ;;  %v811_v37 = vld [vmem:[%s6409_s3 + $0x1b0] sm:$0xff]  ;;  %v816_v40 = vld [vmem:[%s6409_s3 + $0x1d8] sm:$0xff] }
  0x43   : > { %3683 = vmatpush1.bf16.msra.mxu1 %v3682_v47  ;;  %v3714_v38 = vpack.c.bf16 %v811_v37, %v809_v36  ;;  %v813_v42 = vld [vmem:[%s6409_s3 + $0x1c0] sm:$0xff]  ;;  %v815_v43 = vld [vmem:[%s6409_s3 + $0x1d0] sm:$0xff]  ;;  %v818_v45 = vld [vmem:[%s6409_s3 + $0x1e8] sm:$0xff] }
  0x44   : > { %3685 = vmatprep.subr.bf16.mxu1 %v3684_v48  ;;  %v3718_v44 = vpack.c.bf16 %v815_v43, %v813_v42  ;;  %v817_v48 = vld [vmem:[%s6409_s3 + $0x1e0] sm:$0xff]  ;;  %v819_v49 = vld [vmem:[%s6409_s3 + $0x1f0] sm:$0xff]  ;;  %v1155_v51 = vld [vmem:[#allocation2 + $0x8] sm:$0xff]  ;;  %v370_v42 = vlaneseq }
  0x45   : > { %3502 = vmatmul.mubr.msk.f32.gmra.mrb[10].mxu0 %vm382_vm1, %v356_v39  ;;  %v814_v39 = vld [vmem:[%s6409_s3 + $0x1c8] sm:$0xff]  ;;  %v3722_v50 = vpack.c.bf16 %v819_v49, %v817_v48  ;;  %v1157_v52 = vld [vmem:[#allocation2 + $0x18] sm:$0xff]  ;;  %v1162_v3 = vld [vmem:[#allocation2 + $0x40] sm:$0xff] }
  0x46   : > { %536 = vmatprep.mubr.f32.mxu0 %v4230_v0  ;;  %v3716_v41 = vpack.c.bf16 %v816_v40, %v814_v39  ;;  %v1159_v56 = vld [vmem:[#allocation2 + $0x28] sm:$0xff]  ;;  %v1161_v57 = vld [vmem:[#allocation2 + $0x38] sm:$0xff]  ;;  %v1166_v9 = vld [vmem:[#allocation2 + $0x60] sm:$0xff]  ;;  %v371_v49 = vshrl.u32 %v370_v42, 7 }
  0x47   : > { %3687 = vmatpush1.bf16.msra.mxu1 %v3686_v54  ;;  %v3724_v54 = vpack.c.bf16 %v1157_v52, %v1155_v51  ;;  %v3728_v59 = vpack.c.bf16 %v1161_v57, %v1159_v56  ;;  %v1165_v63 = vld [vmem:[#allocation2 + $0x58] sm:$0xff]  ;;  %v1168_v10 = vld [vmem:[#allocation2 + $0x70] sm:$0xff]  ;;  %v1170_v15 = vld [vmem:[#allocation2 + $0x80] sm:$0xff] }
  0x48   : > { %3689 = vmatprep.subr.bf16.mxu1 %v3688_v55  ;;  %v1156_v55 = vld [vmem:[#allocation2 + $0x10] sm:$0xff]  ;;  %v1179_v23 = vld [vmem:[#allocation2 + $0xc8] sm:$0xff]  ;;  %v1197_v48 = vld [vmem:[#allocation2 + $0x158] sm:$0xff]  ;;  %v4595_v56 = vsub.s32 1, %v371_v49 }
  0x49   : > { %3503 = vmatmul.mubr.msk.f32.gmra.mrb[12].mxu0 %vm382_vm1, %v357_v46  ;;  %v820_v46 = vld [vmem:[%s6409_s3 + $0x1f8] sm:$0xff]  ;;  %3725 = vmatprep.subr.bf16.mxu0 %v3724_v54  ;;  %v1176_v22 = vld [vmem:[#allocation2 + $0xb0] sm:$0xff]  ;;  %v1183_v28 = vld [vmem:[#allocation2 + $0xe8] sm:$0xff]  ;;  %v4590_v54 = vsub.s32 0, %v371_v49 }
  0x4a   : > { %542 = vmatprep.mubr.f32.mxu0 %v4230_v0  ;;  %v3720_v47 = vpack.c.bf16 %v820_v46, %v818_v45  ;;  %v1180_v27 = vld [vmem:[#allocation2 + $0xd0] sm:$0xff]  ;;  %v1187_v34 = vld [vmem:[#allocation2 + $0x108] sm:$0xff]  ;;  %v1190_v45 = vld [vmem:[#allocation2 + $0x120] sm:$0xff] }
  0x4b   : > { %3691 = vmatpush1.bf16.msra.mxu1 %v3690_v61  ;;  %v1160_v61 = vld [vmem:[#allocation2 + $0x30] sm:$0xff]  ;;  %v1191_v40 = vld [vmem:[#allocation2 + $0x128] sm:$0xff]  ;;  %v1194_v52 = vld [vmem:[#allocation2 + $0x140] sm:$0xff] }
  0x4c   : > { %3693 = vmatprep.subr.bf16.mxu1 %v3692_v62  ;;  %v1163_v62 = vld [vmem:[#allocation2 + $0x48] sm:$0xff]  ;;  %v1184_v33 = vld [vmem:[#allocation2 + $0xf0] sm:$0xff] }
  0x4d   : > { %3504 = vmatmul.mubr.msk.f32.gmra.mrb[14].mxu0 %vm382_vm1, %v358_v53  ;;  %v1154_v53 = vld [vmem:[#allocation2] sm:$0xff]  ;;  %v3732_v2 = vpack.c.bf16 %v1165_v63, %v1163_v62  ;;  %v1188_v39 = vld [vmem:[#allocation2 + $0x110] sm:$0xff] }
  0x4e   : > { %548 = vmatprep.mubr.f32.mxu0 %v4230_v0  ;;  %v3726_v58 = vpack.c.bf16 %v1156_v55, %v1154_v53  ;;  %v1192_v46 = vld [vmem:[#allocation2 + $0x130] sm:$0xff]  ;;  %v368_v55 = vld [vmem:[%s6408_s2] sm:$0x3] }
  0x4f   : > { %3695 = vmatpush1.bf16.msra.mxu1 %v3694_v5  ;;  %v1167_v5 = vld [vmem:[#allocation2 + $0x68] sm:$0xff]  ;;  %v1196_v53 = vld [vmem:[#allocation2 + $0x150] sm:$0xff] }
  0x50   : > { %3697 = vmatprep.subr.bf16.mxu1 %v3696_v6  ;;  %3727 = vmatpush1.bf16.msra.mxu0 %v3726_v58  ;;  %v1169_v6 = vld [vmem:[#allocation2 + $0x78] sm:$0xff]  ;;  %v3766_v57 = vpack.c.bf16 %v1196_v53, %v1194_v52  ;;  %v4598_v58 = vrot.slane %v368_v55, %v4590_v54 }
  0x51   : > { %3505 = vmatmul.mubr.msk.f32.gmra.mrb[16].mxu0 %vm382_vm1, %v359_v60  ;;  %v1158_v60 = vld [vmem:[#allocation2 + $0x20] sm:$0xff]  ;;  %3729 = vmatprep.subr.bf16.mxu0 %v3728_v59  ;;  %v3736_v8 = vpack.c.bf16 %v1169_v6, %v1167_v5  ;;  %v4601_v59 = vrot.slane %v368_v55, %v4595_v56 }
  0x52   : > { %554 = vmatprep.mubr.f32.mxu0 %v4230_v0  ;;  %v3730_v1 = vpack.c.bf16 %v1160_v61, %v1158_v60 }
  0x53   : > { %3699 = vmatpush1.bf16.msra.mxu1 %v3698_v12  ;;  %v1173_v12 = vld [vmem:[#allocation2 + $0x98] sm:$0xff] }
  0x54   : > { %3701 = vmatprep.subr.bf16.mxu1 %v3700_v13  ;;  %3731 = vmatpush1.bf16.msra.mxu0 %v3730_v1  ;;  %v3738_v13 = vpack.c.bf16 %v1168_v10, %v1166_v9 }
  0x55   : > { %3506 = vmatmul.mubr.msk.f32.gmra.mrb[18].mxu0 %vm382_vm1, %v360_v4  ;;  %v1164_v4 = vld [vmem:[#allocation2 + $0x50] sm:$0xff]  ;;  %3733 = vmatprep.subr.bf16.mxu0 %v3732_v2 }
  0x56   : > { %560 = vmatprep.mubr.f32.mxu0 %v4230_v0  ;;  %v3734_v7 = vpack.c.bf16 %v1164_v4, %v1162_v3 }
  0x57   : > { %3703 = vmatpush1.bf16.msra.mxu1 %v3702_v17  ;;  %v1175_v17 = vld [vmem:[#allocation2 + $0xa8] sm:$0xff] }
  0x58   : > { %3705 = vmatprep.subr.bf16.mxu1 %v3704_v24  ;;  %3735 = vmatpush1.bf16.msra.mxu0 %v3734_v7  ;;  %v1181_v24 = vld [vmem:[#allocation2 + $0xd8] sm:$0xff] }
  0x59   : > { %3507 = vmatmul.mubr.msk.f32.gmra.mrb[20].mxu0 %vm382_vm1, %v361_v11  ;;  %v1171_v11 = vld [vmem:[#allocation2 + $0x88] sm:$0xff]  ;;  %3737 = vmatprep.subr.bf16.mxu0 %v3736_v8 }
  0x5a   : > { %566 = vmatprep.mubr.f32.mxu0 %v4230_v0  ;;  %v3740_v14 = vpack.c.bf16 %v1173_v12, %v1171_v11 }
  0x5c   : > { %3739 = vmatpush1.bf16.msra.mxu0 %v3738_v13 }
  0x5d   : > { %3508 = vmatmul.mubr.msk.f32.gmra.mrb[22].mxu0 %vm382_vm1, %v362_v16  ;;  %v1172_v16 = vld [vmem:[#allocation2 + $0x90] sm:$0xff]  ;;  %3741 = vmatprep.subr.bf16.mxu0 %v3740_v14 }
  0x5e   : > { %572 = vmatprep.mubr.f32.mxu0 %v4230_v0 }
  0x61   : > { %3509 = vmatmul.mubr.msk.f32.gmra.mrb[24].mxu0 %vm382_vm1, %v363_v18  ;;  %v1177_v18 = vld [vmem:[#allocation2 + $0xb8] sm:$0xff] }
  0x62   : > { %578 = vmatprep.mubr.f32.mxu0 %v4230_v0 }
  0x65   : > { %3510 = vmatmul.mubr.msk.f32.gmra.mrb[26].mxu0 %vm382_vm1, %v364_v19  ;;  %v3742_v19 = vpack.c.bf16 %v1172_v16, %v1170_v15 }
  0x66   : > { %584 = vmatprep.mubr.f32.mxu0 %v4230_v0 }
  0x67   : > { %3743 = vmatpush1.bf16.msra.mxu0 %v3742_v19 }
  0x69   : > { %3511 = vmatmul.mubr.msk.f32.gmra.mrb[28].mxu0 %vm382_vm1, %v365_v20  ;;  %v3744_v20 = vpack.c.bf16 %v1177_v18, %v1175_v17 }
  0x6a   : > { %590 = vmatprep.mubr.f32.mxu0 %v4230_v0  ;;  %v803_v0 = vld [vmem:[%s6409_s3 + $0x170] sm:$0xff] }
  0x6b   : > { %v3706_v26 = vpack.c.bf16 %v803_v0, %v801_v25  ;;  %3745 = vmatprep.subr.bf16.mxu0 %v3744_v20  ;;  %v3748_v0 = vpack.c.bf16 %v1181_v24, %v1179_v23 }
  0x6d   : > { %3512 = vmatmul.mubr.msk.f32.gmra.mrb[30].mxu0 %vm382_vm1, %v366_v21  ;;  %3707 = vmatpush1.bf16.msra.mxu1 %v3706_v26  ;;  %v1174_v21 = vld [vmem:[#allocation2 + $0xa0] sm:$0xff] }
  0x6e   : > { %3709 = vmatprep.subr.bf16.mxu1 %v3708_v29  ;;  %v3746_v25 = vpack.c.bf16 %v1176_v22, %v1174_v21  ;;  %v1178_v26 = vld [vmem:[#allocation2 + $0xc0] sm:$0xff]  ;;  %v1185_v29 = vld [vmem:[#allocation2 + $0xf8] sm:$0xff] }
  0x6f   : > { %v3750_v30 = vpack.c.bf16 %v1180_v27, %v1178_v26  ;;  %v3752_v31 = vpack.c.bf16 %v1185_v29, %v1183_v28 }
  0x70   : > { %3747 = vmatpush1.bf16.msra.mxu0 %v3746_v25 }
  0x71   : > { %3711 = vmatpush1.bf16.msra.mxu1 %v3710_v32  ;;  %3749 = vmatprep.subr.bf16.mxu0 %v3748_v0  ;;  %v1182_v32 = vld [vmem:[#allocation2 + $0xe0] sm:$0xff] }
  0x72   : > { %3713 = vmatprep.subr.bf16.mxu1 %v3712_v35  ;;  %v1189_v35 = vld [vmem:[#allocation2 + $0x118] sm:$0xff]  ;;  %v3754_v36 = vpack.c.bf16 %v1184_v33, %v1182_v32 }
  0x73   : > { %v3756_v37 = vpack.c.bf16 %v1189_v35, %v1187_v34 }
  0x74   : > { %3751 = vmatpush1.bf16.msra.mxu0 %v3750_v30 }
  0x75   : > { %3715 = vmatpush1.bf16.msra.mxu1 %v3714_v38  ;;  %3753 = vmatprep.subr.bf16.mxu0 %v3752_v31  ;;  %v1186_v38 = vld [vmem:[#allocation2 + $0x100] sm:$0xff] }
  0x76   : > { %3717 = vmatprep.subr.bf16.mxu1 %v3716_v41  ;;  %v1193_v41 = vld [vmem:[#allocation2 + $0x138] sm:$0xff]  ;;  %v3758_v43 = vpack.c.bf16 %v1188_v39, %v1186_v38 }
  0x78   : > { %3755 = vmatpush1.bf16.msra.mxu0 %v3754_v36 }
  0x79   : > { %3719 = vmatpush1.bf16.msra.mxu1 %v3718_v44  ;;  %3757 = vmatprep.subr.bf16.mxu0 %v3756_v37  ;;  %v3760_v44 = vpack.c.bf16 %v1193_v41, %v1191_v40 }
  0x7a   : > { %3721 = vmatprep.subr.bf16.mxu1 %v3720_v47  ;;  %v1195_v47 = vld [vmem:[#allocation2 + $0x148] sm:$0xff] }
  0x7b   : > { %v3764_v51 = vpack.c.bf16 %v1197_v48, %v1195_v47 }
  0x7c   : > { %3759 = vmatpush1.bf16.msra.mxu0 %v3758_v43 }
  0x7d   : > { %3723 = vmatpush1.bf16.msra.mxu1 %v3722_v50  ;;  %v3762_v50 = vpack.c.bf16 %v1192_v46, %v1190_v45  ;;  %3761 = vmatprep.subr.bf16.mxu0 %v3760_v44 }
  0x80   : > { %3763 = vmatpush1.bf16.msra.mxu0 %v3762_v50 }
  0x81   : > { %3765 = vmatprep.subr.bf16.mxu0 %v3764_v51 }
  0x84   : > { %3767 = vmatpush1.bf16.msra.mxu0 %v3766_v57 }
 0x104   : > { %v502_v60 = vpop.f32.mrb[0].mxu0 }
 0x105   : > { %v503_v61 = vadd.f32 %v502_v60, %v4598_v58  ;;  %v504_v62 = vpop.f32.mrb[1].mxu0 }
 0x106   : > { %v505_v63 = vadd.f32 %v504_v62, %v4601_v59 }
 0x107   : > { %v629_v1 = vmul.f32 0.70710677, %v503_v61  ;;  %v597_v28 = vmul.f32 0.5, %v503_v61 }
 0x108   : > { %v630_v2 = vmul.f32 0.70710677, %v505_v63  ;;  %v508_v3 = vpop.f32.mrb[2].mxu0  ;;  %v598_v26 = vmul.f32 0.5, %v505_v63 }
 0x109   : > { %3929 = verf.f32 %v629_v1  ;;  %v509_v4 = vadd.f32 %v508_v3, %v4598_v58  ;;  %v510_v5 = vpop.f32.mrb[3].mxu0 }
 0x10a   : > { %3931 = verf.f32 %v630_v2  ;;  %v511_v6 = vadd.f32 %v510_v5, %v4601_v59 }
 0x10b   : > { %v631_v7 = vmul.f32 0.70710677, %v509_v4  ;;  %v599_v42 = vmul.f32 0.5, %v509_v4 }
 0x10c   : > { %v632_v8 = vmul.f32 0.70710677, %v511_v6  ;;  %v514_v9 = vpop.f32.mrb[4].mxu0  ;;  %v600_v38 = vmul.f32 0.5, %v511_v6 }
 0x10d   : > { %3933 = verf.f32 %v631_v7  ;;  %v515_v10 = vadd.f32 %v514_v9, %v4598_v58  ;;  %v516_v11 = vpop.f32.mrb[5].mxu0 }
 0x10e   : > { %3935 = verf.f32 %v632_v8  ;;  %v517_v12 = vadd.f32 %v516_v11, %v4601_v59 }
 0x10f   : > { %v633_v13 = vmul.f32 0.70710677, %v515_v10  ;;  %v601_v60 = vmul.f32 0.5, %v515_v10 }
 0x110   : > { %v634_v14 = vmul.f32 0.70710677, %v517_v12  ;;  %v520_v15 = vpop.f32.mrb[6].mxu0  ;;  %v602_v52 = vmul.f32 0.5, %v517_v12 }
 0x111   : > { %3937 = verf.f32 %v633_v13  ;;  %v4610_v16 = vadd.f32 %v520_v15, %v4598_v58  ;;  %v522_v17 = vpop.f32.mrb[7].mxu0 }
 0x112   : > { %3939 = verf.f32 %v634_v14  ;;  %v523_v18 = vadd.f32 %v522_v17, %v4601_v59 }
 0x113   : > { %v3930_v19 = vpop.eup %3929  ;;  %v635_v20 = vmul.f32 0.70710677, %v4610_v16  ;;  %v603_v11 = vmul.f32 0.5, %v4610_v16 }
 0x114   : > { %v3932_v21 = vpop.eup %3931  ;;  %v693_v22 = vadd.f32 1.0, %v3930_v19  ;;  %v636_v23 = vmul.f32 0.70710677, %v523_v18  ;;  %v526_v24 = vpop.f32.mrb[8].mxu0  ;;  %v604_v7 = vmul.f32 0.5, %v523_v18 }
 0x115   : > { %3941 = verf.f32 %v635_v20  ;;  %v4615_v25 = vadd.f32 %v526_v24, %v4598_v58  ;;  %v528_v0 = vpop.f32.mrb[9].mxu0  ;;  %v694_v27 = vadd.f32 1.0, %v3932_v21 }
 0x116   : > { %3943 = verf.f32 %v636_v23  ;;  %v4618_v29 = vadd.f32 %v528_v0, %v4601_v59  ;;  %v725_v37 = vmul.f32 %v693_v22, %v597_v28 }
 0x117   : > { %v3934_v30 = vpop.eup %3933  ;;  %v637_v31 = vmul.f32 0.70710677, %v4615_v25  ;;  %v726_v32 = vmul.f32 %v694_v27, %v598_v26  ;;  %v605_v0 = vmul.f32 0.5, %v4615_v25 }
 0x118   : > { %v3936_v33 = vpop.eup %3935  ;;  %v695_v34 = vadd.f32 1.0, %v3934_v30  ;;  %v638_v35 = vmul.f32 0.70710677, %v4618_v29  ;;  %v532_v36 = vpop.f32.mrb[10].mxu0  ;;  %v606_v22 = vmul.f32 0.5, %v4618_v29 }
 0x119   : > { %v696_v39 = vadd.f32 1.0, %v3936_v33  ;;  %3945 = verf.f32 %v637_v31  ;;  %v4623_v40 = vadd.f32 %v532_v36, %v4598_v58  ;;  %v534_v41 = vpop.f32.mrb[11].mxu0  ;;  %897 = vmatprep.mubr.f32.mxu1 %v726_v32 }
 0x11a   : > { %3947 = verf.f32 %v638_v35  ;;  %v4626_v43 = vadd.f32 %v534_v41, %v4601_v59  ;;  %898 = vmatmul.mubr.f32.vlgmr.msra.gmra.mrb[0].mxu1 %v725_v37  ;;  %v727_v51 = vmul.f32 %v695_v34, %v599_v42 }
 0x11b   : > { %v3938_v44 = vpop.eup %3937  ;;  %v639_v45 = vmul.f32 0.70710677, %v4623_v40  ;;  %v728_v46 = vmul.f32 %v696_v39, %v600_v38  ;;  %v607_v38 = vmul.f32 0.5, %v4623_v40 }
 0x11c   : > { %v3940_v47 = vpop.eup %3939  ;;  %v697_v48 = vadd.f32 1.0, %v3938_v44  ;;  %v640_v49 = vmul.f32 0.70710677, %v4626_v43  ;;  %v538_v50 = vpop.f32.mrb[12].mxu0  ;;  %v608_v35 = vmul.f32 0.5, %v4626_v43 }
 0x11d   : > { %v698_v53 = vadd.f32 1.0, %v3940_v47  ;;  %3949 = verf.f32 %v639_v45  ;;  %v4631_v55 = vadd.f32 %v538_v50, %v4598_v58  ;;  %v540_v57 = vpop.f32.mrb[13].mxu0  ;;  %903 = vmatprep.mubr.f32.mxu1 %v728_v46 }
 0x11e   : > { %3951 = verf.f32 %v640_v49  ;;  %v4634_v61 = vadd.f32 %v540_v57, %v4601_v59  ;;  %904 = vmatmul.mubr.f32.gmra.mrb[2].mxu1 %v727_v51  ;;  %v729_v6 = vmul.f32 %v697_v48, %v601_v60 }
 0x11f   : > { %v3942_v62 = vpop.eup %3941  ;;  %v641_v63 = vmul.f32 0.70710677, %v4631_v55  ;;  %v730_v1 = vmul.f32 %v698_v53, %v602_v52  ;;  %v609_v52 = vmul.f32 0.5, %v4631_v55 }
 0x120   : > { %v3944_v2 = vpop.eup %3943  ;;  %v699_v3 = vadd.f32 1.0, %v3942_v62  ;;  %v642_v4 = vmul.f32 0.70710677, %v4634_v61  ;;  %v544_v5 = vpop.f32.mrb[14].mxu0  ;;  %v610_v49 = vmul.f32 0.5, %v4634_v61 }
 0x121   : > { %v700_v8 = vadd.f32 1.0, %v3944_v2  ;;  %3953 = verf.f32 %v641_v63  ;;  %v4639_v9 = vadd.f32 %v544_v5, %v4598_v58  ;;  %v546_v10 = vpop.f32.mrb[15].mxu0  ;;  %909 = vmatprep.mubr.f32.mxu1 %v730_v1 }
 0x122   : > { %3955 = verf.f32 %v642_v4  ;;  %v4643_v12 = vadd.f32 %v546_v10, %v4601_v59  ;;  %910 = vmatmul.mubr.f32.gmra.mrb[4].mxu1 %v729_v6  ;;  %v731_v21 = vmul.f32 %v699_v3, %v603_v11 }
 0x123   : > { %v3946_v13 = vpop.eup %3945  ;;  %v643_v14 = vmul.f32 0.70710677, %v4639_v9  ;;  %v732_v15 = vmul.f32 %v700_v8, %v604_v7  ;;  %v611_v7 = vmul.f32 0.5, %v4639_v9 }
 0x124   : > { %v3948_v17 = vpop.eup %3947  ;;  %v701_v18 = vadd.f32 1.0, %v3946_v13  ;;  %v644_v19 = vmul.f32 0.70710677, %v4643_v12  ;;  %v550_v20 = vpop.f32.mrb[16].mxu0  ;;  %v612_v4 = vmul.f32 0.5, %v4643_v12 }
 0x125   : > { %v702_v23 = vadd.f32 1.0, %v3948_v17  ;;  %3957 = verf.f32 %v643_v14  ;;  %v4649_v16 = vadd.f32 %v550_v20, %v4598_v58  ;;  %v552_v24 = vpop.f32.mrb[17].mxu0  ;;  %915 = vmatprep.mubr.f32.mxu1 %v732_v15 }
 0x126   : > { %3959 = verf.f32 %v644_v19  ;;  %v4653_v26 = vadd.f32 %v552_v24, %v4601_v59  ;;  %916 = vmatmul.mubr.f32.gmra.mrb[6].mxu1 %v731_v21  ;;  %v733_v34 = vmul.f32 %v701_v18, %v605_v0 }
 0x127   : > { %v3950_v27 = vpop.eup %3949  ;;  %v645_v28 = vmul.f32 0.70710677, %v4649_v16  ;;  %v734_v30 = vmul.f32 %v702_v23, %v606_v22  ;;  %v613_v22 = vmul.f32 0.5, %v4649_v16 }
 0x128   : > { %v3952_v31 = vpop.eup %3951  ;;  %v703_v29 = vadd.f32 1.0, %v3950_v27  ;;  %v646_v32 = vmul.f32 0.70710677, %v4653_v26  ;;  %v556_v33 = vpop.f32.mrb[18].mxu0  ;;  %v614_v19 = vmul.f32 0.5, %v4653_v26 }
 0x129   : > { %v704_v36 = vadd.f32 1.0, %v3952_v31  ;;  %3961 = verf.f32 %v645_v28  ;;  %v4659_v25 = vadd.f32 %v556_v33, %v4598_v58  ;;  %v558_v37 = vpop.f32.mrb[19].mxu0  ;;  %921 = vmatprep.mubr.f32.mxu1 %v734_v30 }
 0x12a   : > { %3963 = verf.f32 %v646_v32  ;;  %v4663_v39 = vadd.f32 %v558_v37, %v4601_v59  ;;  %922 = vmatmul.mubr.f32.gmra.mrb[8].mxu1 %v733_v34  ;;  %v735_v48 = vmul.f32 %v703_v29, %v607_v38 }
 0x12b   : > { %v3954_v41 = vpop.eup %3953  ;;  %v647_v42 = vmul.f32 0.70710677, %v4659_v25  ;;  %v736_v44 = vmul.f32 %v704_v36, %v608_v35  ;;  %v615_v35 = vmul.f32 0.5, %v4659_v25 }
 0x12c   : > { %v3956_v45 = vpop.eup %3955  ;;  %v705_v43 = vadd.f32 1.0, %v3954_v41  ;;  %v648_v46 = vmul.f32 0.70710677, %v4663_v39  ;;  %v562_v47 = vpop.f32.mrb[20].mxu0  ;;  %v616_v32 = vmul.f32 0.5, %v4663_v39 }
 0x12d   : > { %v706_v50 = vadd.f32 1.0, %v3956_v45  ;;  %3965 = verf.f32 %v647_v42  ;;  %v4669_v40 = vadd.f32 %v562_v47, %v4598_v58  ;;  %v564_v51 = vpop.f32.mrb[21].mxu0  ;;  %927 = vmatprep.mubr.f32.mxu1 %v736_v44 }
 0x12e   : > { %3967 = verf.f32 %v648_v46  ;;  %v4673_v53 = vadd.f32 %v564_v51, %v4601_v59  ;;  %928 = vmatmul.mubr.f32.gmra.mrb[10].mxu1 %v735_v48  ;;  %v737_v3 = vmul.f32 %v705_v43, %v609_v52 }
 0x12f   : > { %v3958_v57 = vpop.eup %3957  ;;  %v649_v60 = vmul.f32 0.70710677, %v4669_v40  ;;  %v738_v62 = vmul.f32 %v706_v50, %v610_v49  ;;  %v617_v49 = vmul.f32 0.5, %v4669_v40 }
 0x130   : > { %v3960_v63 = vpop.eup %3959  ;;  %v707_v61 = vadd.f32 1.0, %v3958_v57  ;;  %v650_v1 = vmul.f32 0.70710677, %v4673_v53  ;;  %v568_v2 = vpop.f32.mrb[22].mxu0  ;;  %v618_v46 = vmul.f32 0.5, %v4673_v53 }
 0x131   : > { %v708_v5 = vadd.f32 1.0, %v3960_v63  ;;  %3969 = verf.f32 %v649_v60  ;;  %v4679_v55 = vadd.f32 %v568_v2, %v4598_v58  ;;  %v570_v6 = vpop.f32.mrb[23].mxu0  ;;  %933 = vmatprep.mubr.f32.mxu1 %v738_v62 }
 0x132   : > { %3971 = verf.f32 %v650_v1  ;;  %v4683_v8 = vadd.f32 %v570_v6, %v4601_v59  ;;  %934 = vmatmul.mubr.f32.gmra.mrb[12].mxu1 %v737_v3  ;;  %v739_v18 = vmul.f32 %v707_v61, %v611_v7 }
 0x133   : > { %v3962_v10 = vpop.eup %3961  ;;  %v651_v11 = vmul.f32 0.70710677, %v4679_v55  ;;  %v740_v13 = vmul.f32 %v708_v5, %v612_v4  ;;  %v619_v40 = vmul.f32 0.5, %v4679_v55 }
 0x134   : > { %v3964_v14 = vpop.eup %3963  ;;  %v709_v12 = vadd.f32 1.0, %v3962_v10  ;;  %v652_v15 = vmul.f32 0.70710677, %v4683_v8  ;;  %v574_v17 = vpop.f32.mrb[24].mxu0  ;;  %v620_v1 = vmul.f32 0.5, %v4683_v8 }
 0x135   : > { %v710_v20 = vadd.f32 1.0, %v3964_v14  ;;  %3973 = verf.f32 %v651_v11  ;;  %v4689_v9 = vadd.f32 %v574_v17, %v4598_v58  ;;  %v576_v21 = vpop.f32.mrb[25].mxu0  ;;  %939 = vmatprep.mubr.f32.mxu1 %v740_v13 }
 0x136   : > { %3975 = verf.f32 %v652_v15  ;;  %v4693_v23 = vadd.f32 %v576_v21, %v4601_v59  ;;  %940 = vmatmul.mubr.f32.gmra.mrb[14].mxu1 %v739_v18  ;;  %v741_v29 = vmul.f32 %v709_v12, %v613_v22 }
 0x137   : > { %v3966_v24 = vpop.eup %3965  ;;  %v653_v0 = vmul.f32 0.70710677, %v4689_v9  ;;  %v742_v27 = vmul.f32 %v710_v20, %v614_v19 }
 0x138   : > { %v3968_v28 = vpop.eup %3967  ;;  %v711_v26 = vadd.f32 1.0, %v3966_v24  ;;  %v654_v30 = vmul.f32 0.70710677, %v4693_v23  ;;  %v580_v31 = vpop.f32.mrb[26].mxu0  ;;  %v622_v8 = vmul.f32 0.5, %v4693_v23 }
 0x139   : > { %v712_v33 = vadd.f32 1.0, %v3968_v28  ;;  %3977 = verf.f32 %v653_v0  ;;  %v4699_v16 = vadd.f32 %v580_v31, %v4598_v58  ;;  %v582_v34 = vpop.f32.mrb[27].mxu0  ;;  %945 = vmatprep.mubr.f32.mxu1 %v742_v27 }
 0x13a   : > { %3979 = verf.f32 %v654_v30  ;;  %v583_v36 = vadd.f32 %v582_v34, %v4601_v59  ;;  %946 = vmatmul.mubr.f32.gmra.mrb[16].mxu1 %v741_v29  ;;  %v743_v43 = vmul.f32 %v711_v26, %v615_v35 }
 0x13b   : > { %v3970_v37 = vpop.eup %3969  ;;  %v655_v38 = vmul.f32 0.70710677, %v4699_v16  ;;  %v744_v41 = vmul.f32 %v712_v33, %v616_v32  ;;  %v623_v22 = vmul.f32 0.5, %v4699_v16 }
 0x13c   : > { %v3972_v42 = vpop.eup %3971  ;;  %v713_v44 = vadd.f32 1.0, %v3970_v37  ;;  %v656_v39 = vmul.f32 0.70710677, %v583_v36  ;;  %v586_v45 = vpop.f32.mrb[28].mxu0  ;;  %v624_v20 = vmul.f32 0.5, %v583_v36 }
 0x13d   : > { %v714_v47 = vadd.f32 1.0, %v3972_v42  ;;  %3981 = verf.f32 %v655_v38  ;;  %v587_v48 = vadd.f32 %v586_v45, %v4598_v58  ;;  %v588_v25 = vpop.f32.mrb[29].mxu0  ;;  %951 = vmatprep.mubr.f32.mxu1 %v744_v41  ;;  %v1199_v41 = vld [vmem:[#allocation2 + $0x168] sm:$0xff]  ;;  %v1201_v42 = vld [vmem:[#allocation2 + $0x178] sm:$0xff]  ;;  %v1200_v45 = vld [vmem:[#allocation2 + $0x170] sm:$0xff] }
 0x13e   : > { %3983 = verf.f32 %v656_v39  ;;  %v589_v50 = vadd.f32 %v588_v25, %v4601_v59  ;;  %952 = vmatmul.mubr.f32.gmra.mrb[18].mxu1 %v743_v43  ;;  %v745_v53 = vmul.f32 %v713_v44, %v617_v49  ;;  %v3768_v44 = vpack.c.bf16 %v1201_v42, %v1199_v41  ;;  %v1198_v39 = vld [vmem:[#allocation2 + $0x160] sm:$0xff]  ;;  %v1204_v49 = vld [vmem:[#allocation2 + $0x190] sm:$0xff] }
 0x13f   : > { %v3974_v51 = vpop.eup %3973  ;;  %v657_v52 = vmul.f32 0.70710677, %v587_v48  ;;  %v746_v57 = vmul.f32 %v714_v47, %v618_v46  ;;  %v625_v30 = vmul.f32 0.5, %v587_v48  ;;  %v3770_v43 = vpack.c.bf16 %v1200_v45, %v1198_v39  ;;  %v1203_v46 = vld [vmem:[#allocation2 + $0x188] sm:$0xff]  ;;  %v1205_v47 = vld [vmem:[#allocation2 + $0x198] sm:$0xff]  ;;  %v1202_v25 = vld [vmem:[#allocation2 + $0x180] sm:$0xff] }
 0x140   : > { %v3976_v60 = vpop.eup %3975  ;;  %v715_v62 = vadd.f32 1.0, %v3974_v51  ;;  %v658_v63 = vmul.f32 0.70710677, %v589_v50  ;;  %v592_v61 = vpop.f32.mrb[30].mxu0  ;;  %v626_v26 = vmul.f32 0.5, %v589_v50  ;;  %3769 = vmatprep.subr.bf16.mxu0 %v3768_v44  ;;  %v3772_v48 = vpack.c.bf16 %v1205_v47, %v1203_v46  ;;  %v1207_v51 = vld [vmem:[#allocation2 + $0x1a8] sm:$0xff] }
 0x141   : > { %v716_v2 = vadd.f32 1.0, %v3976_v60  ;;  %3985 = verf.f32 %v657_v52  ;;  %v593_v3 = vadd.f32 %v592_v61, %v4598_v58  ;;  %v594_v4 = vpop.f32.mrb[31].mxu0  ;;  %957 = vmatprep.mubr.f32.mxu1 %v746_v57  ;;  %v621_v58 = vmul.f32 0.5, %v4689_v9  ;;  %3771 = vmatpush1.bf16.msra.mxu0 %v3770_v43  ;;  %v1209_v52 = vld [vmem:[#allocation2 + $0x1b8] sm:$0xff]  ;;  %v1206_v60 = vld [vmem:[#allocation2 + $0x1a0] sm:$0xff]  ;;  %v1211_v61 = vld [vmem:[#allocation2 + $0x1c8] sm:$0xff] }
 0x142   : > { %3987 = verf.f32 %v658_v63  ;;  %v595_v5 = vadd.f32 %v594_v4, %v4601_v59  ;;  %958 = vmatmul.mubr.f32.gmra.mrb[20].mxu1 %v745_v53  ;;  %v747_v12 = vmul.f32 %v715_v62, %v619_v40  ;;  %v3774_v50 = vpack.c.bf16 %v1204_v49, %v1202_v25  ;;  %3773 = vmatprep.subr.bf16.mxu0 %v3772_v48  ;;  %v1208_v62 = vld [vmem:[#allocation2 + $0x1b0] sm:$0xff]  ;;  %v1213_v53 = vld [vmem:[#allocation2 + $0x1d8] sm:$0xff]  ;;  %v1215_v40 = vld [vmem:[#allocation2 + $0x1e8] sm:$0xff] }
 0x143   : > { %v3978_v6 = vpop.eup %3977  ;;  %v659_v7 = vmul.f32 0.70710677, %v593_v3  ;;  %v748_v10 = vmul.f32 %v716_v2, %v620_v1  ;;  %v627_v16 = vmul.f32 0.5, %v593_v3  ;;  %v3776_v57 = vpack.c.bf16 %v1209_v52, %v1207_v51  ;;  %v1210_v2 = vld [vmem:[#allocation2 + $0x1c0] sm:$0xff]  ;;  %v1212_v3 = vld [vmem:[#allocation2 + $0x1d0] sm:$0xff] }
 0x144   : > { %v3980_v11 = vpop.eup %3979  ;;  %v717_v13 = vadd.f32 1.0, %v3978_v6  ;;  %v660_v14 = vmul.f32 0.70710677, %v595_v5  ;;  %v628_v35 = vmul.f32 0.5, %v595_v5  ;;  %v3778_v63 = vpack.c.bf16 %v1208_v62, %v1206_v60  ;;  %v1217_v5 = vld [vmem:[#allocation2 + $0x1f8] sm:$0xff] }
 0x145   : > { %v718_v15 = vadd.f32 1.0, %v3980_v11  ;;  %3989 = verf.f32 %v659_v7  ;;  %963 = vmatprep.mubr.f32.mxu1 %v748_v10  ;;  %3775 = vmatpush1.bf16.msra.mxu0 %v3774_v50  ;;  %v3780_v1 = vpack.c.bf16 %v1213_v53, %v1211_v61  ;;  %v3782_v4 = vpack.c.bf16 %v1212_v3, %v1210_v2  ;;  %v1214_v7 = vld [vmem:[#allocation2 + $0x1e0] sm:$0xff]  ;;  %v1216_v10 = vld [vmem:[#allocation2 + $0x1f0] sm:$0xff] }
 0x146   : > { %3991 = verf.f32 %v660_v14  ;;  %964 = vmatmul.mubr.f32.gmra.mrb[22].mxu1 %v747_v12  ;;  %v749_v19 = vmul.f32 %v717_v13, %v621_v58  ;;  %3777 = vmatprep.subr.bf16.mxu0 %v3776_v57  ;;  %v3784_v6 = vpack.c.bf16 %v1217_v5, %v1215_v40  ;;  %v3786_v11 = vpack.c.bf16 %v1216_v10, %v1214_v7  ;;  %v1567_v13 = vld [vmem:[%s6413_s7 + $0x80] sm:$0xff]  ;;  %v1568_v14 = vld [vmem:[%s6413_s7 + $0x88] sm:$0xff]  ;;  %v1569_v58 = vld [vmem:[%s6413_s7 + $0x90] sm:$0xff] }
 0x147   : > { %v3982_v55 = vpop.eup %3981  ;;  %v750_v17 = vmul.f32 %v718_v15, %v622_v8  ;;  %v1551_v12 = vld [vmem:[%s6413_s7] sm:$0xff]  ;;  %v3788_v8 = vpack.c.bf16 %v1568_v14, %v1567_v13  ;;  %v1552_v15 = vld [vmem:[%s6413_s7 + $0x8] sm:$0xff] }
 0x148   : > { %v3984_v59 = vpop.eup %3983  ;;  %v719_v18 = vadd.f32 1.0, %v3982_v55  ;;  %v1570_v55 = vld [vmem:[%s6413_s7 + $0x98] sm:$0xff] }
 0x149   : > { %v720_v21 = vadd.f32 1.0, %v3984_v59  ;;  %969 = vmatprep.mubr.f32.mxu1 %v750_v17  ;;  %3779 = vmatpush1.bf16.msra.mxu0 %v3778_v63  ;;  %v4733_v17 = vpack.c.bf16 %v1552_v15, %v1551_v12  ;;  %v4735_v59 = vpack.c.bf16 %v1570_v55, %v1569_v58 }
 0x14a   : > { %970 = vmatmul.mubr.f32.gmra.mrb[24].mxu1 %v749_v19  ;;  %v751_v28 = vmul.f32 %v719_v18, %v623_v22  ;;  %3781 = vmatprep.subr.bf16.mxu0 %v3780_v1  ;;  %v1553_v18 = vld [vmem:[%s6413_s7 + $0x10] sm:$0xff]  ;;  %v1554_v19 = vld [vmem:[%s6413_s7 + $0x18] sm:$0xff] }
 0x14b   : > { %v3986_v24 = vpop.eup %3985  ;;  %v752_v23 = vmul.f32 %v720_v21, %v624_v20  ;;  %3820 = vmatprep.subr.bf16.mxu1 %v3788_v8  ;;  %v1571_v20 = vld [vmem:[%s6413_s7 + $0xa0] sm:$0xff]  ;;  %v1572_v21 = vld [vmem:[%s6413_s7 + $0xa8] sm:$0xff]  ;;  %v4751_v22 = vpack.c.bf16 %v1554_v19, %v1553_v18 }
 0x14c   : > { %v3988_v0 = vpop.eup %3987  ;;  %v721_v27 = vadd.f32 1.0, %v3986_v24  ;;  %3828 = vmatpush3.bf16.msra.mxu1 %v4733_v17  ;;  %v4753_v24 = vpack.c.bf16 %v1572_v21, %v1571_v20 }
 0x14d   : > { %v722_v9 = vadd.f32 1.0, %v3988_v0  ;;  %975 = vmatprep.mubr.f32.mxu1 %v752_v23  ;;  %3783 = vmatpush1.bf16.msra.mxu0 %v3782_v4  ;;  %v1555_v23 = vld [vmem:[%s6413_s7 + $0x20] sm:$0xff]  ;;  %v1556_v0 = vld [vmem:[%s6413_s7 + $0x28] sm:$0xff] }
 0x14e   : > { %976 = vmatmul.mubr.f32.gmra.mrb[26].mxu1 %v751_v28  ;;  %v753_v34 = vmul.f32 %v721_v27, %v625_v30  ;;  %3785 = vmatprep.subr.bf16.mxu0 %v3784_v6  ;;  %v4763_v27 = vpack.c.bf16 %v1556_v0, %v1555_v23  ;;  %v821_v28 = vld [vmem:[%s6410_s4] sm:$0x3] }
 0x14f   : > { %v3990_v31 = vpop.eup %3989  ;;  %v754_v29 = vmul.f32 %v722_v9, %v626_v26  ;;  %3821 = vmatprep.subr.bf16.mxu1 %v4735_v59  ;;  %v4770_v26 = vrot.slane %v821_v28, %v4590_v54  ;;  %v4773_v9 = vrot.slane %v821_v28, %v4595_v56 }
 0x150   : > { %v3992_v32 = vpop.eup %3991  ;;  %v723_v33 = vadd.f32 1.0, %v3990_v31  ;;  %3829 = vmatpush3.bf16.msra.mxu1 %v4751_v22 }
 0x151   : > { %v724_v36 = vadd.f32 1.0, %v3992_v32  ;;  %981 = vmatprep.mubr.f32.mxu1 %v754_v29  ;;  %3787 = vmatpush1.bf16.msra.mxu0 %v3786_v11 }
 0x152   : > { %982 = vmatmul.mubr.f32.gmra.mrb[28].mxu1 %v753_v34  ;;  %v755_v38 = vmul.f32 %v723_v33, %v627_v16  ;;  %3789 = vmatprep.subr.bf16.mxu0 %v3788_v8 }
 0x153   : > { %v756_v37 = vmul.f32 %v724_v36, %v628_v35  ;;  %3822 = vmatprep.subr.bf16.mxu1 %v4753_v24 }
 0x154   : > { %3830 = vmatpush3.bf16.msra.mxu1 %v4763_v27 }
 0x155   : > { %987 = vmatprep.mubr.f32.mxu1 %v756_v37 }
 0x156   : > { %988 = vmatmul.mubr.f32.gmra.mrb[30].mxu1 %v755_v38 }
 0x1ed   : > { %v899_v30 = vpop.f32.mrb[0].mxu1 }
 0x1ee   : > { %v900_v31 = vadd.f32 %v899_v30, %v4770_v26  ;;  %v901_v29 = vpop.f32.mrb[1].mxu1 }
 0x1ef   : > { %v902_v32 = vadd.f32 %v901_v29, %v4773_v9 }
 0x1f0   : > { %v1026_v33 = vmul.f32 0.70710677, %v900_v31  ;;  %v994_v2 = vmul.f32 0.5, %v900_v31 }
 0x1f1   : > { %v1027_v34 = vmul.f32 0.70710677, %v902_v32  ;;  %v905_v35 = vpop.f32.mrb[2].mxu1  ;;  %v995_v63 = vmul.f32 0.5, %v902_v32 }
 0x1f2   : > { %3993 = verf.f32 %v1026_v33  ;;  %v906_v36 = vadd.f32 %v905_v35, %v4770_v26  ;;  %v907_v16 = vpop.f32.mrb[3].mxu1 }
 0x1f3   : > { %3995 = verf.f32 %v1027_v34  ;;  %v908_v37 = vadd.f32 %v907_v16, %v4773_v9 }
 0x1f4   : > { %v1028_v38 = vmul.f32 0.70710677, %v906_v36  ;;  %v996_v58 = vmul.f32 0.5, %v906_v36 }
 0x1f5   : > { %v1029_v41 = vmul.f32 0.70710677, %v908_v37  ;;  %v911_v42 = vpop.f32.mrb[4].mxu1  ;;  %v997_v14 = vmul.f32 0.5, %v908_v37 }
 0x1f6   : > { %3997 = verf.f32 %v1028_v38  ;;  %v912_v44 = vadd.f32 %v911_v42, %v4770_v26  ;;  %v913_v39 = vpop.f32.mrb[5].mxu1 }
 0x1f7   : > { %3999 = verf.f32 %v1029_v41  ;;  %v914_v45 = vadd.f32 %v913_v39, %v4773_v9 }
 0x1f8   : > { %v1030_v43 = vmul.f32 0.70710677, %v912_v44  ;;  %v998_v34 = vmul.f32 0.5, %v912_v44 }
 0x1f9   : > { %v1031_v46 = vmul.f32 0.70710677, %v914_v45  ;;  %v917_v47 = vpop.f32.mrb[6].mxu1  ;;  %v999_v31 = vmul.f32 0.5, %v914_v45 }
 0x1fa   : > { %4001 = verf.f32 %v1030_v43  ;;  %v4782_v48 = vadd.f32 %v917_v47, %v4770_v26  ;;  %v919_v25 = vpop.f32.mrb[7].mxu1 }
 0x1fb   : > { %4003 = verf.f32 %v1031_v46  ;;  %v920_v49 = vadd.f32 %v919_v25, %v4773_v9 }
 0x1fc   : > { %v3994_v50 = vpop.eup %3993  ;;  %v1032_v51 = vmul.f32 0.70710677, %v4782_v48  ;;  %v1000_v46 = vmul.f32 0.5, %v4782_v48 }
 0x1fd   : > { %v3996_v52 = vpop.eup %3995  ;;  %v1090_v57 = vadd.f32 1.0, %v3994_v50  ;;  %v1033_v60 = vmul.f32 0.70710677, %v920_v49  ;;  %v923_v62 = vpop.f32.mrb[8].mxu1  ;;  %v1001_v44 = vmul.f32 0.5, %v920_v49 }
 0x1fe   : > { %v1091_v61 = vadd.f32 1.0, %v3996_v52  ;;  %4005 = verf.f32 %v1032_v51  ;;  %v4787_v53 = vadd.f32 %v923_v62, %v4770_v26  ;;  %v925_v1 = vpop.f32.mrb[9].mxu1 }
 0x1ff   : > { %4007 = verf.f32 %v1033_v60  ;;  %v4790_v3 = vadd.f32 %v925_v1, %v4773_v9  ;;  %v1122_v7 = vmul.f32 %v1090_v57, %v994_v2 }
 0x200   : > { %v3998_v4 = vpop.eup %3997  ;;  %v1034_v40 = vmul.f32 0.70710677, %v4787_v53  ;;  %v1123_v5 = vmul.f32 %v1091_v61, %v995_v63  ;;  %v1002_v61 = vmul.f32 0.5, %v4787_v53 }
 0x201   : > { %v4000_v6 = vpop.eup %3999  ;;  %v1092_v10 = vadd.f32 1.0, %v3998_v4  ;;  %v1035_v11 = vmul.f32 0.70710677, %v4790_v3  ;;  %v929_v13 = vpop.f32.mrb[10].mxu1  ;;  %v1003_v60 = vmul.f32 0.5, %v4790_v3 }
 0x202   : > { %v1093_v12 = vadd.f32 1.0, %v4000_v6  ;;  %4009 = verf.f32 %v1034_v40  ;;  %v4795_v8 = vadd.f32 %v929_v13, %v4770_v26  ;;  %v931_v15 = vpop.f32.mrb[11].mxu1  ;;  %1294 = vmatprep.mubr.f32.mxu0 %v1123_v5 }
 0x203   : > { %4011 = verf.f32 %v1035_v11  ;;  %v4798_v55 = vadd.f32 %v931_v15, %v4773_v9  ;;  %1295 = vmatmul.mubr.f32.vlgmr.msra.gmra.mrb[32].mxu0 %v1122_v7  ;;  %v1124_v30 = vmul.f32 %v1092_v10, %v996_v58 }
 0x204   : > { %v4002_v18 = vpop.eup %4001  ;;  %v1036_v19 = vmul.f32 0.70710677, %v4795_v8  ;;  %v1125_v20 = vmul.f32 %v1093_v12, %v997_v14  ;;  %3791 = vmatpush3.bf16.msra.mxu0 %v4733_v17  ;;  %v1004_v14 = vmul.f32 0.5, %v4795_v8 }
 0x205   : > { %v4004_v21 = vpop.eup %4003  ;;  %v1094_v23 = vadd.f32 1.0, %v4002_v18  ;;  %v1037_v0 = vmul.f32 0.70710677, %v4798_v55  ;;  %v935_v28 = vpop.f32.mrb[12].mxu1  ;;  %3793 = vmatprep.subr.bf16.mxu0 %v4735_v59  ;;  %v1005_v10 = vmul.f32 0.5, %v4798_v55 }
 0x206   : > { %v1095_v29 = vadd.f32 1.0, %v4004_v21  ;;  %4013 = verf.f32 %v1036_v19  ;;  %v4805_v32 = vadd.f32 %v935_v28, %v4770_v26  ;;  %v937_v33 = vpop.f32.mrb[13].mxu1  ;;  %1300 = vmatprep.mubr.f32.mxu0 %v1125_v20 }
 0x207   : > { %4015 = verf.f32 %v1037_v0  ;;  %v4808_v17 = vadd.f32 %v937_v33, %v4773_v9  ;;  %1301 = vmatmul.mubr.f32.gmra.mrb[34].mxu0 %v1124_v30  ;;  %v1126_v42 = vmul.f32 %v1094_v23, %v998_v34 }
 0x208   : > { %v4006_v35 = vpop.eup %4005  ;;  %v1038_v36 = vmul.f32 0.70710677, %v4805_v32  ;;  %v1127_v16 = vmul.f32 %v1095_v29, %v999_v31  ;;  %3795 = vmatpush3.bf16.msra.mxu0 %v4751_v22  ;;  %v1006_v31 = vmul.f32 0.5, %v4805_v32 }
 0x209   : > { %v4008_v59 = vpop.eup %4007  ;;  %v1096_v37 = vadd.f32 1.0, %v4006_v35  ;;  %v1039_v38 = vmul.f32 0.70710677, %v4808_v17  ;;  %v941_v41 = vpop.f32.mrb[14].mxu1  ;;  %3797 = vmatprep.subr.bf16.mxu0 %v4753_v24  ;;  %v1007_v0 = vmul.f32 0.5, %v4808_v17 }
 0x20a   : > { %v1097_v39 = vadd.f32 1.0, %v4008_v59  ;;  %4017 = verf.f32 %v1038_v36  ;;  %v4815_v45 = vadd.f32 %v941_v41, %v4770_v26  ;;  %v943_v43 = vpop.f32.mrb[15].mxu1  ;;  %1306 = vmatprep.mubr.f32.mxu0 %v1127_v16 }
 0x20b   : > { %4019 = verf.f32 %v1039_v38  ;;  %v4819_v22 = vadd.f32 %v943_v43, %v4773_v9  ;;  %1307 = vmatmul.mubr.f32.gmra.mrb[36].mxu0 %v1126_v42  ;;  %v1128_v57 = vmul.f32 %v1096_v37, %v1000_v46 }
 0x20c   : > { %v4010_v47 = vpop.eup %4009  ;;  %v1040_v25 = vmul.f32 0.70710677, %v4815_v45  ;;  %v1129_v50 = vmul.f32 %v1097_v39, %v1001_v44  ;;  %3799 = vmatpush3.bf16.msra.mxu0 %v4763_v27  ;;  %v1008_v44 = vmul.f32 0.5, %v4815_v45 }
 0x20d   : > { %v4012_v24 = vpop.eup %4011  ;;  %v1098_v49 = vadd.f32 1.0, %v4010_v47  ;;  %v1041_v51 = vmul.f32 0.70710677, %v4819_v22  ;;  %v947_v52 = vpop.f32.mrb[16].mxu1  ;;  %v1009_v38 = vmul.f32 0.5, %v4819_v22 }
 0x20e   : > { %v1099_v48 = vadd.f32 1.0, %v4012_v24  ;;  %4021 = verf.f32 %v1040_v25  ;;  %v4826_v62 = vadd.f32 %v947_v52, %v4770_v26  ;;  %v949_v63 = vpop.f32.mrb[17].mxu1  ;;  %1312 = vmatprep.mubr.f32.mxu0 %v1129_v50 }
 0x20f   : > { %4023 = verf.f32 %v1041_v51  ;;  %v4830_v27 = vadd.f32 %v949_v63, %v4773_v9  ;;  %1313 = vmatmul.mubr.f32.gmra.mrb[38].mxu0 %v1128_v57  ;;  %v1130_v7 = vmul.f32 %v1098_v49, %v1002_v61 }
 0x210   : > { %v4014_v1 = vpop.eup %4013  ;;  %v1042_v2 = vmul.f32 0.70710677, %v4826_v62  ;;  %v1131_v4 = vmul.f32 %v1099_v48, %v1003_v60  ;;  %v1010_v60 = vmul.f32 0.5, %v4826_v62 }
 0x211   : > { %v4016_v40 = vpop.eup %4015  ;;  %v1100_v3 = vadd.f32 1.0, %v4014_v1  ;;  %v1043_v5 = vmul.f32 0.70710677, %v4830_v27  ;;  %v953_v6 = vpop.f32.mrb[18].mxu1  ;;  %v1011_v51 = vmul.f32 0.5, %v4830_v27 }
 0x212   : > { %v1101_v11 = vadd.f32 1.0, %v4016_v40  ;;  %4025 = verf.f32 %v1042_v2  ;;  %v4836_v53 = vadd.f32 %v953_v6, %v4770_v26  ;;  %v955_v13 = vpop.f32.mrb[19].mxu1  ;;  %1318 = vmatprep.mubr.f32.mxu0 %v1131_v4 }
 0x213   : > { %4027 = verf.f32 %v1043_v5  ;;  %v4840_v12 = vadd.f32 %v955_v13, %v4773_v9  ;;  %1319 = vmatmul.mubr.f32.gmra.mrb[40].mxu0 %v1130_v7  ;;  %v1132_v23 = vmul.f32 %v1100_v3, %v1004_v14 }
 0x214   : > { %v4018_v15 = vpop.eup %4017  ;;  %v1044_v58 = vmul.f32 0.70710677, %v4836_v53  ;;  %v1133_v18 = vmul.f32 %v1101_v11, %v1005_v10  ;;  %v1012_v10 = vmul.f32 0.5, %v4836_v53 }
 0x215   : > { %v4020_v19 = vpop.eup %4019  ;;  %v1102_v55 = vadd.f32 1.0, %v4018_v15  ;;  %v1045_v20 = vmul.f32 0.70710677, %v4840_v12  ;;  %v959_v21 = vpop.f32.mrb[20].mxu1  ;;  %v1013_v5 = vmul.f32 0.5, %v4840_v12 }
 0x216   : > { %v1103_v28 = vadd.f32 1.0, %v4020_v19  ;;  %4029 = verf.f32 %v1044_v58  ;;  %v4846_v8 = vadd.f32 %v959_v21, %v4770_v26  ;;  %v961_v30 = vpop.f32.mrb[21].mxu1  ;;  %1324 = vmatprep.mubr.f32.mxu0 %v1133_v18 }
 0x217   : > { %4031 = verf.f32 %v1045_v20  ;;  %v4850_v29 = vadd.f32 %v961_v30, %v4773_v9  ;;  %1325 = vmatmul.mubr.f32.gmra.mrb[42].mxu0 %v1132_v23  ;;  %v1134_v37 = vmul.f32 %v1102_v55, %v1006_v31 }
 0x218   : > { %v4022_v33 = vpop.eup %4021  ;;  %v1046_v34 = vmul.f32 0.70710677, %v4846_v8  ;;  %v1135_v35 = vmul.f32 %v1103_v28, %v1007_v0  ;;  %v1014_v0 = vmul.f32 0.5, %v4846_v8 }
 0x219   : > { %v4024_v36 = vpop.eup %4023  ;;  %v1104_v17 = vadd.f32 1.0, %v4022_v33  ;;  %v1047_v16 = vmul.f32 0.70710677, %v4850_v29  ;;  %v965_v59 = vpop.f32.mrb[22].mxu1  ;;  %v1015_v20 = vmul.f32 0.5, %v4850_v29 }
 0x21a   : > { %v1105_v41 = vadd.f32 1.0, %v4024_v36  ;;  %4033 = verf.f32 %v1046_v34  ;;  %v4856_v32 = vadd.f32 %v965_v59, %v4770_v26  ;;  %v967_v42 = vpop.f32.mrb[23].mxu1  ;;  %1330 = vmatprep.mubr.f32.mxu0 %v1135_v35 }
 0x21b   : > { %4035 = verf.f32 %v1047_v16  ;;  %v4860_v39 = vadd.f32 %v967_v42, %v4773_v9  ;;  %1331 = vmatmul.mubr.f32.gmra.mrb[44].mxu0 %v1134_v37  ;;  %v1136_v49 = vmul.f32 %v1104_v17, %v1008_v44 }
 0x21c   : > { %v4026_v43 = vpop.eup %4025  ;;  %v1048_v46 = vmul.f32 0.70710677, %v4856_v32  ;;  %v1137_v47 = vmul.f32 %v1105_v41, %v1009_v38  ;;  %v1016_v8 = vmul.f32 0.5, %v4856_v32 }
 0x21d   : > { %v4028_v25 = vpop.eup %4027  ;;  %v1106_v22 = vadd.f32 1.0, %v4026_v43  ;;  %v1049_v50 = vmul.f32 0.70710677, %v4860_v39  ;;  %v971_v24 = vpop.f32.mrb[24].mxu1  ;;  %v1017_v16 = vmul.f32 0.5, %v4860_v39 }
 0x21e   : > { %v1107_v52 = vadd.f32 1.0, %v4028_v25  ;;  %4037 = verf.f32 %v1048_v46  ;;  %v4866_v45 = vadd.f32 %v971_v24, %v4770_v26  ;;  %v973_v57 = vpop.f32.mrb[25].mxu1  ;;  %1336 = vmatprep.mubr.f32.mxu0 %v1137_v47 }
 0x21f   : > { %4039 = verf.f32 %v1049_v50  ;;  %v4870_v48 = vadd.f32 %v973_v57, %v4773_v9  ;;  %1337 = vmatmul.mubr.f32.gmra.mrb[46].mxu0 %v1136_v49  ;;  %v1138_v3 = vmul.f32 %v1106_v22, %v1010_v60 }
 0x220   : > { %v4030_v63 = vpop.eup %4029  ;;  %v1050_v61 = vmul.f32 0.70710677, %v4866_v45  ;;  %v1139_v1 = vmul.f32 %v1107_v52, %v1011_v51 }
 0x221   : > { %v4032_v2 = vpop.eup %4031  ;;  %v1108_v27 = vadd.f32 1.0, %v4030_v63  ;;  %v1051_v4 = vmul.f32 0.70710677, %v4870_v48  ;;  %v977_v40 = vpop.f32.mrb[26].mxu1  ;;  %v1019_v39 = vmul.f32 0.5, %v4870_v48 }
 0x222   : > { %v1109_v6 = vadd.f32 1.0, %v4032_v2  ;;  %4041 = verf.f32 %v1050_v61  ;;  %v4876_v62 = vadd.f32 %v977_v40, %v4770_v26  ;;  %v979_v7 = vpop.f32.mrb[27].mxu1  ;;  %1342 = vmatprep.mubr.f32.mxu0 %v1139_v1 }
 0x223   : > { %4043 = verf.f32 %v1051_v4  ;;  %v980_v11 = vadd.f32 %v979_v7, %v4773_v9  ;;  %1343 = vmatmul.mubr.f32.gmra.mrb[48].mxu0 %v1138_v3  ;;  %v1140_v55 = vmul.f32 %v1108_v27, %v1012_v10 }
 0x224   : > { %v4034_v13 = vpop.eup %4033  ;;  %v1052_v14 = vmul.f32 0.70710677, %v4876_v62  ;;  %v1141_v15 = vmul.f32 %v1109_v6, %v1013_v5  ;;  %v1020_v60 = vmul.f32 0.5, %v4876_v62 }
 0x225   : > { %v4036_v58 = vpop.eup %4035  ;;  %v1110_v18 = vadd.f32 1.0, %v4034_v13  ;;  %v1053_v12 = vmul.f32 0.70710677, %v980_v11  ;;  %v983_v19 = vpop.f32.mrb[28].mxu1  ;;  %v1021_v52 = vmul.f32 0.5, %v980_v11 }
 0x226   : > { %v1111_v21 = vadd.f32 1.0, %v4036_v58  ;;  %4045 = verf.f32 %v1052_v14  ;;  %v984_v23 = vadd.f32 %v983_v19, %v4770_v26  ;;  %v985_v53 = vpop.f32.mrb[29].mxu1  ;;  %1348 = vmatprep.mubr.f32.mxu0 %v1141_v15  ;;  %v1573_v15 = vld [vmem:[%s6413_s7 + $0xb0] sm:$0xff]  ;;  %v1574_v58 = vld [vmem:[%s6413_s7 + $0xb8] sm:$0xff] }
 0x227   : > { %4047 = verf.f32 %v1053_v12  ;;  %v986_v28 = vadd.f32 %v985_v53, %v4773_v9  ;;  %1349 = vmatmul.mubr.f32.gmra.mrb[50].mxu0 %v1140_v55  ;;  %v1142_v29 = vmul.f32 %v1110_v18, %v1014_v0  ;;  %v3800_v18 = vpack.c.bf16 %v1574_v58, %v1573_v15  ;;  %v1557_v12 = vld [vmem:[%s6413_s7 + $0x30] sm:$0xff]  ;;  %v1558_v19 = vld [vmem:[%s6413_s7 + $0x38] sm:$0xff]  ;;  %v1559_v53 = vld [vmem:[%s6413_s7 + $0x40] sm:$0xff] }
 0x228   : > { %v4038_v30 = vpop.eup %4037  ;;  %v1054_v31 = vmul.f32 0.70710677, %v984_v23  ;;  %v1143_v33 = vmul.f32 %v1111_v21, %v1015_v20  ;;  %v1022_v4 = vmul.f32 0.5, %v984_v23  ;;  %v3802_v55 = vpack.c.bf16 %v1558_v19, %v1557_v12  ;;  %v1575_v20 = vld [vmem:[%s6413_s7 + $0xc0] sm:$0xff]  ;;  %v1576_v21 = vld [vmem:[%s6413_s7 + $0xc8] sm:$0xff] }
 0x229   : > { %v4040_v34 = vpop.eup %4039  ;;  %v1112_v35 = vadd.f32 1.0, %v4038_v30  ;;  %v1055_v36 = vmul.f32 0.70710677, %v986_v28  ;;  %v989_v17 = vpop.f32.mrb[30].mxu1  ;;  %v1023_v27 = vmul.f32 0.5, %v986_v28  ;;  %3801 = vmatprep.subr.bf16.mxu0 %v3800_v18  ;;  %3823 = vmatprep.subr.bf16.mxu1 %v3800_v18  ;;  %v3804_v23 = vpack.c.bf16 %v1576_v21, %v1575_v20  ;;  %v1560_v0 = vld [vmem:[%s6413_s7 + $0x48] sm:$0xff] }
 0x22a   : > { %v1113_v59 = vadd.f32 1.0, %v4040_v34  ;;  %4049 = verf.f32 %v1054_v31  ;;  %v990_v37 = vadd.f32 %v989_v17, %v4770_v26  ;;  %v991_v38 = vpop.f32.mrb[31].mxu1  ;;  %1354 = vmatprep.mubr.f32.mxu0 %v1143_v33  ;;  %v1018_v26 = vmul.f32 0.5, %v4866_v45  ;;  %3803 = vmatpush3.bf16.msra.mxu0 %v3802_v55  ;;  %v1577_v30 = vld [vmem:[%s6413_s7 + $0xd0] sm:$0xff]  ;;  %v1578_v31 = vld [vmem:[%s6413_s7 + $0xd8] sm:$0xff]  ;;  %v1579_v17 = vld [vmem:[%s6413_s7 + $0xe0] sm:$0xff] }
 0x22b   : > { %4051 = verf.f32 %v1055_v36  ;;  %v992_v41 = vadd.f32 %v991_v38, %v4773_v9  ;;  %1355 = vmatmul.mubr.f32.gmra.mrb[52].mxu0 %v1142_v29  ;;  %v1144_v22 = vmul.f32 %v1112_v35, %v1016_v8  ;;  %3831 = vmatpush3.bf16.msra.mxu1 %v3802_v55  ;;  %v3806_v28 = vpack.c.bf16 %v1560_v0, %v1559_v53  ;;  %v1561_v34 = vld [vmem:[%s6413_s7 + $0x50] sm:$0xff]  ;;  %v1562_v35 = vld [vmem:[%s6413_s7 + $0x58] sm:$0xff]  ;;  %v1580_v29 = vld [vmem:[%s6413_s7 + $0xe8] sm:$0xff] }
 0x22c   : > { %v4042_v42 = vpop.eup %4041  ;;  %v1056_v44 = vmul.f32 0.70710677, %v990_v37  ;;  %v1145_v43 = vmul.f32 %v1113_v59, %v1017_v16  ;;  %v1024_v62 = vmul.f32 0.5, %v990_v37  ;;  %3805 = vmatprep.subr.bf16.mxu0 %v3804_v23  ;;  %3824 = vmatprep.subr.bf16.mxu1 %v3804_v23  ;;  %v3808_v33 = vpack.c.bf16 %v1578_v31, %v1577_v30  ;;  %v1563_v59 = vld [vmem:[%s6413_s7 + $0x60] sm:$0xff]  ;;  %v1564_v37 = vld [vmem:[%s6413_s7 + $0x68] sm:$0xff]  ;;  %v1581_v8 = vld [vmem:[%s6413_s7 + $0xf0] sm:$0xff] }
 0x22d   : > { %v4044_v46 = vpop.eup %4043  ;;  %v1114_v47 = vadd.f32 1.0, %v4042_v42  ;;  %v1057_v25 = vmul.f32 0.70710677, %v992_v41  ;;  %v1025_v10 = vmul.f32 0.5, %v992_v41  ;;  %v3810_v36 = vpack.c.bf16 %v1562_v35, %v1561_v34  ;;  %v1582_v41 = vld [vmem:[%s6413_s7 + $0xf8] sm:$0xff] }
 0x22e   : > { %v1115_v50 = vadd.f32 1.0, %v4044_v46  ;;  %4053 = verf.f32 %v1056_v44  ;;  %1360 = vmatprep.mubr.f32.mxu0 %v1145_v43  ;;  %3807 = vmatpush3.bf16.msra.mxu0 %v3806_v28  ;;  %v3812_v16 = vpack.c.bf16 %v1580_v29, %v1579_v17  ;;  %v3814_v38 = vpack.c.bf16 %v1564_v37, %v1563_v59  ;;  %v1565_v44 = vld [vmem:[%s6413_s7 + $0x70] sm:$0xff]  ;;  %v1566_v43 = vld [vmem:[%s6413_s7 + $0x78] sm:$0xff] }
 0x22f   : > { %4055 = verf.f32 %v1057_v25  ;;  %1361 = vmatmul.mubr.f32.gmra.mrb[54].mxu0 %v1144_v22  ;;  %v1146_v51 = vmul.f32 %v1114_v47, %v1018_v26  ;;  %3832 = vmatpush3.bf16.msra.mxu1 %v3806_v28  ;;  %v3816_v42 = vpack.c.bf16 %v1582_v41, %v1581_v8  ;;  %v3818_v46 = vpack.c.bf16 %v1566_v43, %v1565_v44  ;;  %v1218_v47 = vld [vmem:[%s6412_s6] sm:$0x3] }
 0x230   : > { %v4046_v32 = vpop.eup %4045  ;;  %v1147_v24 = vmul.f32 %v1115_v50, %v1019_v39  ;;  %3809 = vmatprep.subr.bf16.mxu0 %v3808_v33  ;;  %3825 = vmatprep.subr.bf16.mxu1 %v3808_v33  ;;  %v4956_v25 = vrot.slane %v1218_v47, %v4590_v54  ;;  %v4959_v22 = vrot.slane %v1218_v47, %v4595_v56 }
 0x231   : > { %v4048_v9 = vpop.eup %4047  ;;  %v1116_v49 = vadd.f32 1.0, %v4046_v32 }
 0x232   : > { %v1117_v57 = vadd.f32 1.0, %v4048_v9  ;;  %1366 = vmatprep.mubr.f32.mxu0 %v1147_v24  ;;  %3811 = vmatpush3.bf16.msra.mxu0 %v3810_v36 }
 0x233   : > { %1367 = vmatmul.mubr.f32.gmra.mrb[56].mxu0 %v1146_v51  ;;  %v1148_v2 = vmul.f32 %v1116_v49, %v1020_v60  ;;  %3833 = vmatpush3.bf16.msra.mxu1 %v3810_v36 }
 0x234   : > { %v4050_v63 = vpop.eup %4049  ;;  %v1149_v48 = vmul.f32 %v1117_v57, %v1021_v52  ;;  %3813 = vmatprep.subr.bf16.mxu0 %v3812_v16  ;;  %3826 = vmatprep.subr.bf16.mxu1 %v3812_v16 }
 0x235   : > { %v4052_v61 = vpop.eup %4051  ;;  %v1118_v1 = vadd.f32 1.0, %v4050_v63 }
 0x236   : > { %v1119_v45 = vadd.f32 1.0, %v4052_v61  ;;  %1372 = vmatprep.mubr.f32.mxu0 %v1149_v48  ;;  %3815 = vmatpush3.bf16.msra.mxu0 %v3814_v38 }
 0x237   : > { %1373 = vmatmul.mubr.f32.gmra.mrb[58].mxu0 %v1148_v2  ;;  %v1150_v7 = vmul.f32 %v1118_v1, %v1022_v4  ;;  %3834 = vmatpush3.bf16.msra.mxu1 %v3814_v38 }
 0x238   : > { %v4054_v40 = vpop.eup %4053  ;;  %v1151_v3 = vmul.f32 %v1119_v45, %v1023_v27  ;;  %3817 = vmatprep.subr.bf16.mxu0 %v3816_v42  ;;  %3827 = vmatprep.subr.bf16.mxu1 %v3816_v42 }
 0x239   : > { %v4056_v5 = vpop.eup %4055  ;;  %v1120_v6 = vadd.f32 1.0, %v4054_v40 }
 0x23a   : > { %v1121_v11 = vadd.f32 1.0, %v4056_v5  ;;  %1378 = vmatprep.mubr.f32.mxu0 %v1151_v3  ;;  %3819 = vmatpush3.bf16.msra.mxu0 %v3818_v46 }
 0x23b   : > { %1379 = vmatmul.mubr.f32.gmra.mrb[60].mxu0 %v1150_v7  ;;  %v1152_v14 = vmul.f32 %v1120_v6, %v1024_v62  ;;  %3835 = vmatpush3.bf16.msra.mxu1 %v3818_v46 }
 0x23c   : > { %v1153_v13 = vmul.f32 %v1121_v11, %v1025_v10 }
 0x23e   : > { %1384 = vmatprep.mubr.f32.mxu0 %v1153_v13 }
 0x23f   : > { %1385 = vmatmul.mubr.f32.gmra.mrb[62].mxu0 %v1152_v14 }
 0x2d6   : > { %v1296_v39 = vpop.f32.mrb[32].mxu0 }
 0x2d7   : > { %v1297_v50 = vadd.f32 %v1296_v39, %v4956_v25  ;;  %v1298_v26 = vpop.f32.mrb[33].mxu0 }
 0x2d8   : > { %v1299_v32 = vadd.f32 %v1298_v26, %v4959_v22 }
 0x2d9   : > { %v1423_v24 = vmul.f32 0.70710677, %v1297_v50  ;;  %v1391_v58 = vmul.f32 0.5, %v1297_v50 }
 0x2da   : > { %v1424_v9 = vmul.f32 0.70710677, %v1299_v32  ;;  %v1302_v49 = vpop.f32.mrb[34].mxu0  ;;  %v1392_v62 = vmul.f32 0.5, %v1299_v32 }
 0x2db   : > { %4057 = verf.f32 %v1423_v24  ;;  %v1303_v51 = vadd.f32 %v1302_v49, %v4956_v25  ;;  %v1304_v52 = vpop.f32.mrb[35].mxu0 }
 0x2dc   : > { %4059 = verf.f32 %v1424_v9  ;;  %v1305_v54 = vadd.f32 %v1304_v52, %v4959_v22 }
 0x2dd   : > { %v1425_v57 = vmul.f32 0.70710677, %v1303_v51  ;;  %v1393_v34 = vmul.f32 0.5, %v1303_v51 }
 0x2de   : > { %v1426_v60 = vmul.f32 0.70710677, %v1305_v54  ;;  %v1308_v56 = vpop.f32.mrb[36].mxu0  ;;  %v1394_v28 = vmul.f32 0.5, %v1305_v54 }
 0x2df   : > { %4061 = verf.f32 %v1425_v57  ;;  %v1309_v63 = vadd.f32 %v1308_v56, %v4956_v25  ;;  %v1310_v48 = vpop.f32.mrb[37].mxu0 }
 0x2e0   : > { %4063 = verf.f32 %v1426_v60  ;;  %v1311_v61 = vadd.f32 %v1310_v48, %v4959_v22 }
 0x2e1   : > { %v1427_v1 = vmul.f32 0.70710677, %v1309_v63  ;;  %v1395_v46 = vmul.f32 0.5, %v1309_v63 }
 0x2e2   : > { %v1428_v2 = vmul.f32 0.70710677, %v1311_v61  ;;  %v1314_v27 = vpop.f32.mrb[38].mxu0  ;;  %v1396_v41 = vmul.f32 0.5, %v1311_v61 }
 0x2e3   : > { %4065 = verf.f32 %v1427_v1  ;;  %v4968_v45 = vadd.f32 %v1314_v27, %v4956_v25  ;;  %v1316_v4 = vpop.f32.mrb[39].mxu0 }
 0x2e4   : > { %4067 = verf.f32 %v1428_v2  ;;  %v1317_v40 = vadd.f32 %v1316_v4, %v4959_v22 }
 0x2e5   : > { %v4058_v3 = vpop.eup %4057  ;;  %v1429_v5 = vmul.f32 0.70710677, %v4968_v45  ;;  %v1397_v56 = vmul.f32 0.5, %v4968_v45 }
 0x2e6   : > { %v4060_v6 = vpop.eup %4059  ;;  %v1487_v7 = vadd.f32 1.0, %v4058_v3  ;;  %v1430_v10 = vmul.f32 0.70710677, %v1317_v40  ;;  %v1320_v11 = vpop.f32.mrb[40].mxu0  ;;  %v1398_v52 = vmul.f32 0.5, %v1317_v40 }
 0x2e7   : > { %v1488_v13 = vadd.f32 1.0, %v4060_v6  ;;  %4069 = verf.f32 %v1429_v5  ;;  %v4973_v14 = vadd.f32 %v1320_v11, %v4956_v25  ;;  %v1322_v15 = vpop.f32.mrb[41].mxu0 }
 0x2e8   : > { %4071 = verf.f32 %v1430_v10  ;;  %v4976_v18 = vadd.f32 %v1322_v15, %v4959_v22  ;;  %v1519_v21 = vmul.f32 %v1487_v7, %v1391_v58 }
 0x2e9   : > { %v4062_v12 = vpop.eup %4061  ;;  %v1431_v19 = vmul.f32 0.70710677, %v4973_v14  ;;  %v1520_v55 = vmul.f32 %v1488_v13, %v1392_v62  ;;  %v1399_v10 = vmul.f32 0.5, %v4973_v14 }
 0x2ea   : > { %v4064_v20 = vpop.eup %4063  ;;  %v1489_v23 = vadd.f32 1.0, %v4062_v12  ;;  %v1432_v53 = vmul.f32 0.70710677, %v4976_v18  ;;  %v1326_v0 = vpop.f32.mrb[42].mxu0  ;;  %v1400_v5 = vmul.f32 0.5, %v4976_v18 }
 0x2eb   : > { %v1490_v30 = vadd.f32 1.0, %v4064_v20  ;;  %4073 = verf.f32 %v1431_v19  ;;  %v4981_v31 = vadd.f32 %v1326_v0, %v4956_v25  ;;  %v1328_v33 = vpop.f32.mrb[43].mxu0  ;;  %1654 = vmatprep.mubr.f32.mxu0 %v1520_v55 }
 0x2ec   : > { %4075 = verf.f32 %v1432_v53  ;;  %v4984_v35 = vadd.f32 %v1328_v33, %v4959_v22  ;;  %1655 = vmatmul.mubr.f32.vlgmr.msra.gmra.mrb[64].mxu0 %v1519_v21  ;;  %v1521_v8 = vmul.f32 %v1489_v23, %v1393_v34 }
 0x2ed   : > { %v4066_v36 = vpop.eup %4065  ;;  %v1433_v17 = vmul.f32 0.70710677, %v4981_v31  ;;  %v1522_v29 = vmul.f32 %v1490_v30, %v1394_v28  ;;  %v1401_v53 = vmul.f32 0.5, %v4981_v31 }
 0x2ee   : > { %v4068_v16 = vpop.eup %4067  ;;  %v1491_v59 = vadd.f32 1.0, %v4066_v36  ;;  %v1434_v37 = vmul.f32 0.70710677, %v4984_v35  ;;  %v1332_v38 = vpop.f32.mrb[44].mxu0  ;;  %v1402_v20 = vmul.f32 0.5, %v4984_v35 }
 0x2ef   : > { %v1492_v42 = vadd.f32 1.0, %v4068_v16  ;;  %4077 = verf.f32 %v1433_v17  ;;  %v4989_v44 = vadd.f32 %v1332_v38, %v4956_v25  ;;  %v1334_v43 = vpop.f32.mrb[45].mxu0  ;;  %1659 = vmatprep.mubr.f32.mxu0 %v1522_v29 }
 0x2f0   : > { %4079 = verf.f32 %v1434_v37  ;;  %v4992_v47 = vadd.f32 %v1334_v43, %v4959_v22  ;;  %1660 = vmatmul.mubr.f32.gmra.mrb[66].mxu0 %v1521_v8  ;;  %v1523_v51 = vmul.f32 %v1491_v59, %v1395_v46 }
 0x2f1   : > { %v4070_v39 = vpop.eup %4069  ;;  %v1435_v50 = vmul.f32 0.70710677, %v4989_v44  ;;  %v1524_v26 = vmul.f32 %v1492_v42, %v1396_v41  ;;  %v1403_v38 = vmul.f32 0.5, %v4989_v44 }
 0x2f2   : > { %v4072_v32 = vpop.eup %4071  ;;  %v1493_v24 = vadd.f32 1.0, %v4070_v39  ;;  %v1436_v9 = vmul.f32 0.70710677, %v4992_v47  ;;  %v1338_v49 = vpop.f32.mrb[46].mxu0  ;;  %v1404_v16 = vmul.f32 0.5, %v4992_v47 }
 0x2f3   : > { %v1494_v54 = vadd.f32 1.0, %v4072_v32  ;;  %4081 = verf.f32 %v1435_v50  ;;  %v4997_v57 = vadd.f32 %v1338_v49, %v4956_v25  ;;  %v1340_v60 = vpop.f32.mrb[47].mxu0  ;;  %1664 = vmatprep.mubr.f32.mxu0 %v1524_v26 }
 0x2f4   : > { %4083 = verf.f32 %v1436_v9  ;;  %v5001_v63 = vadd.f32 %v1340_v60, %v4959_v22  ;;  %1665 = vmatmul.mubr.f32.gmra.mrb[68].mxu0 %v1523_v51  ;;  %v1525_v3 = vmul.f32 %v1493_v24, %v1397_v56 }
 0x2f5   : > { %v4074_v48 = vpop.eup %4073  ;;  %v1437_v61 = vmul.f32 0.70710677, %v4997_v57  ;;  %v1526_v1 = vmul.f32 %v1494_v54, %v1398_v52  ;;  %v1405_v49 = vmul.f32 0.5, %v4997_v57 }
 0x2f6   : > { %v4076_v2 = vpop.eup %4075  ;;  %v1495_v27 = vadd.f32 1.0, %v4074_v48  ;;  %v1438_v4 = vmul.f32 0.70710677, %v5001_v63  ;;  %v1344_v40 = vpop.f32.mrb[48].mxu0  ;;  %v1406_v32 = vmul.f32 0.5, %v5001_v63 }
 0x2f7   : > { %v1496_v6 = vadd.f32 1.0, %v4076_v2  ;;  %4085 = verf.f32 %v1437_v61  ;;  %v5007_v45 = vadd.f32 %v1344_v40, %v4956_v25  ;;  %v1346_v7 = vpop.f32.mrb[49].mxu0  ;;  %1669 = vmatprep.mubr.f32.mxu0 %v1526_v1 }
 0x2f8   : > { %4087 = verf.f32 %v1438_v4  ;;  %v5011_v11 = vadd.f32 %v1346_v7, %v4959_v22  ;;  %1670 = vmatmul.mubr.f32.gmra.mrb[70].mxu0 %v1525_v3  ;;  %v1527_v55 = vmul.f32 %v1495_v27, %v1399_v10 }
 0x2f9   : > { %v4078_v62 = vpop.eup %4077  ;;  %v1439_v13 = vmul.f32 0.70710677, %v5007_v45  ;;  %v1528_v15 = vmul.f32 %v1496_v6, %v1400_v5  ;;  %v1407_v40 = vmul.f32 0.5, %v5007_v45 }
 0x2fa   : > { %v4080_v58 = vpop.eup %4079  ;;  %v1497_v18 = vadd.f32 1.0, %v4078_v62  ;;  %v1440_v12 = vmul.f32 0.70710677, %v5011_v11  ;;  %v1350_v19 = vpop.f32.mrb[50].mxu0  ;;  %v1408_v2 = vmul.f32 0.5, %v5011_v11 }
 0x2fb   : > { %v1498_v21 = vadd.f32 1.0, %v4080_v58  ;;  %4089 = verf.f32 %v1439_v13  ;;  %v5017_v14 = vadd.f32 %v1350_v19, %v4956_v25  ;;  %v1352_v23 = vpop.f32.mrb[51].mxu0  ;;  %1674 = vmatprep.mubr.f32.mxu0 %v1528_v15 }
 0x2fc   : > { %4091 = verf.f32 %v1440_v12  ;;  %v5021_v0 = vadd.f32 %v1352_v23, %v4959_v22  ;;  %1675 = vmatmul.mubr.f32.gmra.mrb[72].mxu0 %v1527_v55  ;;  %v1529_v29 = vmul.f32 %v1497_v18, %v1401_v53 }
 0x2fd   : > { %v4082_v28 = vpop.eup %4081  ;;  %v1441_v30 = vmul.f32 0.70710677, %v5017_v14  ;;  %v1530_v33 = vmul.f32 %v1498_v21, %v1402_v20  ;;  %v1409_v19 = vmul.f32 0.5, %v5017_v14 }
 0x2fe   : > { %v4084_v34 = vpop.eup %4083  ;;  %v1499_v35 = vadd.f32 1.0, %v4082_v28  ;;  %v1442_v36 = vmul.f32 0.70710677, %v5021_v0  ;;  %v1356_v17 = vpop.f32.mrb[52].mxu0  ;;  %v1410_v58 = vmul.f32 0.5, %v5021_v0 }
 0x2ff   : > { %v1500_v59 = vadd.f32 1.0, %v4084_v34  ;;  %4093 = verf.f32 %v1441_v30  ;;  %v5027_v31 = vadd.f32 %v1356_v17, %v4956_v25  ;;  %v1358_v37 = vpop.f32.mrb[53].mxu0  ;;  %1679 = vmatprep.mubr.f32.mxu0 %v1530_v33 }
 0x300   : > { %4095 = verf.f32 %v1442_v36  ;;  %v5031_v8 = vadd.f32 %v1358_v37, %v4959_v22  ;;  %1680 = vmatmul.mubr.f32.gmra.mrb[74].mxu0 %v1529_v29  ;;  %v1531_v26 = vmul.f32 %v1499_v35, %v1403_v38 }
 0x301   : > { %v4086_v41 = vpop.eup %4085  ;;  %v1443_v42 = vmul.f32 0.70710677, %v5027_v31  ;;  %v1532_v43 = vmul.f32 %v1500_v59, %v1404_v16  ;;  %v1411_v17 = vmul.f32 0.5, %v5027_v31 }
 0x302   : > { %v4088_v46 = vpop.eup %4087  ;;  %v1501_v47 = vadd.f32 1.0, %v4086_v41  ;;  %v1444_v39 = vmul.f32 0.70710677, %v5031_v8  ;;  %v1362_v50 = vpop.f32.mrb[54].mxu0  ;;  %v1412_v34 = vmul.f32 0.5, %v5031_v8 }
 0x303   : > { %v1502_v24 = vadd.f32 1.0, %v4088_v46  ;;  %4097 = verf.f32 %v1443_v42  ;;  %v5037_v44 = vadd.f32 %v1362_v50, %v4956_v25  ;;  %v1364_v9 = vpop.f32.mrb[55].mxu0  ;;  %1684 = vmatprep.mubr.f32.mxu0 %v1532_v43 }
 0x304   : > { %4099 = verf.f32 %v1444_v39  ;;  %v5041_v51 = vadd.f32 %v1364_v9, %v4959_v22  ;;  %1685 = vmatmul.mubr.f32.gmra.mrb[76].mxu0 %v1531_v26  ;;  %v1533_v63 = vmul.f32 %v1501_v47, %v1405_v49 }
 0x305   : > { %v4090_v52 = vpop.eup %4089  ;;  %v1445_v54 = vmul.f32 0.70710677, %v5037_v44  ;;  %v1534_v60 = vmul.f32 %v1502_v24, %v1406_v32  ;;  %v1413_v31 = vmul.f32 0.5, %v5037_v44 }
 0x306   : > { %v4092_v56 = vpop.eup %4091  ;;  %v1503_v48 = vadd.f32 1.0, %v4090_v52  ;;  %v1446_v61 = vmul.f32 0.70710677, %v5041_v51  ;;  %v1368_v1 = vpop.f32.mrb[56].mxu0  ;;  %v1414_v46 = vmul.f32 0.5, %v5041_v51 }
 0x307   : > { %v1504_v27 = vadd.f32 1.0, %v4092_v56  ;;  %4101 = verf.f32 %v1445_v54  ;;  %v5047_v57 = vadd.f32 %v1368_v1, %v4956_v25  ;;  %v1370_v4 = vpop.f32.mrb[57].mxu0  ;;  %1689 = vmatprep.mubr.f32.mxu1 %v1534_v60 }
 0x308   : > { %4103 = verf.f32 %v1446_v61  ;;  %v5051_v3 = vadd.f32 %v1370_v4, %v4959_v22  ;;  %1690 = vmatmul.mubr.f32.vlgmr.msra.gmra.mrb[32].mxu1 %v1533_v63  ;;  %v1535_v15 = vmul.f32 %v1503_v48, %v1407_v40 }
 0x309   : > { %v4094_v5 = vpop.eup %4093  ;;  %v1447_v6 = vmul.f32 0.70710677, %v5047_v57  ;;  %v1536_v7 = vmul.f32 %v1504_v27, %v1408_v2 }
 0x30a   : > { %v4096_v10 = vpop.eup %4095  ;;  %v1505_v11 = vadd.f32 1.0, %v4094_v5  ;;  %v1448_v62 = vmul.f32 0.70710677, %v5051_v3  ;;  %v1374_v13 = vpop.f32.mrb[58].mxu0  ;;  %v1416_v51 = vmul.f32 0.5, %v5051_v3 }
 0x30b   : > { %v1506_v18 = vadd.f32 1.0, %v4096_v10  ;;  %4105 = verf.f32 %v1447_v6  ;;  %v5057_v45 = vadd.f32 %v1374_v13, %v4956_v25  ;;  %v1376_v12 = vpop.f32.mrb[59].mxu0  ;;  %1694 = vmatprep.mubr.f32.mxu1 %v1536_v7 }
 0x30c   : > { %4107 = verf.f32 %v1448_v62  ;;  %v1377_v55 = vadd.f32 %v1376_v12, %v4959_v22  ;;  %1695 = vmatmul.mubr.f32.gmra.mrb[34].mxu1 %v1535_v15  ;;  %v1537_v33 = vmul.f32 %v1505_v11, %v1409_v19 }
 0x30d   : > { %v4098_v20 = vpop.eup %4097  ;;  %v1449_v21 = vmul.f32 0.70710677, %v5057_v45  ;;  %v1538_v23 = vmul.f32 %v1506_v18, %v1410_v58  ;;  %v1417_v27 = vmul.f32 0.5, %v5057_v45 }
 0x30e   : > { %v4100_v53 = vpop.eup %4099  ;;  %v1507_v28 = vadd.f32 1.0, %v4098_v20  ;;  %v1450_v0 = vmul.f32 0.70710677, %v1377_v55  ;;  %v1380_v30 = vpop.f32.mrb[60].mxu0  ;;  %v1418_v1 = vmul.f32 0.5, %v1377_v55 }
 0x30f   : > { %v1508_v35 = vadd.f32 1.0, %v4100_v53  ;;  %4109 = verf.f32 %v1449_v21  ;;  %v1381_v36 = vadd.f32 %v1380_v30, %v4956_v25  ;;  %v1382_v14 = vpop.f32.mrb[61].mxu0  ;;  %1699 = vmatprep.mubr.f32.mxu1 %v1538_v23  ;;  %v5076_v21 = vld [vmem:[%s6414_s8] ss:$0 sm:$0xff] }
 0x310   : > { %4111 = verf.f32 %v1450_v0  ;;  %v1383_v29 = vadd.f32 %v1382_v14, %v4959_v22  ;;  %1700 = vmatmul.mubr.f32.gmra.mrb[36].mxu1 %v1537_v33  ;;  %v1539_v8 = vmul.f32 %v1507_v28, %v1411_v17 }
 0x311   : > { %v4102_v16 = vpop.eup %4101  ;;  %v1451_v59 = vmul.f32 0.70710677, %v1381_v36  ;;  %v1540_v37 = vmul.f32 %v1508_v35, %v1412_v34  ;;  %v1419_v10 = vmul.f32 0.5, %v1381_v36 }
 0x312   : > { %v4104_v38 = vpop.eup %4103  ;;  %v1509_v41 = vadd.f32 1.0, %v4102_v16  ;;  %v1452_v42 = vmul.f32 0.70710677, %v1383_v29  ;;  %v1386_v43 = vpop.f32.mrb[62].mxu0  ;;  %v1420_v7 = vmul.f32 0.5, %v1383_v29 }
 0x313   : > { %v1510_v47 = vadd.f32 1.0, %v4104_v38  ;;  %4113 = verf.f32 %v1451_v59  ;;  %v1387_v39 = vadd.f32 %v1386_v43, %v4956_v25  ;;  %v1388_v50 = vpop.f32.mrb[63].mxu0  ;;  %1704 = vmatprep.mubr.f32.mxu1 %v1540_v37  ;;  %v1415_v25 = vmul.f32 0.5, %v5047_v57 }
 0x314   : > { %4115 = verf.f32 %v1452_v42  ;;  %v1389_v26 = vadd.f32 %v1388_v50, %v4959_v22  ;;  %1705 = vmatmul.mubr.f32.gmra.mrb[38].mxu1 %v1539_v8  ;;  %v1541_v60 = vmul.f32 %v1509_v41, %v1413_v31 }
 0x315   : > { %v4106_v32 = vpop.eup %4105  ;;  %v1453_v24 = vmul.f32 0.70710677, %v1387_v39  ;;  %v1542_v9 = vmul.f32 %v1510_v47, %v1414_v46  ;;  %v1421_v45 = vmul.f32 0.5, %v1387_v39 }
 0x316   : > { %v4108_v49 = vpop.eup %4107  ;;  %v1511_v52 = vadd.f32 1.0, %v4106_v32  ;;  %v1454_v54 = vmul.f32 0.70710677, %v1389_v26  ;;  %v1422_v18 = vmul.f32 0.5, %v1389_v26 }
 0x317   : > { %v1512_v56 = vadd.f32 1.0, %v4108_v49  ;;  %4117 = verf.f32 %v1453_v24  ;;  %1709 = vmatprep.mubr.f32.mxu1 %v1542_v9 }
 0x318   : > { %4119 = verf.f32 %v1454_v54  ;;  %1710 = vmatmul.mubr.f32.gmra.mrb[40].mxu1 %v1541_v60  ;;  %v1543_v61 = vmul.f32 %v1511_v52, %v1415_v25 }
 0x319   : > { %v4110_v44 = vpop.eup %4109  ;;  %v1544_v63 = vmul.f32 %v1512_v56, %v1416_v51 }
 0x31a   : > { %v4112_v22 = vpop.eup %4111  ;;  %v1513_v48 = vadd.f32 1.0, %v4110_v44 }
 0x31b   : > { %v1514_v2 = vadd.f32 1.0, %v4112_v22  ;;  %1714 = vmatprep.mubr.f32.mxu1 %v1544_v63  ;;  %v4231_v63 = vmov 683565275  }
 0x31c   : > { %1715 = vmatmul.mubr.f32.gmra.mrb[42].mxu1 %v1543_v61  ;;  %v1545_v6 = vmul.f32 %v1513_v48, %v1417_v27  ;;  %v4232_v48 = vmov 2475754826  }
 0x31d   : > { %v4114_v4 = vpop.eup %4113  ;;  %v1546_v40 = vmul.f32 %v1514_v2, %v1418_v1  ;;  %v4233_v2 = vmov 2131351028  }
 0x31e   : > { %v4116_v3 = vpop.eup %4115  ;;  %v1515_v5 = vadd.f32 1.0, %v4114_v4  ;;  %v4234_v4 = vmov 2102212464  }
 0x31f   : > { %v1516_v57 = vadd.f32 1.0, %v4116_v3  ;;  %1719 = vmatprep.mubr.f32.mxu1 %v1546_v40  ;;  %v4235_v3 = vmov 920167782  }
 0x320   : > { %1720 = vmatmul.mubr.f32.gmra.mrb[44].mxu1 %v1545_v6  ;;  %v1547_v58 = vmul.f32 %v1515_v5, %v1419_v10 }
 0x321   : > { %v4118_v11 = vpop.eup %4117  ;;  %v1548_v62 = vmul.f32 %v1516_v57, %v1420_v7 }
 0x322   : > { %v4120_v13 = vpop.eup %4119  ;;  %v1517_v15 = vadd.f32 1.0, %v4118_v11 }
 0x323   : > { %v1518_v12 = vadd.f32 1.0, %v4120_v13  ;;  %1724 = vmatprep.mubr.f32.mxu1 %v1548_v62  ;;  %v4236_v13 = vmov 1326507024  }
 0x324   : > { %1725 = vmatmul.mubr.f32.gmra.mrb[46].mxu1 %v1547_v58  ;;  %v1549_v55 = vmul.f32 %v1517_v15, %v1421_v45 }
 0x325   : > { %v1550_v19 = vmul.f32 %v1518_v12, %v1422_v18 }
 0x327   : > { %1729 = vmatprep.mubr.f32.mxu1 %v1550_v19 }
 0x328   : > { %1730 = vmatmul.mubr.f32.gmra.mrb[48].mxu1 %v1549_v55 }
 0x3bf   : > { %v3612_v20 = vpop.f32.mrb[64].mxu0 }
 0x3c0   : > { %v3613_v23 = vpop.f32.mrb[65].mxu0 }
 0x3c1   : > { %v3614_v53 = vadd.f32 %v3613_v23, %v3612_v20 }
 0x3c3   : > { %v5079_v28 = vadd.f32 %v3614_v53, %v5076_v21  ;;  %v3615_v0 = vpop.f32.mrb[66].mxu0 }
 0x3c4   : > { %v3616_v30 = vpop.f32.mrb[67].mxu0 }
 0x3c5   : > { %v1735_v33 = vand.u32 2147483647, %v5079_v28  ;;  %v1738_v34 = vand.u32 2139095040, %v5079_v28  ;;  %v3617_v35 = vadd.f32 %v3616_v30, %v3615_v0  ;;  %vm1737_vm15 = vcmp.lt.s32.totalorder %v5079_v28, 0 }
 0x3c7   : > { %v1739_v36 = vshrl.u32 %v1738_v34, 23  ;;  %v1742_v14 = vand.u32 8388607, %v1735_v33  ;;  %v3618_v17 = vpop.f32.mrb[68].mxu0  ;;  %v5086_v29 = vadd.f32 %v3617_v35, %v5076_v21  ;;  %vm5236_vm0 = vcmp.le.f32.partialorder %v1735_v33, 0.7853982 }
 0x3c8   : > { %v3619_v16 = vpop.f32.mrb[69].mxu0 }
 0x3c9   : > { %v3514_v59 = vadd.s32 4294967169, %v1739_v36  ;;  %v3620_v37 = vadd.f32 %v3619_v16, %v3618_v17  ;;  %v1839_v38 = vand.u32 2147483647, %v5086_v29  ;;  %v1842_v41 = vand.u32 2139095040, %v5086_v29 }
 0x3ca   : > { %v1743_v42 = vor.u32 8388608, %v1742_v14  ;;  %vm1841_vm1 = vcmp.lt.s32.totalorder %v5086_v29, 0 }
 0x3cb   : > { %v1745_v43 = vadd.s32 1, %v3514_v59  ;;  %v5091_v8 = vadd.f32 %v3620_v37, %v5076_v21  ;;  %v3621_v46 = vpop.f32.mrb[70].mxu0  ;;  %v1843_v47 = vshrl.u32 %v1842_v41, 23  ;;  %v5095_v39 = vand.u32 8388607, %v1839_v38 }
 0x3cc   : > { %v3622_v50 = vpop.f32.mrb[71].mxu0  ;;  %v5098_v49 = vshll.u32 %v1743_v42, 8 }
 0x3cd   : > { %vm1746_vm2 = vcmp.gt.s32.totalorder %v1745_v43, 0  ;;  %v1946_v31 = vand.u32 2139095040, %v5091_v8  ;;  %v3518_v32 = vadd.s32 4294967169, %v1843_v47  ;;  %v1847_v54 = vor.u32 8388608, %v5095_v39 }
 0x3ce   : > { %v1747_v26 = vsel %vm1746_vm2, %v1745_v43, 0  ;;  %v1943_v60 = vand.u32 2147483647, %v5091_v8  ;;  %v5104_v56 = vadd.f32 %v3622_v50, %v3621_v46 }
 0x3cf   : > { %v1748_v24 = vshrl.u32 %v1747_v26, 5  ;;  %v1749_v9 = vand.u32 31, %v1747_v26  ;;  %v5100_v52 = vpop.f32.mrb[72].mxu0  ;;  %v1947_v51 = vshrl.u32 %v1946_v31, 23  ;;  %v1849_v1 = vadd.s32 1, %v3518_v32 }
 0x3d0   : > { %v5106_v25 = vpop.f32.mrb[73].mxu0  ;;  %v5138_v47 = vshll.u32 %v1847_v54, 8 }
 0x3d1   : > { %v1750_v44 = vsub.s32 32, %v1749_v9  ;;  %v1752_v22 = vshll.u32 %v4231_v63, %v1749_v9  ;;  %v1755_v61 = vshll.u32 %v4232_v48, %v1749_v9  ;;  %v1758_v27 = vshll.u32 %v4233_v2, %v1749_v9 }
 0x3d2   : > { %v1761_v40 = vshll.u32 %v4234_v4, %v1749_v9  ;;  %v1764_v5 = vshll.u32 %v4235_v3, %v1749_v9  ;;  %vm1767_vm3 = vcmp.lt.s32.totalorder %v1748_v24, 1  ;;  %vm1768_vm4 = vcmp.lt.s32.totalorder %v1748_v24, 2 }
 0x3d3   : > { %v1753_v6 = vshrl.u32 %v4232_v48, %v1750_v44  ;;  %v1756_v7 = vshrl.u32 %v4233_v2, %v1750_v44  ;;  %v1759_v57 = vshrl.u32 %v4234_v4, %v1750_v44  ;;  %v5116_v10 = vpop.f32.mrb[74].mxu0  ;;  %v1751_v11 = vshrl.u32 %v4231_v63, %v1750_v44 }
 0x3d4   : > { %v1762_v62 = vshrl.u32 %v4235_v3, %v1750_v44  ;;  %v1765_v15 = vshrl.u32 %v4236_v13, %v1750_v44  ;;  %vm1769_vm5 = vcmp.lt.s32.totalorder %v1748_v24, 3  ;;  %v5121_v58 = vpop.f32.mrb[75].mxu0  ;;  %vm1850_vm6 = vcmp.gt.s32.totalorder %v1849_v1, 0 }
 0x3d5   : > { %v1754_v18 = vor.u32 %v1753_v6, %v1752_v22  ;;  %v1757_v12 = vor.u32 %v1756_v7, %v1755_v61  ;;  %v1760_v45 = vor.u32 %v1759_v57, %v1758_v27  ;;  %vm1770_vm7 = vcmp.lt.s32.totalorder %v1748_v24, 4 }
 0x3d6   : > { %v1763_v19 = vor.u32 %v1762_v62, %v1761_v40  ;;  %v1766_v55 = vor.u32 %v1765_v15, %v1764_v5  ;;  %v1851_v20 = vsel %vm1850_vm6, %v1849_v1, 0  ;;  %v3522_v22 = vadd.s32 4294967169, %v1947_v51 }
 0x3d7   : > { %v1771_v23 = vsel %vm1767_vm3, %v1751_v11, %v1754_v18  ;;  %v1772_v53 = vsel %vm1770_vm7, %v1760_v45, 2102212464  ;;  %v1775_v0 = vsel %vm1767_vm3, %v1754_v18, %v1757_v12  ;;  %v1779_v30 = vsel %vm1767_vm3, %v1757_v12, %v1760_v45  ;;  %v5126_v34 = vpop.f32.mrb[76].mxu0 }
 0x3d8   : > { %v1773_v35 = vsel %vm1769_vm5, %v1757_v12, %v1772_v53  ;;  %v1776_v36 = vsel %vm1770_vm7, %v1763_v19, 920167782  ;;  %v1780_v14 = vsel %vm1770_vm7, %v1766_v55, 1326507024  ;;  %v5129_v17 = vshrl.u32 %v1851_v20, 5  ;;  %v5131_v16 = vpop.f32.mrb[77].mxu0 }
 0x3d9   : > { %v1774_v59 = vsel %vm1768_vm4, %v1771_v23, %v1773_v35  ;;  %v1777_v37 = vsel %vm1769_vm5, %v1760_v45, %v1776_v36  ;;  %v1781_v41 = vsel %vm1769_vm5, %v1763_v19, %v1780_v14  ;;  %v1853_v42 = vand.u32 31, %v1851_v20 }
 0x3da   : > { %v1778_v43 = vsel %vm1768_vm4, %v1775_v0, %v1777_v37  ;;  %v1782_v46 = vsel %vm1768_vm4, %v1779_v30, %v1781_v41  ;;  %v1790_v9 = vmul.u32 %v5098_v49, %v1774_v59  ;;  %v5154_v24 = vand.u32 8388607, %v1943_v60 }
 0x3db   : > { %v5141_v39 = vmul.u32.u64.low %v5098_v49, %v1782_v46  ;;  %v5142_v50 = vmul.u32.u64.high %v5098_v49, %v1782_v46, %v5141_v39  ;;  %v5145_v31 = vmul.u32.u64.low %v5098_v49, %v1778_v43  ;;  %v5146_v26 = vmul.u32.u64.high %v5098_v49, %v1778_v43, %v5145_v31  ;;  %v5149_v32 = vpop.f32.mrb[32].mxu1 }
 0x3dc   : > { %v1854_v44 = vsub.s32 32, %v1853_v42  ;;  %v5156_v54 = vpop.f32.mrb[33].mxu1  ;;  %v1856_v61 = vshll.u32 %v4231_v63, %v1853_v42  ;;  %v1859_v1 = vshll.u32 %v4232_v48, %v1853_v42  ;;  %v1862_v27 = vshll.u32 %v4233_v2, %v1853_v42 }
 0x3dd   : > { %vm1871_vm8 = vcmp.lt.s32.totalorder %v5129_v17, 1  ;;  %v1865_v5 = vshll.u32 %v4234_v4, %v1853_v42  ;;  %vm1792_vm9 = vc.u32 %v5142_v50, %v5145_v31  ;;  %v1793_v6 = vadd.s32 1, %v5146_v26 }
 0x3de   : > { %v1857_v40 = vshrl.u32 %v4232_v48, %v1854_v44  ;;  %v1860_v49 = vshrl.u32 %v4233_v2, %v1854_v44  ;;  %v1863_v51 = vshrl.u32 %v4234_v4, %v1854_v44  ;;  %v1866_v7 = vshrl.u32 %v4235_v3, %v1854_v44 }
 0x3df   : > { %v1868_v57 = vshll.u32 %v4235_v3, %v1853_v42  ;;  %v1869_v18 = vshrl.u32 %v4236_v13, %v1854_v44  ;;  %v1794_v12 = vsel %vm1792_vm9, %v1793_v6, %v5146_v26  ;;  %vm1872_vm10 = vcmp.lt.s32.totalorder %v5129_v17, 2 }
 0x3e0   : > { %v1858_v11 = vor.u32 %v1857_v40, %v1856_v61  ;;  %v1861_v62 = vor.u32 %v1860_v49, %v1859_v1  ;;  %v1864_v15 = vor.u32 %v1863_v51, %v1862_v27  ;;  %v1867_v45 = vor.u32 %v1866_v7, %v1865_v5  ;;  %v5196_v1 = vpop.f32.mrb[34].mxu1 }
 0x3e1   : > { %vm1874_vm11 = vcmp.lt.s32.totalorder %v5129_v17, 4  ;;  %v1795_v19 = vadd.s32 %v1794_v12, %v1790_v9  ;;  %v1855_v55 = vshrl.u32 %v4231_v63, %v1854_v44  ;;  %v1870_v20 = vor.u32 %v1869_v18, %v1868_v57  ;;  %v5200_v49 = vpop.f32.mrb[35].mxu1 }
 0x3e2   : > { %v1876_v23 = vsel %vm1874_vm11, %v1864_v15, 2102212464  ;;  %vm1873_vm12 = vcmp.lt.s32.totalorder %v5129_v17, 3  ;;  %v1879_v53 = vsel %vm1871_vm8, %v1858_v11, %v1861_v62  ;;  %v1880_v0 = vsel %vm1874_vm11, %v1867_v45, 920167782 }
 0x3e3   : > { %v1883_v30 = vsel %vm1871_vm8, %v1861_v62, %v1864_v15  ;;  %v1796_v35 = vadd.s32 536870912, %v1795_v19  ;;  %v1875_v36 = vsel %vm1871_vm8, %v1855_v55, %v1858_v11  ;;  %v1881_v14 = vsel %vm1873_vm12, %v1864_v15, %v1880_v0 }
 0x3e4   : > { %v1884_v59 = vsel %vm1874_vm11, %v1870_v20, 1326507024  ;;  %v1877_v37 = vsel %vm1873_vm12, %v1861_v62, %v1876_v23  ;;  %v1882_v41 = vsel %vm1872_vm10, %v1879_v53, %v1881_v14  ;;  %v1953_v43 = vadd.s32 1, %v3522_v22 }
 0x3e5   : > { %v1885_v42 = vsel %vm1873_vm12, %v1867_v45, %v1884_v59  ;;  %v1797_v46 = vshrl.u32 %v1796_v35, 30  ;;  %v5188_v26 = vmul.u32.u64.low %v5138_v47, %v1882_v41  ;;  %v5189_v9 = vmul.u32.u64.high %v5138_v47, %v1882_v41, %v5188_v26 }
 0x3e6   : > { %v1886_v39 = vsel %vm1872_vm10, %v1883_v30, %v1885_v42  ;;  %vm1954_vm13 = vcmp.gt.s32.totalorder %v1953_v43, 0  ;;  %v1878_v22 = vsel %vm1872_vm10, %v1875_v36, %v1877_v37  ;;  %v5204_v5 = vadd.f32 %v5106_v25, %v5100_v52 }
 0x3e7   : > { %v5193_v44 = vmul.u32.u64.low %v5138_v47, %v1886_v39  ;;  %v5194_v61 = vmul.u32.u64.high %v5138_v47, %v1886_v39, %v5193_v44  ;;  %v1798_v27 = vshll.u32 %v1797_v46, 30  ;;  %v1955_v40 = vsel %vm1954_vm13, %v1953_v43, 0 }
 0x3e8   : > { %v1957_v51 = vand.u32 31, %v1955_v40  ;;  %v5208_v6 = vadd.f32 %v5121_v58, %v5116_v10  ;;  %v1897_v57 = vadd.s32 1, %v5189_v9  ;;  %v1951_v11 = vor.u32 8388608, %v5154_v24 }
 0x3e9   : > { %v1799_v7 = vsub.s32 %v1795_v19, %v1798_v27  ;;  %v1894_v17 = vmul.u32 %v5138_v47, %v1878_v22  ;;  %vm1896_vm14 = vc.u32 %v5194_v61, %v5188_v26  ;;  %v1791_v25 = vadd.s32 %v5145_v31, %v5142_v50 }
 0x3ea   : > { %v1958_v62 = vsub.s32 32, %v1957_v51  ;;  %v1898_v18 = vsel %vm1896_vm14, %v1897_v57, %v5189_v9  ;;  %v5219_v58 = vshll.u32 %v1951_v11, 8  ;;  %v1821_v12 = vsub.s32 4, %v1797_v46 }
 0x3eb   : > { %v1801_v15 = vsub.s32 0, %v1799_v7  ;;  %v1899_v52 = vadd.s32 %v1898_v18, %v1894_v17  ;;  %v1956_v55 = vshrl.u32 %v1955_v40, 5  ;;  %v5226_v23 = vadd.f32 %v5104_v56, %v5076_v21 }
 0x3ec   : > { %v1961_v47 = vshrl.u32 %v4232_v48, %v1958_v62  ;;  %v1964_v45 = vshrl.u32 %v4233_v2, %v1958_v62  ;;  %v1967_v20 = vshrl.u32 %v4234_v4, %v1958_v62  ;;  %v1960_v50 = vshll.u32 %v4231_v63, %v1957_v51 }
 0x3ed   : > { %v3515_v10 = vmin.u32 %v1801_v15, %v1799_v7  ;;  %v1900_v24 = vadd.s32 536870912, %v1899_v52  ;;  %v1963_v31 = vshll.u32 %v4232_v48, %v1957_v51  ;;  %v1970_v0 = vshrl.u32 %v4235_v3, %v1958_v62 }
 0x3ee   : > { %v1966_v35 = vshll.u32 %v4233_v2, %v1957_v51  ;;  %v1969_v36 = vshll.u32 %v4234_v4, %v1957_v51  ;;  %v1973_v14 = vshrl.u32 %v4236_v13, %v1958_v62  ;;  %v1822_v56 = vsel %vm1737_vm15, %v1821_v12, %v1797_v46 }
 0x3ef   : > { %v1803_v19 = vclz %v3515_v10  ;;  %v1901_v53 = vshrl.u32 %v1900_v24, 30  ;;  %v1962_v41 = vor.u32 %v1961_v47, %v1960_v50  ;;  %v1965_v42 = vor.u32 %v1964_v45, %v1963_v31 }
 0x3f0   : > { %v1968_v43 = vor.u32 %v1967_v20, %v1966_v35  ;;  %v1971_v39 = vor.u32 %v1970_v0, %v1969_v36  ;;  %v1972_v9 = vshll.u32 %v4235_v3, %v1957_v51  ;;  %vm1975_vm3 = vcmp.lt.s32.totalorder %v1956_v55, 1 }
 0x3f1   : > { %v3516_v30 = vadd.s32 4294967294, %v1803_v19  ;;  %v1902_v37 = vshll.u32 %v1901_v53, 30  ;;  %v1925_v33 = vsub.s32 4, %v1901_v53  ;;  %vm1977_vm4 = vcmp.lt.s32.totalorder %v1956_v55, 3 }
 0x3f2   : > { %v1974_v57 = vor.u32 %v1973_v14, %v1972_v9  ;;  %vm1978_vm5 = vcmp.lt.s32.totalorder %v1956_v55, 4  ;;  %v1983_v17 = vsel %vm1975_vm3, %v1962_v41, %v1965_v42  ;;  %vm5250_vm6 = vcmp.le.f32.partialorder %v1839_v38, 0.7853982 }
 0x3f3   : > { %vm3517_vm2 = vcmp.lt.s32.totalorder %v3516_v30, 0  ;;  %v5244_v27 = vsub.s32 %v1899_v52, %v1902_v37  ;;  %v1980_v52 = vsel %vm1978_vm5, %v1968_v43, 2102212464  ;;  %v1984_v10 = vsel %vm1978_vm5, %v1971_v39, 920167782 }
 0x3f4   : > { %v1806_v44 = vsel %vm3517_vm2, 0, %v3516_v30  ;;  %vm1976_vm7 = vcmp.lt.s32.totalorder %v1956_v55, 2  ;;  %v1985_v24 = vsel %vm1977_vm4, %v1968_v43, %v1984_v10  ;;  %v2047_v38 = vand.u32 2147483647, %v5226_v23 }
 0x3f5   : > { %v1807_v22 = vsub.s32 32, %v1806_v44  ;;  %v1811_v40 = vsub.s32 4294967266, %v1806_v44  ;;  %v1808_v46 = vshll.u32 %v1799_v7, %v1806_v44  ;;  %v1905_v11 = vsub.s32 0, %v5244_v27 }
 0x3f6   : > { %v1959_v7 = vshrl.u32 %v4231_v63, %v1958_v62  ;;  %v1986_v45 = vsel %vm1976_vm7, %v1983_v17, %v1985_v24  ;;  %v1981_v50 = vsel %vm1977_vm4, %v1965_v42, %v1980_v52  ;;  %v1987_v31 = vsel %vm1975_vm3, %v1965_v42, %v1968_v43 }
 0x3f7   : > { %v1809_v15 = vshrl.u32 %v1791_v25, %v1807_v22  ;;  %v1812_v18 = vadd.s32 127, %v1811_v40  ;;  %v3519_v12 = vmin.u32 %v1905_v11, %v5244_v27  ;;  %v1824_v62 = vsel %vm5236_vm0, 0, %v1822_v56 }
 0x3f8   : > { %v1979_v20 = vsel %vm1975_vm3, %v1959_v7, %v1962_v41  ;;  %v1926_v30 = vsel %vm1841_vm1, %v1925_v33, %v1901_v53  ;;  %v1988_v35 = vsel %vm1978_vm5, %v1974_v57, 1326507024  ;;  %v2050_v53 = vand.u32 2139095040, %v5226_v23 }
 0x3f9   : > { %v1810_v47 = vor.u32 %v1809_v15, %v1808_v46  ;;  %v1813_v25 = vshll.u32 %v1812_v18, 23  ;;  %v1907_v19 = vclz %v3519_v12  ;;  %v1989_v14 = vsel %vm1977_vm4, %v1971_v39, %v1988_v35 }
 0x3fa   : > { %v5271_v37 = vmul.u32.u64.low %v5219_v58, %v1986_v45  ;;  %v5272_v9 = vmul.u32.u64.high %v5219_v58, %v1986_v45, %v5271_v37  ;;  %v1982_v42 = vsel %vm1976_vm7, %v1979_v20, %v1981_v50  ;;  %v1990_v43 = vsel %vm1976_vm7, %v1987_v31, %v1989_v14  ;;  %v5301_v50 = vpop.f32.mrb[36].mxu1 }
 0x3fb   : > { %v1814_v0 = vor.u32 4788187, %v1813_v25  ;;  %v3520_v36 = vadd.s32 4294967294, %v1907_v19  ;;  %v1817_v44 = vcvt.s32.f32 %v1810_v47  ;;  %v1828_v40 = vadd.s32 3, %v1824_v62 }
 0x3fc   : > { %v5277_v56 = vmul.u32.u64.low %v5219_v58, %v1990_v43  ;;  %v5278_v22 = vmul.u32.u64.high %v5219_v58, %v1990_v43, %v5277_v56  ;;  %v1895_v39 = vadd.s32 %v5188_v26, %v5194_v61  ;;  %v1928_v17 = vsel %vm5250_vm6, 0, %v1926_v30  ;;  %v5305_v30 = vpop.f32.mrb[37].mxu1 }
 0x3fd   : > { %v1815_v41 = vand.u32 2147483647, %v1814_v0  ;;  %vm3521_vm8 = vcmp.lt.s32.totalorder %v3520_v36, 0  ;;  %v2001_v55 = vadd.s32 1, %v5272_v9  ;;  %v1998_v18 = vmul.u32 %v5219_v58, %v1982_v42 }
 0x3fe   : > { %v1910_v57 = vsel %vm3521_vm8, 0, %v3520_v36  ;;  %v2051_v52 = vshrl.u32 %v2050_v53, 23  ;;  %v2054_v10 = vand.u32 8388607, %v2047_v38  ;;  %vm2000_vm9 = vc.u32 %v5278_v22, %v5271_v37 }
 0x3ff   : > { %v1818_v33 = vmul.f32 %v1817_v44, %v1815_v41  ;;  %v1911_v46 = vsub.s32 32, %v1910_v57  ;;  %v1915_v11 = vsub.s32 4294967266, %v1910_v57  ;;  %v1912_v12 = vshll.u32 %v5244_v27, %v1910_v57 }
 0x400   : > { %v2002_v61 = vsel %vm2000_vm9, %v2001_v55, %v5272_v9  ;;  %v3526_v47 = vadd.s32 4294967169, %v2051_v52  ;;  %v5296_v25 = vadd.f32 %v5204_v5, %v5076_v21  ;;  %v5303_v31 = vand.u32 3, %v1828_v40 }
 0x401   : > { %v1819_v15 = vxor.u32 2147483648, %v1818_v33  ;;  %v1913_v7 = vshrl.u32 %v1895_v39, %v1911_v46  ;;  %v1916_v24 = vadd.s32 127, %v1915_v11  ;;  %v2003_v19 = vadd.s32 %v2002_v61, %v1998_v18 }
 0x402   : > { %v2057_v20 = vadd.s32 1, %v3526_v47  ;;  %v1932_v5 = vadd.s32 3, %v1928_v17  ;;  %v2055_v35 = vor.u32 8388608, %v2054_v10  ;;  %v2151_v59 = vand.u32 2147483647, %v5296_v25 }
 0x403   : > { %v1820_v26 = vsel %vm1737_vm15, %v1819_v15, %v1818_v33  ;;  %v1914_v45 = vor.u32 %v1913_v7, %v1912_v12  ;;  %v1917_v27 = vshll.u32 %v1916_v24, 23  ;;  %v2004_v62 = vadd.s32 536870912, %v2003_v19 }
 0x404   : > { %v1823_v58 = vsel %vm5236_vm0, %v5079_v28, %v1820_v26  ;;  %vm2058_vm10 = vcmp.gt.s32.totalorder %v2057_v20, 0  ;;  %vm1945_vm11 = vcmp.lt.s32.totalorder %v5091_v8, 0  ;;  %v2154_v42 = vand.u32 2139095040, %v5296_v25 }
 0x405   : > { %4121 = vcosq.f32 %v1823_v58  ;;  %v1918_v0 = vor.u32 4788187, %v1917_v27  ;;  %v1921_v14 = vcvt.s32.f32 %v1914_v45  ;;  %v2005_v9 = vshrl.u32 %v2004_v62, 30 }
 0x406   : > { %4123 = vsinq.f32 %v1823_v58  ;;  %v2059_v41 = vsel %vm2058_vm10, %v2057_v20, 0  ;;  %vm1831_vm12 = vcmp.eq.s32.totalorder %v5303_v31, 0  ;;  %vm1834_vm13 = vcmp.eq.s32.totalorder %v5303_v31, 2 }
 0x407   : > { %v1919_v36 = vand.u32 2147483647, %v1918_v0  ;;  %v2061_v44 = vand.u32 31, %v2059_v41  ;;  %v2006_v56 = vshll.u32 %v2005_v9, 30  ;;  %vm1830_vm14 = vcmp.lt.s32.totalorder %v5303_v31, 2 }
 0x408   : > { %vm3399_vm15 = vcmask 31744   ;;  %v5313_v53 = vand.u32 3, %v1932_v5  ;;  %vm5317_vm0 = vcmp.le.f32.partialorder %v1943_v60, 0.7853982  ;;  %v5322_v40 = vadd.s32 %v5271_v37, %v5278_v22 }
 0x409   : > { %v1922_v43 = vmul.f32 %v1921_v14, %v1919_v36  ;;  %v2062_v39 = vsub.s32 32, %v2061_v44  ;;  %v5324_v57 = vshll.u32 %v2055_v35, 8  ;;  %vm1827_vm2 = vweird.f32 %v5079_v28 }
 0x40a   : > { %v5327_v11 = vsub.s32 %v2003_v19, %v2006_v56  ;;  %v2029_v17 = vsub.s32 4, %v2005_v9  ;;  %v5331_v55 = vand.u32 8388607, %v2151_v59  ;;  %v5333_v60 = vshrl.u32 %v2059_v41, 5 }
 0x40b   : > { %v1923_v46 = vxor.u32 2147483648, %v1922_v43  ;;  %v2064_v15 = vshll.u32 %v4231_v63, %v2061_v44  ;;  %v2065_v37 = vshrl.u32 %v4232_v48, %v2062_v39  ;;  %v2155_v22 = vshrl.u32 %v2154_v42, 23 }
 0x40c   : > { %v2009_v52 = vsub.s32 0, %v5327_v11  ;;  %v2068_v10 = vshrl.u32 %v4233_v2, %v2062_v39  ;;  %v2071_v12 = vshrl.u32 %v4234_v4, %v2062_v39  ;;  %v2067_v26 = vshll.u32 %v4232_v48, %v2061_v44 }
 0x40d   : > { %v1924_v18 = vsel %vm1841_vm1, %v1923_v46, %v1922_v43  ;;  %v2070_v61 = vshll.u32 %v4233_v2, %v2061_v44  ;;  %v2074_v47 = vshrl.u32 %v4235_v3, %v2062_v39  ;;  %v2030_v19 = vsel %vm1945_vm11, %v2029_v17, %v2005_v9 }
 0x40e   : > { %v1927_v24 = vsel %vm5250_vm6, %v5086_v29, %v1924_v18  ;;  %v3523_v27 = vmin.u32 %v2009_v52, %v5327_v11  ;;  %v2066_v0 = vor.u32 %v2065_v37, %v2064_v15  ;;  %v2073_v51 = vshll.u32 %v4234_v4, %v2061_v44 }
 0x40f   : > { %v4122_v7 = vpop.eup %4121  ;;  %4125 = vcosq.f32 %v1927_v24  ;;  %v2069_v35 = vor.u32 %v2068_v10, %v2067_v26  ;;  %v2072_v36 = vor.u32 %v2071_v12, %v2070_v61  ;;  %v2076_v41 = vshll.u32 %v4235_v3, %v2061_v44 }
 0x410   : > { %v4124_v58 = vpop.eup %4123  ;;  %v1835_v45 = vxor.u32 2147483648, %v4122_v7  ;;  %4127 = vsinq.f32 %v1927_v24  ;;  %v2011_v5 = vclz %v3523_v27  ;;  %v2075_v9 = vor.u32 %v2074_v47, %v2073_v51 }
 0x411   : > { %v1832_v20 = vxor.u32 2147483648, %v4124_v58  ;;  %v2077_v42 = vshrl.u32 %v4236_v13, %v2062_v39  ;;  %vm1938_vm1 = vcmp.eq.s32.totalorder %v5313_v53, 2  ;;  %v2032_v46 = vsel %vm5317_vm0, 0, %v2030_v19 }
 0x412   : > { %v1836_v62 = vsel %vm1834_vm13, %v1835_v45, %v4124_v58  ;;  %v3524_v56 = vadd.s32 4294967294, %v2011_v5  ;;  %v2063_v17 = vshrl.u32 %v4231_v63, %v2062_v39  ;;  %vm1935_vm3 = vcmp.eq.s32.totalorder %v5313_v53, 0 }
 0x413   : > { %v1833_v14 = vsel %vm1831_vm12, %v4122_v7, %v1832_v20  ;;  %v2078_v37 = vor.u32 %v2077_v42, %v2076_v41  ;;  %vm2079_vm4 = vcmp.lt.s32.totalorder %v5333_v60, 1  ;;  %vm2082_vm5 = vcmp.lt.s32.totalorder %v5333_v60, 4 }
 0x414   : > { %v1837_v43 = vsel %vm1830_vm14, %v1833_v14, %v1836_v62  ;;  %vm1934_vm6 = vcmp.lt.s32.totalorder %v5313_v53, 2  ;;  %vm3525_vm7 = vcmp.lt.s32.totalorder %v3524_v56, 0  ;;  %vm2080_vm8 = vcmp.lt.s32.totalorder %v5333_v60, 2 }
 0x415   : > { %v1838_v15 = vsel %vm1827_vm2, nan, %v1837_v43  ;;  %vm2081_vm9 = vcmp.lt.s32.totalorder %v5333_v60, 3  ;;  %v2084_v28 = vsel %vm2082_vm5, %v2072_v36, 2102212464  ;;  %vm1931_vm10 = vweird.f32 %v5086_v29 }
 0x416   : > { %3400 = vst.msk [vmem:[%s5359_s24] sm:$0xff] %vm3399_vm15, %v1838_v15  ;;  %v2014_v31 = vsel %vm3525_vm7, 0, %v3524_v56  ;;  %v2083_v44 = vsel %vm2079_vm4, %v2063_v17, %v2066_v0  ;;  %v2087_v39 = vsel %vm2079_vm4, %v2066_v0, %v2069_v35  ;;  %v2088_v18 = vsel %vm2082_vm5, %v2075_v9, 920167782  ;;  %v5404_v0 = vpop.f32.mrb[38].mxu1 }
 0x417   : > { %v2015_v52 = vsub.s32 32, %v2014_v31  ;;  %v2019_v10 = vsub.s32 4294967266, %v2014_v31  ;;  %v2085_v12 = vsel %vm2081_vm9, %v2069_v35, %v2084_v28  ;;  %v2091_v7 = vsel %vm2079_vm4, %v2069_v35, %v2072_v36 }
 0x418   : > { %v2016_v24 = vshll.u32 %v5327_v11, %v2014_v31  ;;  %v2089_v26 = vsel %vm2081_vm9, %v2072_v36, %v2088_v18  ;;  %v2092_v61 = vsel %vm2082_vm5, %v2078_v37, 1326507024  ;;  %v3530_v47 = vadd.s32 4294967169, %v2155_v22 }
 0x419   : > { %v4126_v58 = vpop.eup %4125  ;;  %v2017_v45 = vshrl.u32 %v5322_v40, %v2015_v52  ;;  %v2020_v27 = vadd.s32 127, %v2019_v10  ;;  %v2090_v19 = vsel %vm2080_vm8, %v2087_v39, %v2089_v26  ;;  %v2093_v20 = vsel %vm2081_vm9, %v2075_v9, %v2092_v61  ;;  %v5413_v40 = vpop.f32.mrb[39].mxu1 }
 0x41a   : > { %v4128_v11 = vpop.eup %4127  ;;  %v1939_v51 = vxor.u32 2147483648, %v4126_v58  ;;  %v2094_v62 = vsel %vm2080_vm8, %v2091_v7, %v2093_v20  ;;  %v5409_v5 = vmul.u32.u64.low %v5324_v57, %v2090_v19  ;;  %v5410_v22 = vmul.u32.u64.high %v5324_v57, %v2090_v19, %v5409_v5 }
 0x41b   : > { %v1936_v35 = vxor.u32 2147483648, %v4128_v11  ;;  %v2018_v36 = vor.u32 %v2017_v45, %v2016_v24  ;;  %v2021_v14 = vshll.u32 %v2020_v27, 23  ;;  %v2161_v41 = vadd.s32 1, %v3530_v47 }
 0x41c   : > { %v1940_v9 = vsel %vm1938_vm1, %v1939_v51, %v4128_v11  ;;  %v2036_v42 = vadd.s32 3, %v2032_v46  ;;  %v5418_v43 = vmul.u32.u64.low %v5324_v57, %v2094_v62  ;;  %v5419_v56 = vmul.u32.u64.high %v5324_v57, %v2094_v62, %v5418_v43 }
 0x41d   : > { %v1937_v17 = vsel %vm1935_vm3, %v4126_v58, %v1936_v35  ;;  %v2022_v15 = vor.u32 4788187, %v2021_v14  ;;  %v2086_v37 = vsel %vm2080_vm8, %v2083_v44, %v2085_v12  ;;  %vm2162_vm12 = vcmp.gt.s32.totalorder %v2161_v41, 0 }
 0x41e   : > { %v1941_v28 = vsel %vm1934_vm6, %v1937_v17, %v1940_v9  ;;  %v2105_v31 = vadd.s32 1, %v5410_v22  ;;  %v2159_v39 = vor.u32 8388608, %v5331_v55  ;;  %v2163_v46 = vsel %vm2162_vm12, %v2161_v41, 0 }
 0x41f   : > { %v1942_v18 = vsel %vm1931_vm10, nan, %v1941_v28  ;;  %v2023_v52 = vand.u32 2147483647, %v2022_v15  ;;  %v2025_v10 = vcvt.s32.f32 %v2018_v36  ;;  %v2165_v7 = vand.u32 31, %v2163_v46 }
 0x420   : > { %3401 = vst.msk [vmem:[%s5359_s24 + $0x8] sm:$0xff] %vm3399_vm15, %v1942_v18  ;;  %v5433_v24 = vand.u32 3, %v2036_v42  ;;  %v2102_v60 = vmul.u32 %v5324_v57, %v2086_v37  ;;  %vm2104_vm13 = vc.u32 %v5419_v56, %v5409_v5  ;;  %v5440_v53 = vadd.f32 %v5208_v6, %v5076_v21 }
 0x421   : > { %v2026_v55 = vmul.f32 %v2025_v10, %v2023_v52  ;;  %v2106_v29 = vsel %vm2104_vm13, %v2105_v31, %v5410_v22  ;;  %v2164_v44 = vshrl.u32 %v2163_v46, 5  ;;  %v2166_v12 = vsub.s32 32, %v2165_v7 }
 0x422   : > { %v2107_v26 = vadd.s32 %v2106_v29, %v2102_v60  ;;  %v2168_v61 = vshll.u32 %v4231_v63, %v2165_v7  ;;  %v2171_v47 = vshll.u32 %v4232_v48, %v2165_v7  ;;  %v2174_v58 = vshll.u32 %v4233_v2, %v2165_v7 }
 0x423   : > { %v2027_v57 = vxor.u32 2147483648, %v2026_v55  ;;  %v2169_v45 = vshrl.u32 %v4232_v48, %v2166_v12  ;;  %v2172_v27 = vshrl.u32 %v4233_v2, %v2166_v12  ;;  %v2177_v6 = vshll.u32 %v4234_v4, %v2165_v7 }
 0x424   : > { %v2108_v19 = vadd.s32 536870912, %v2107_v26  ;;  %v2175_v20 = vshrl.u32 %v4234_v4, %v2166_v12  ;;  %v2178_v11 = vshrl.u32 %v4235_v3, %v2166_v12  ;;  %v2180_v51 = vshll.u32 %v4235_v3, %v2165_v7 }
 0x425   : > { %v2028_v62 = vsel %vm1945_vm11, %v2027_v57, %v2026_v55  ;;  %v2170_v22 = vor.u32 %v2169_v45, %v2168_v61  ;;  %v2173_v35 = vor.u32 %v2172_v27, %v2171_v47  ;;  %v2181_v36 = vshrl.u32 %v4236_v13, %v2166_v12 }
 0x426   : > { %v2031_v14 = vsel %vm5317_vm0, %v5091_v8, %v2028_v62  ;;  %v2109_v41 = vshrl.u32 %v2108_v19, 30  ;;  %v2176_v9 = vor.u32 %v2175_v20, %v2174_v58  ;;  %v2179_v42 = vor.u32 %v2178_v11, %v2177_v6  ;;  %v5488_v11 = vpop.f32.mrb[40].mxu1 }
 0x427   : > { %4129 = vcosq.f32 %v2031_v14  ;;  %v2167_v43 = vshrl.u32 %v4231_v63, %v2166_v12  ;;  %v2182_v17 = vor.u32 %v2181_v36, %v2180_v51  ;;  %v2199_v15 = vshll.u32 %v2159_v39, 8  ;;  %v5494_v62 = vpop.f32.mrb[41].mxu1 }
 0x428   : > { %4131 = vsinq.f32 %v2031_v14  ;;  %v2110_v37 = vshll.u32 %v2109_v41, 30  ;;  %vm2183_vm14 = vcmp.lt.s32.totalorder %v2164_v44, 1  ;;  %vm2184_vm11 = vcmp.lt.s32.totalorder %v2164_v44, 2 }
 0x429   : > { %v2133_v28 = vsub.s32 4, %v2109_v41  ;;  %vm2185_vm2 = vcmp.lt.s32.totalorder %v2164_v44, 3  ;;  %vm2186_vm1 = vcmp.lt.s32.totalorder %v2164_v44, 4  ;;  %v2191_v31 = vsel %vm2183_vm14, %v2170_v22, %v2173_v35 }
 0x42a   : > { %v5459_v46 = vsub.s32 %v2107_v26, %v2110_v37  ;;  %v2187_v33 = vsel %vm2183_vm14, %v2167_v43, %v2170_v22  ;;  %v2188_v18 = vsel %vm2186_vm1, %v2176_v9, 2102212464  ;;  %v2192_v52 = vsel %vm2186_vm1, %v2179_v42, 920167782 }
 0x42b   : > { %v2189_v10 = vsel %vm2185_vm2, %v2173_v35, %v2188_v18  ;;  %v2193_v7 = vsel %vm2185_vm2, %v2176_v9, %v2192_v52  ;;  %v2195_v60 = vsel %vm2183_vm14, %v2173_v35, %v2176_v9  ;;  %v2196_v55 = vsel %vm2186_vm1, %v2182_v17, 1326507024 }
 0x42c   : > { %vm5465_vm0 = vcmp.le.f32.partialorder %v2047_v38, 0.7853982  ;;  %vm2049_vm3 = vcmp.lt.s32.totalorder %v5226_v23, 0  ;;  %v2113_v29 = vsub.s32 0, %v5459_v46  ;;  %v2194_v12 = vsel %vm2184_vm11, %v2191_v31, %v2193_v7 }
 0x42d   : > { %v2134_v26 = vsel %vm2049_vm3, %v2133_v28, %v2109_v41  ;;  %v2197_v61 = vsel %vm2185_vm2, %v2179_v42, %v2196_v55  ;;  %v5475_v47 = vmul.u32.u64.low %v2199_v15, %v2194_v12  ;;  %v5476_v58 = vmul.u32.u64.high %v2199_v15, %v2194_v12, %v5475_v47 }
 0x42e   : > { %vm2035_vm4 = vweird.f32 %v5091_v8  ;;  %v3527_v38 = vmin.u32 %v2113_v29, %v5459_v46  ;;  %v2190_v57 = vsel %vm2184_vm11, %v2187_v33, %v2189_v10  ;;  %v2198_v45 = vsel %vm2184_vm11, %v2195_v60, %v2197_v61 }
 0x42f   : > { %v2258_v27 = vand.u32 2139095040, %v5440_v53  ;;  %vm2038_vm5 = vcmp.lt.s32.totalorder %v5433_v24, 2  ;;  %v5484_v6 = vmul.u32.u64.low %v2199_v15, %v2198_v45  ;;  %v5485_v19 = vmul.u32.u64.high %v2199_v15, %v2198_v45, %v5484_v6 }
 0x430   : > { %v2255_v20 = vand.u32 2147483647, %v5440_v53  ;;  %vm2039_vm6 = vcmp.eq.s32.totalorder %v5433_v24, 0  ;;  %vm2042_vm7 = vcmp.eq.s32.totalorder %v5433_v24, 2  ;;  %v2115_v51 = vclz %v3527_v38 }
 0x431   : > { %v2136_v44 = vsel %vm5465_vm0, 0, %v2134_v26  ;;  %v4130_v22 = vpop.eup %4129  ;;  %v2206_v35 = vmul.u32 %v2199_v15, %v2190_v57  ;;  %v2209_v36 = vadd.s32 1, %v5476_v58  ;;  %v2259_v14 = vshrl.u32 %v2258_v27, 23 }
 0x432   : > { %v3632_v41 = vadd.f32 %v5131_v16, %v5126_v34  ;;  %v4132_v9 = vpop.eup %4131  ;;  %v2043_v42 = vxor.u32 2147483648, %v4130_v22  ;;  %v3528_v43 = vadd.s32 4294967294, %v2115_v51  ;;  %v5501_v17 = vadd.f32 %v5156_v54, %v5149_v32 }
 0x433   : > { %v5505_v37 = vadd.f32 %v5200_v49, %v5196_v1  ;;  %v2040_v28 = vxor.u32 2147483648, %v4132_v9  ;;  %vm2208_vm8 = vc.u32 %v5485_v19, %v5475_v47  ;;  %v3534_v15 = vadd.s32 4294967169, %v2259_v14 }
 0x434   : > { %v2262_v31 = vand.u32 8388607, %v2255_v20  ;;  %v2044_v34 = vsel %vm2042_vm7, %v2043_v42, %v4132_v9  ;;  %v2103_v16 = vadd.s32 %v5409_v5, %v5419_v56  ;;  %vm3529_vm9 = vcmp.lt.s32.totalorder %v3528_v43, 0 }
 0x435   : > { %v2210_v32 = vsel %vm2208_vm8, %v2209_v36, %v5476_v58  ;;  %v2041_v54 = vsel %vm2039_vm6, %v4130_v22, %v2040_v28  ;;  %v2118_v1 = vsel %vm3529_vm9, 0, %v3528_v43  ;;  %v2265_v33 = vadd.s32 1, %v3534_v15 }
 0x436   : > { %v2211_v49 = vadd.s32 %v2210_v32, %v2206_v35  ;;  %v2045_v18 = vsel %vm2038_vm5, %v2041_v54, %v2044_v34  ;;  %v2119_v52 = vsub.s32 32, %v2118_v1  ;;  %v2123_v10 = vsub.s32 4294967266, %v2118_v1 }
 0x437   : > { %v2140_v7 = vadd.s32 3, %v2136_v44  ;;  %v2046_v60 = vsel %vm2035_vm4, nan, %v2045_v18  ;;  %v2263_v5 = vor.u32 8388608, %v2262_v31  ;;  %vm2266_vm10 = vcmp.gt.s32.totalorder %v2265_v33, 0 }
 0x438   : > { %v2212_v55 = vadd.s32 536870912, %v2211_v49  ;;  %3402 = vst.msk [vmem:[%s5359_s24 + $0x10] sm:$0xff] %vm3399_vm15, %v2046_v60  ;;  %v2120_v56 = vshll.u32 %v5459_v46, %v2118_v1  ;;  %v2121_v29 = vshrl.u32 %v2103_v16, %v2119_v52  ;;  %v2124_v12 = vadd.s32 127, %v2123_v10 }
 0x439   : > { %v2267_v26 = vsel %vm2266_vm10, %v2265_v33, 0  ;;  %vm2153_vm12 = vcmp.lt.s32.totalorder %v5296_v25, 0  ;;  %v5525_v27 = vand.u32 3, %v2140_v7  ;;  %v2207_v6 = vadd.s32 %v5475_v47, %v5485_v19 }
 0x43a   : > { %v2213_v61 = vshrl.u32 %v2212_v55, 30  ;;  %v2269_v58 = vand.u32 31, %v2267_v26  ;;  %v2122_v24 = vor.u32 %v2121_v29, %v2120_v56  ;;  %v2125_v38 = vshll.u32 %v2124_v12, 23 }
 0x43b   : > { %v5528_v51 = vshll.u32 %v2263_v5, 8  ;;  %v2268_v46 = vshrl.u32 %v2267_v26, 5  ;;  %v5534_v35 = vadd.f32 %v3632_v41, %v5076_v21  ;;  %vm2146_vm5 = vcmp.eq.s32.totalorder %v5525_v27, 2 }
 0x43c   : > { %v2214_v57 = vshll.u32 %v2213_v61, 30  ;;  %v2270_v45 = vsub.s32 32, %v2269_v58  ;;  %v2126_v8 = vor.u32 4788187, %v2125_v38  ;;  %v2129_v14 = vcvt.s32.f32 %v2122_v24 }
 0x43d   : > { %v2237_v28 = vsub.s32 4, %v2213_v61  ;;  %v2272_v47 = vshll.u32 %v4231_v63, %v2269_v58  ;;  %v2275_v19 = vshll.u32 %v4232_v48, %v2269_v58  ;;  %v2278_v31 = vshll.u32 %v4233_v2, %v2269_v58 }
 0x43e   : > { %v5530_v44 = vsub.s32 %v2211_v49, %v2214_v57  ;;  %v2273_v22 = vshrl.u32 %v4232_v48, %v2270_v45  ;;  %v2127_v36 = vand.u32 2147483647, %v2126_v8  ;;  %v2276_v9 = vshrl.u32 %v4233_v2, %v2270_v45 }
 0x43f   : > { %v2279_v42 = vshrl.u32 %v4234_v4, %v2270_v45  ;;  %v2281_v34 = vshll.u32 %v4234_v4, %v2269_v58  ;;  %v2282_v21 = vshrl.u32 %v4235_v3, %v2270_v45  ;;  %v2285_v54 = vshrl.u32 %v4236_v13, %v2270_v45 }
 0x440   : > { %v2217_v43 = vsub.s32 0, %v5530_v44  ;;  %v2130_v15 = vmul.f32 %v2129_v14, %v2127_v36  ;;  %v2274_v16 = vor.u32 %v2273_v22, %v2272_v47  ;;  %v2277_v32 = vor.u32 %v2276_v9, %v2275_v19 }
 0x441   : > { %v2280_v49 = vor.u32 %v2279_v42, %v2278_v31  ;;  %v2283_v33 = vor.u32 %v2282_v21, %v2281_v34  ;;  %v2284_v18 = vshll.u32 %v4235_v3, %v2269_v58  ;;  %v2238_v10 = vsel %vm2153_vm12, %v2237_v28, %v2213_v61 }
 0x442   : > { %v3531_v41 = vmin.u32 %v2217_v43, %v5530_v44  ;;  %v2131_v1 = vxor.u32 2147483648, %v2130_v15  ;;  %v2271_v7 = vshrl.u32 %v4231_v63, %v2270_v45  ;;  %v2362_v60 = vand.u32 2139095040, %v5534_v35 }
 0x443   : > { %v2286_v5 = vor.u32 %v2285_v54, %v2284_v18  ;;  %vm2287_vm13 = vcmp.lt.s32.totalorder %v2268_v46, 1  ;;  %vm2288_vm14 = vcmp.lt.s32.totalorder %v2268_v46, 2  ;;  %vm2289_vm11 = vcmp.lt.s32.totalorder %v2268_v46, 3 }
 0x444   : > { %v2219_v52 = vclz %v3531_v41  ;;  %v2132_v55 = vsel %vm2049_vm3, %v2131_v1, %v2130_v15  ;;  %vm2290_vm2 = vcmp.lt.s32.totalorder %v2268_v46, 4  ;;  %v2295_v26 = vsel %vm2287_vm13, %v2274_v16, %v2277_v32 }
 0x445   : > { %v2135_v56 = vsel %vm5465_vm0, %v5226_v23, %v2132_v55  ;;  %v2292_v12 = vsel %vm2290_vm2, %v2280_v49, 2102212464  ;;  %v2296_v61 = vsel %vm2290_vm2, %v2283_v33, 920167782  ;;  %v2291_v58 = vsel %vm2287_vm13, %v2271_v7, %v2274_v16 }
 0x446   : > { %v3532_v29 = vadd.s32 4294967294, %v2219_v52  ;;  %4133 = vcosq.f32 %v2135_v56  ;;  %v2297_v24 = vsel %vm2289_vm11, %v2280_v49, %v2296_v61  ;;  %v2299_v39 = vsel %vm2287_vm13, %v2277_v32, %v2280_v49  ;;  %v5594_v49 = vpop.f32.mrb[42].mxu1 }
 0x447   : > { %4135 = vsinq.f32 %v2135_v56  ;;  %v2298_v57 = vsel %vm2288_vm14, %v2295_v26, %v2297_v24  ;;  %v2300_v45 = vsel %vm2290_vm2, %v2286_v5, 1326507024  ;;  %v2293_v36 = vsel %vm2289_vm11, %v2277_v32, %v2292_v12  ;;  %v5600_v52 = vpop.f32.mrb[43].mxu1 }
 0x448   : > { %vm3533_vm1 = vcmp.lt.s32.totalorder %v3532_v29, 0  ;;  %v2301_v14 = vsel %vm2289_vm11, %v2283_v33, %v2300_v45  ;;  %v5566_v43 = vmul.u32.u64.low %v5528_v51, %v2298_v57  ;;  %v5567_v28 = vmul.u32.u64.high %v5528_v51, %v2298_v57, %v5566_v43 }
 0x449   : > { %v2222_v38 = vsel %vm3533_vm1, 0, %v3532_v29  ;;  %v2302_v42 = vsel %vm2288_vm14, %v2299_v39, %v2301_v14  ;;  %vm5576_vm0 = vcmp.le.f32.partialorder %v2151_v59, 0.7853982  ;;  %v2363_v21 = vshrl.u32 %v2362_v60, 23  ;;  %v5588_v59 = vld [vmem:[%s6414_s8] ss:$0 sm:$0xff] }
 0x44a   : > { %v2223_v8 = vsub.s32 32, %v2222_v38  ;;  %v2227_v22 = vsub.s32 4294967266, %v2222_v38  ;;  %v2224_v9 = vshll.u32 %v5530_v44, %v2222_v38  ;;  %v2294_v44 = vsel %vm2288_vm14, %v2291_v58, %v2293_v36 }
 0x44b   : > { %v5571_v15 = vmul.u32.u64.low %v5528_v51, %v2302_v42  ;;  %v5572_v31 = vmul.u32.u64.high %v5528_v51, %v2302_v42, %v5571_v15  ;;  %v2240_v32 = vsel %vm5576_vm0, 0, %v2238_v10  ;;  %v2359_v54 = vand.u32 2147483647, %v5534_v35 }
 0x44c   : > { %v2225_v47 = vshrl.u32 %v2207_v6, %v2223_v8  ;;  %v2228_v19 = vadd.s32 127, %v2227_v22  ;;  %v2313_v6 = vadd.s32 1, %v5567_v28  ;;  %v3538_v1 = vadd.s32 4294967169, %v2363_v21 }
 0x44d   : > { %v5592_v46 = vadd.f32 %v5588_v59, %v5501_v17  ;;  %vm2143_vm3 = vcmp.eq.s32.totalorder %v5525_v27, 0  ;;  %v2310_v18 = vmul.u32 %v5528_v51, %v2294_v44  ;;  %vm2312_vm4 = vc.u32 %v5572_v31, %v5566_v43 }
 0x44e   : > { %v2226_v41 = vor.u32 %v2225_v47, %v2224_v9  ;;  %v2229_v16 = vshll.u32 %v2228_v19, 23  ;;  %v2244_v7 = vadd.s32 3, %v2240_v32  ;;  %v2314_v60 = vsel %vm2312_vm4, %v2313_v6, %v5567_v28 }
 0x44f   : > { %v2369_v17 = vadd.s32 1, %v3538_v1  ;;  %v2315_v12 = vadd.s32 %v2314_v60, %v2310_v18  ;;  %v2366_v51 = vand.u32 8388607, %v2359_v54  ;;  %v2466_v61 = vand.u32 2139095040, %v5592_v46 }
 0x450   : > { %v2230_v33 = vor.u32 4788187, %v2229_v16  ;;  %v4134_v10 = vpop.eup %4133  ;;  %v2233_v29 = vcvt.s32.f32 %v2226_v41  ;;  %vm2139_vm7 = vweird.f32 %v5226_v23  ;;  %vm2142_vm8 = vcmp.lt.s32.totalorder %v5525_v27, 2 }
 0x451   : > { %v4136_v55 = vpop.eup %4135  ;;  %v2147_v5 = vxor.u32 2147483648, %v4134_v10  ;;  %vm2370_vm6 = vcmp.gt.s32.totalorder %v2369_v17, 0  ;;  %v2316_v38 = vadd.s32 536870912, %v2315_v12  ;;  %v5611_v36 = vand.u32 3, %v2244_v7 }
 0x452   : > { %v2231_v56 = vand.u32 2147483647, %v2230_v33  ;;  %v2144_v26 = vxor.u32 2147483648, %v4136_v55  ;;  %v2371_v57 = vsel %vm2370_vm6, %v2369_v17, 0  ;;  %v2367_v42 = vor.u32 8388608, %v2366_v51 }
 0x453   : > { %v2148_v58 = vsel %vm2146_vm5, %v2147_v5, %v4136_v55  ;;  %v2373_v45 = vand.u32 31, %v2371_v57  ;;  %v5613_v14 = vshrl.u32 %v2316_v38, 30  ;;  %v2463_v47 = vand.u32 2147483647, %v5592_v46 }
 0x454   : > { %v2234_v24 = vmul.f32 %v2233_v29, %v2231_v56  ;;  %v2145_v39 = vsel %vm2143_vm3, %v4134_v10, %v2144_v26  ;;  %v2467_v15 = vshrl.u32 %v2466_v61, 23  ;;  %v5634_v33 = vadd.s32 %v5566_v43, %v5572_v31 }
 0x455   : > { %v2149_v8 = vsel %vm2142_vm8, %v2145_v39, %v2148_v58  ;;  %v2374_v28 = vsub.s32 32, %v2373_v45  ;;  %v2318_v27 = vshll.u32 %v5613_v14, 30  ;;  %v2376_v19 = vshll.u32 %v4231_v63, %v2373_v45 }
 0x456   : > { %v2235_v22 = vxor.u32 2147483648, %v2234_v24  ;;  %v2150_v9 = vsel %vm2139_vm7, nan, %v2149_v8  ;;  %v2379_v41 = vshll.u32 %v4232_v48, %v2373_v45  ;;  %v2382_v6 = vshll.u32 %v4233_v2, %v2373_v45 }
 0x457   : > { %3403 = vst.msk [vmem:[%s5359_s24 + $0x18] sm:$0xff] %vm3399_vm15, %v2150_v9  ;;  %v2377_v21 = vshrl.u32 %v4232_v48, %v2374_v28  ;;  %v2380_v16 = vshrl.u32 %v4233_v2, %v2374_v28  ;;  %v5628_v32 = vsub.s32 %v2315_v12, %v2318_v27  ;;  %v2383_v1 = vshrl.u32 %v4234_v4, %v2374_v28 }
 0x458   : > { %v2236_v23 = vsel %vm2153_vm12, %v2235_v22, %v2234_v24  ;;  %v2372_v34 = vshrl.u32 %v2371_v57, 5  ;;  %v5636_v18 = vshll.u32 %v2367_v42, 8  ;;  %v2385_v55 = vshll.u32 %v4234_v4, %v2373_v45 }
 0x459   : > { %v2239_v44 = vsel %vm5576_vm0, %v5296_v25, %v2236_v23  ;;  %v2321_v10 = vsub.s32 0, %v5628_v32  ;;  %v2378_v7 = vor.u32 %v2377_v21, %v2376_v19  ;;  %v2381_v60 = vor.u32 %v2380_v16, %v2379_v41 }
 0x45a   : > { %4137 = vcosq.f32 %v2239_v44  ;;  %v2384_v17 = vor.u32 %v2383_v1, %v2382_v6  ;;  %v2386_v5 = vshrl.u32 %v4235_v3, %v2374_v28  ;;  %v2388_v56 = vshll.u32 %v4235_v3, %v2373_v45 }
 0x45b   : > { %4139 = vsinq.f32 %v2239_v44  ;;  %v2389_v29 = vshrl.u32 %v4236_v13, %v2374_v28  ;;  %vm2250_vm9 = vcmp.eq.s32.totalorder %v5611_v36, 2  ;;  %vm2257_vm10 = vcmp.lt.s32.totalorder %v5440_v53, 0 }
 0x45c   : > { %v3535_v43 = vmin.u32 %v2321_v10, %v5628_v32  ;;  %v2341_v31 = vsub.s32 4, %v5613_v14  ;;  %v3542_v12 = vadd.s32 4294967169, %v2467_v15  ;;  %v5649_v26 = vand.u32 8388607, %v2463_v47 }
 0x45d   : > { %vm2247_vm12 = vcmp.eq.s32.totalorder %v5611_v36, 0  ;;  %v2375_v51 = vshrl.u32 %v4231_v63, %v2374_v28  ;;  %v2387_v61 = vor.u32 %v2386_v5, %v2385_v55  ;;  %v2390_v58 = vor.u32 %v2389_v29, %v2388_v56 }
 0x45e   : > { %vm2391_vm13 = vcmp.lt.s32.totalorder %v2372_v34, 1  ;;  %vm2246_vm14 = vcmp.lt.s32.totalorder %v5611_v36, 2  ;;  %v2323_v24 = vclz %v3535_v43  ;;  %vm2392_vm11 = vcmp.lt.s32.totalorder %v2372_v34, 2 }
 0x45f   : > { %vm2393_vm2 = vcmp.lt.s32.totalorder %v2372_v34, 3  ;;  %vm2394_vm1 = vcmp.lt.s32.totalorder %v2372_v34, 4  ;;  %vm2243_vm0 = vweird.f32 %v5296_v25  ;;  %v2399_v57 = vsel %vm2391_vm13, %v2378_v7, %v2381_v60 }
 0x460   : > { %v2396_v38 = vsel %vm2394_vm1, %v2384_v17, 2102212464  ;;  %v2400_v39 = vsel %vm2394_vm1, %v2387_v61, 920167782  ;;  %v2403_v45 = vsel %vm2391_vm13, %v2381_v60, %v2384_v17  ;;  %vm5657_vm3 = vcmp.le.f32.partialorder %v2255_v20, 0.7853982 }
 0x461   : > { %v3536_v22 = vadd.s32 4294967294, %v2323_v24  ;;  %v2395_v9 = vsel %vm2391_vm13, %v2375_v51, %v2378_v7  ;;  %v2401_v42 = vsel %vm2393_vm2, %v2384_v17, %v2400_v39  ;;  %v2404_v28 = vsel %vm2394_vm1, %v2390_v58, 1326507024 }
 0x462   : > { %v2397_v23 = vsel %vm2393_vm2, %v2381_v60, %v2396_v38  ;;  %v2402_v27 = vsel %vm2392_vm11, %v2399_v57, %v2401_v42  ;;  %v2405_v19 = vsel %vm2393_vm2, %v2387_v61, %v2404_v28  ;;  %v2473_v15 = vadd.s32 1, %v3542_v12  ;;  %v5672_v60 = vpop.f32.mrb[44].mxu1 }
 0x463   : > { %vm3537_vm4 = vcmp.lt.s32.totalorder %v3536_v22, 0  ;;  %v2406_v21 = vsel %vm2392_vm11, %v2403_v45, %v2405_v19  ;;  %v5664_v41 = vmul.u32.u64.low %v5636_v18, %v2402_v27  ;;  %v5665_v16 = vmul.u32.u64.high %v5636_v18, %v2402_v27, %v5664_v41  ;;  %v5675_v29 = vpop.f32.mrb[45].mxu1 }
 0x464   : > { %v4138_v44 = vpop.eup %4137  ;;  %v2326_v1 = vsel %vm3537_vm4, 0, %v3536_v22  ;;  %v5669_v10 = vmul.u32.u64.low %v5636_v18, %v2406_v21  ;;  %v5670_v7 = vmul.u32.u64.high %v5636_v18, %v2406_v21, %v5669_v10  ;;  %v2398_v56 = vsel %vm2392_vm11, %v2395_v9, %v2397_v23 }
 0x465   : > { %v4140_v20 = vpop.eup %4139  ;;  %v2251_v6 = vxor.u32 2147483648, %v4138_v44  ;;  %v2327_v55 = vsub.s32 32, %v2326_v1  ;;  %v2331_v5 = vsub.s32 4294967266, %v2326_v1  ;;  %v2328_v12 = vshll.u32 %v5628_v32, %v2326_v1 }
 0x466   : > { %v2248_v17 = vxor.u32 2147483648, %v4140_v20  ;;  %v2342_v51 = vsel %vm2257_vm10, %v2341_v31, %v5613_v14  ;;  %vm2474_vm5 = vcmp.gt.s32.totalorder %v2473_v15, 0  ;;  %v2417_v24 = vadd.s32 1, %v5665_v16 }
 0x467   : > { %v2252_v43 = vsel %vm2250_vm9, %v2251_v6, %v4140_v20  ;;  %v2329_v58 = vshrl.u32 %v5634_v33, %v2327_v55  ;;  %v2332_v34 = vadd.s32 127, %v2331_v5  ;;  %v2414_v57 = vmul.u32 %v5636_v18, %v2398_v56 }
 0x468   : > { %v2249_v61 = vsel %vm2247_vm12, %v4138_v44, %v2248_v17  ;;  %vm2416_vm6 = vc.u32 %v5670_v7, %v5664_v41  ;;  %v2475_v32 = vsel %vm2474_vm5, %v2473_v15, 0  ;;  %v2344_v33 = vsel %vm5657_vm3, 0, %v2342_v51 }
 0x469   : > { %v2253_v38 = vsel %vm2246_vm14, %v2249_v61, %v2252_v43  ;;  %v2330_v31 = vor.u32 %v2329_v58, %v2328_v12  ;;  %v2333_v39 = vshll.u32 %v2332_v34, 23  ;;  %v2418_v45 = vsel %vm2416_vm6, %v2417_v24, %v5665_v16 }
 0x46a   : > { %v2254_v14 = vsel %vm2243_vm0, nan, %v2253_v38  ;;  %v2419_v36 = vadd.s32 %v2418_v45, %v2414_v57  ;;  %v2477_v22 = vand.u32 31, %v2475_v32  ;;  %v5701_v18 = vadd.f32 %v5305_v30, %v5301_v50 }
 0x46b   : > { %3404 = vst.msk [vmem:[%s5359_s24 + $0x20] sm:$0xff] %vm3399_vm15, %v2254_v14  ;;  %v2334_v9 = vor.u32 4788187, %v2333_v39  ;;  %v5705_v25 = vadd.f32 %v5413_v40, %v5404_v0  ;;  %v2471_v28 = vor.u32 8388608, %v5649_v26  ;;  %v2337_v19 = vcvt.s32.f32 %v2330_v31 }
 0x46c   : > { %v2420_v42 = vadd.s32 536870912, %v2419_v36  ;;  %v2478_v23 = vsub.s32 32, %v2477_v22  ;;  %v2348_v15 = vadd.s32 3, %v2344_v33  ;;  %v2476_v44 = vshrl.u32 %v2475_v32, 5 }
 0x46d   : > { %v2335_v27 = vand.u32 2147483647, %v2334_v9  ;;  %v2489_v50 = vshll.u32 %v4234_v4, %v2477_v22  ;;  %v2480_v1 = vshll.u32 %v4231_v63, %v2477_v22  ;;  %v2483_v10 = vshll.u32 %v4232_v48, %v2477_v22 }
 0x46e   : > { %v2421_v21 = vshrl.u32 %v2420_v42, 30  ;;  %v2481_v16 = vshrl.u32 %v4232_v48, %v2478_v23  ;;  %v2484_v20 = vshrl.u32 %v4233_v2, %v2478_v23  ;;  %v2487_v6 = vshrl.u32 %v4234_v4, %v2478_v23 }
 0x46f   : > { %v2338_v30 = vmul.f32 %v2337_v19, %v2335_v27  ;;  %v2490_v0 = vshrl.u32 %v4235_v3, %v2478_v23  ;;  %v2493_v40 = vshrl.u32 %v4236_v13, %v2478_v23  ;;  %v2486_v17 = vshll.u32 %v4233_v2, %v2477_v22 }
 0x470   : > { %v2422_v26 = vshll.u32 %v2421_v21, 30  ;;  %v2492_v56 = vshll.u32 %v4235_v3, %v2477_v22  ;;  %v2482_v12 = vor.u32 %v2481_v16, %v2480_v1  ;;  %v2485_v51 = vor.u32 %v2484_v20, %v2483_v10 }
 0x471   : > { %v2339_v55 = vxor.u32 2147483648, %v2338_v30  ;;  %v2491_v5 = vor.u32 %v2490_v0, %v2489_v50  ;;  %v2488_v61 = vor.u32 %v2487_v6, %v2486_v17  ;;  %v5722_v34 = vand.u32 3, %v2348_v15 }
 0x472   : > { %v5718_v43 = vsub.s32 %v2419_v36, %v2422_v26  ;;  %v2494_v24 = vor.u32 %v2493_v40, %v2492_v56  ;;  %vm2361_vm7 = vcmp.lt.s32.totalorder %v5534_v35, 0  ;;  %vm2498_vm8 = vcmp.lt.s32.totalorder %v2476_v44, 4 }
 0x473   : > { %v2340_v58 = vsel %vm2257_vm10, %v2339_v55, %v2338_v30  ;;  %v2511_v32 = vshll.u32 %v2471_v28, 8  ;;  %vm2495_vm9 = vcmp.lt.s32.totalorder %v2476_v44, 1  ;;  %vm2497_vm12 = vcmp.lt.s32.totalorder %v2476_v44, 3 }
 0x474   : > { %v2343_v38 = vsel %vm5657_vm3, %v5440_v53, %v2340_v58  ;;  %v2425_v57 = vsub.s32 0, %v5718_v43  ;;  %v2504_v14 = vsel %vm2498_vm8, %v2491_v5, 920167782  ;;  %v2500_v39 = vsel %vm2498_vm8, %v2488_v61, 2102212464 }
 0x475   : > { %4141 = vcosq.f32 %v2343_v38  ;;  %v2503_v45 = vsel %vm2495_vm9, %v2482_v12, %v2485_v51  ;;  %v2479_v33 = vshrl.u32 %v4231_v63, %v2478_v23  ;;  %v2505_v8 = vsel %vm2497_vm12, %v2488_v61, %v2504_v14 }
 0x476   : > { %4143 = vsinq.f32 %v2343_v38  ;;  %v3539_v31 = vmin.u32 %v2425_v57, %v5718_v43  ;;  %v2507_v36 = vsel %vm2495_vm9, %v2485_v51, %v2488_v61  ;;  %v2508_v22 = vsel %vm2498_vm8, %v2494_v24, 1326507024 }
 0x477   : > { %v2445_v42 = vsub.s32 4, %v2421_v21  ;;  %vm2496_vm10 = vcmp.lt.s32.totalorder %v2476_v44, 2  ;;  %v5734_v28 = vadd.f32 %v5588_v59, %v5505_v37  ;;  %v2499_v27 = vsel %vm2495_vm9, %v2479_v33, %v2482_v12 }
 0x478   : > { %v2427_v9 = vclz %v3539_v31  ;;  %v2501_v19 = vsel %vm2497_vm12, %v2485_v51, %v2500_v39  ;;  %v2506_v15 = vsel %vm2496_vm10, %v2503_v45, %v2505_v8  ;;  %v2509_v16 = vsel %vm2497_vm12, %v2491_v5, %v2508_v22 }
 0x479   : > { %v2510_v50 = vsel %vm2496_vm10, %v2507_v36, %v2509_v16  ;;  %v5738_v23 = vmul.u32.u64.low %v2511_v32, %v2506_v15  ;;  %v5739_v30 = vmul.u32.u64.high %v2511_v32, %v2506_v15, %v5738_v23  ;;  %vm2351_vm13 = vcmp.eq.s32.totalorder %v5722_v34, 0 }
 0x47a   : > { %v3540_v20 = vadd.s32 4294967294, %v2427_v9  ;;  %vm5744_vm14 = vcmp.le.f32.partialorder %v2359_v54, 0.7853982  ;;  %v5748_v37 = vmul.u32.u64.low %v2511_v32, %v2510_v50  ;;  %v5749_v0 = vmul.u32.u64.high %v2511_v32, %v2510_v50, %v5748_v37 }
 0x47b   : > { %vm2354_vm11 = vcmp.eq.s32.totalorder %v5722_v34, 2  ;;  %v2502_v44 = vsel %vm2496_vm10, %v2499_v27, %v2501_v19  ;;  %v2570_v40 = vand.u32 2139095040, %v5734_v28  ;;  %v2415_v26 = vadd.s32 %v5664_v41, %v5670_v7 }
 0x47c   : > { %vm3541_vm2 = vcmp.lt.s32.totalorder %v3540_v20, 0  ;;  %v2446_v10 = vsel %vm2361_vm7, %v2445_v42, %v2421_v21  ;;  %v5759_v54 = vadd.f32 %v5494_v62, %v5488_v11  ;;  %v2521_v5 = vadd.s32 1, %v5739_v30  ;;  %v5766_v62 = vpop.f32.mrb[46].mxu1 }
 0x47d   : > { %v2430_v1 = vsel %vm3541_vm2, 0, %v3540_v20  ;;  %v2567_v56 = vand.u32 2147483647, %v5734_v28  ;;  %v2518_v61 = vmul.u32 %v2511_v32, %v2502_v44  ;;  %vm2520_vm1 = vc.u32 %v5749_v0, %v5738_v23  ;;  %v5770_v39 = vpop.f32.mrb[47].mxu1 }
 0x47e   : > { %v2431_v17 = vsub.s32 32, %v2430_v1  ;;  %v2435_v55 = vsub.s32 4294967266, %v2430_v1  ;;  %v2432_v51 = vshll.u32 %v5718_v43, %v2430_v1  ;;  %v2571_v41 = vshrl.u32 %v2570_v40, 23 }
 0x47f   : > { %v4142_v12 = vpop.eup %4141  ;;  %v2522_v11 = vsel %vm2520_vm1, %v2521_v5, %v5739_v30  ;;  %v2448_v57 = vsel %vm5744_vm14, 0, %v2446_v10  ;;  %v2574_v33 = vand.u32 8388607, %v2567_v56  ;;  %vm2350_vm0 = vcmp.lt.s32.totalorder %v5722_v34, 2 }
 0x480   : > { %v4144_v7 = vpop.eup %4143  ;;  %v2355_v58 = vxor.u32 2147483648, %v4142_v12  ;;  %v2433_v21 = vshrl.u32 %v2415_v26, %v2431_v17  ;;  %v2436_v24 = vadd.s32 127, %v2435_v55  ;;  %v2523_v14 = vadd.s32 %v2522_v11, %v2518_v61 }
 0x481   : > { %v2352_v38 = vxor.u32 2147483648, %v4144_v7  ;;  %v3546_v31 = vadd.s32 4294967169, %v2571_v41  ;;  %vm2347_vm3 = vweird.f32 %v5440_v53  ;;  %v2452_v27 = vadd.s32 3, %v2448_v57 }
 0x482   : > { %v2356_v43 = vsel %vm2354_vm11, %v2355_v58, %v4144_v7  ;;  %v2434_v32 = vor.u32 %v2433_v21, %v2432_v51  ;;  %v2437_v45 = vshll.u32 %v2436_v24, 23  ;;  %v2524_v36 = vadd.s32 536870912, %v2523_v14 }
 0x483   : > { %v2353_v8 = vsel %vm2351_vm13, %v4142_v12, %v2352_v38  ;;  %v2577_v22 = vadd.s32 1, %v3546_v31  ;;  %v5784_v16 = vadd.f32 %v5588_v59, %v5701_v18  ;;  %v2575_v50 = vor.u32 8388608, %v2574_v33 }
 0x484   : > { %v2357_v9 = vsel %vm2350_vm0, %v2353_v8, %v2356_v43  ;;  %v2438_v42 = vor.u32 4788187, %v2437_v45  ;;  %v5780_v15 = vshrl.u32 %v2524_v36, 30  ;;  %v2441_v34 = vcvt.s32.f32 %v2434_v32 }
 0x485   : > { %v2358_v19 = vsel %vm2347_vm3, nan, %v2357_v9  ;;  %vm2578_vm4 = vcmp.gt.s32.totalorder %v2577_v22, 0  ;;  %v5789_v40 = vand.u32 3, %v2452_v27  ;;  %v5792_v26 = vadd.s32 %v5738_v23, %v5749_v0 }
 0x486   : > { %3405 = vst.msk [vmem:[%s5359_s24 + $0x28] sm:$0xff] %vm3399_vm15, %v2358_v19  ;;  %v2439_v20 = vand.u32 2147483647, %v2438_v42  ;;  %v2579_v30 = vsel %vm2578_vm4, %v2577_v22, 0  ;;  %v2526_v37 = vshll.u32 %v5780_v15, 30  ;;  %v5798_v18 = vadd.f32 %v5588_v59, %v5705_v25 }
 0x487   : > { %v2581_v53 = vand.u32 31, %v2579_v30  ;;  %v5800_v55 = vshll.u32 %v2575_v50, 8  ;;  %v2671_v5 = vand.u32 2147483647, %v5784_v16  ;;  %v2674_v12 = vand.u32 2139095040, %v5784_v16 }
 0x488   : > { %v2442_v44 = vmul.f32 %v2441_v34, %v2439_v20  ;;  %v5794_v1 = vsub.s32 %v2523_v14, %v2526_v37  ;;  %v2580_v61 = vshrl.u32 %v2579_v30, 5  ;;  %vm2465_vm5 = vcmp.lt.s32.totalorder %v5592_v46, 0 }
 0x489   : > { %v2582_v10 = vsub.s32 32, %v2581_v53  ;;  %v2584_v23 = vshll.u32 %v4231_v63, %v2581_v53  ;;  %v2587_v25 = vshll.u32 %v4232_v48, %v2581_v53  ;;  %v2590_v11 = vshll.u32 %v4233_v2, %v2581_v53 }
 0x48a   : > { %v2443_v17 = vxor.u32 2147483648, %v2442_v44  ;;  %v2529_v51 = vsub.s32 0, %v5794_v1  ;;  %v2593_v38 = vshll.u32 %v4234_v4, %v2581_v53  ;;  %v2549_v32 = vsub.s32 4, %v5780_v15 }
 0x48b   : > { %v2585_v0 = vshrl.u32 %v4232_v48, %v2582_v10  ;;  %v2588_v7 = vshrl.u32 %v4233_v2, %v2582_v10  ;;  %v2591_v58 = vshrl.u32 %v4234_v4, %v2582_v10  ;;  %v2594_v31 = vshrl.u32 %v4235_v3, %v2582_v10 }
 0x48c   : > { %v2444_v41 = vsel %vm2361_vm7, %v2443_v17, %v2442_v44  ;;  %v3543_v24 = vmin.u32 %v2529_v51, %v5794_v1  ;;  %v2583_v33 = vshrl.u32 %v4231_v63, %v2582_v10  ;;  %v2596_v8 = vshll.u32 %v4235_v3, %v2581_v53 }
 0x48d   : > { %v2447_v21 = vsel %vm5744_vm14, %v5534_v35, %v2444_v41  ;;  %v2586_v57 = vor.u32 %v2585_v0, %v2584_v23  ;;  %v2589_v14 = vor.u32 %v2588_v7, %v2587_v25  ;;  %v2592_v45 = vor.u32 %v2591_v58, %v2590_v11 }
 0x48e   : > { %4145 = vcosq.f32 %v2447_v21  ;;  %v2531_v43 = vclz %v3543_v24  ;;  %v2595_v6 = vor.u32 %v2594_v31, %v2593_v38  ;;  %v2597_v36 = vshrl.u32 %v4236_v13, %v2582_v10  ;;  %v5834_v10 = vpop.f32.mrb[48].mxu1 }
 0x48f   : > { %4147 = vsinq.f32 %v2447_v21  ;;  %vm5826_vm6 = vcmp.le.f32.partialorder %v2463_v47, 0.7853982  ;;  %vm2599_vm7 = vcmp.lt.s32.totalorder %v2580_v61, 1  ;;  %vm2601_vm8 = vcmp.lt.s32.totalorder %v2580_v61, 3  ;;  %v5840_v23 = vpop.f32.mrb[49].mxu1 }
 0x490   : > { %v3544_v9 = vadd.s32 4294967294, %v2531_v43  ;;  %v2675_v42 = vshrl.u32 %v2674_v12, 23  ;;  %v2598_v27 = vor.u32 %v2597_v36, %v2596_v8  ;;  %vm2602_vm9 = vcmp.lt.s32.totalorder %v2580_v61, 4 }
 0x491   : > { %v2603_v19 = vsel %vm2599_vm7, %v2583_v33, %v2586_v57  ;;  %v2607_v20 = vsel %vm2599_vm7, %v2586_v57, %v2589_v14  ;;  %vm2455_vm12 = vcmp.eq.s32.totalorder %v5789_v40, 0  ;;  %v2604_v34 = vsel %vm2602_vm9, %v2592_v45, 2102212464 }
 0x492   : > { %vm3545_vm10 = vcmp.lt.s32.totalorder %v3544_v9, 0  ;;  %v2608_v50 = vsel %vm2602_vm9, %v2595_v6, 920167782  ;;  %v2611_v30 = vsel %vm2599_vm7, %v2589_v14, %v2592_v45  ;;  %vm2454_vm13 = vcmp.lt.s32.totalorder %v5789_v40, 2 }
 0x493   : > { %v2534_v47 = vsel %vm3545_vm10, 0, %v3544_v9  ;;  %v2605_v37 = vsel %vm2601_vm8, %v2589_v14, %v2604_v34  ;;  %v2609_v53 = vsel %vm2601_vm8, %v2592_v45, %v2608_v50  ;;  %v2612_v44 = vsel %vm2602_vm9, %v2598_v27, 1326507024 }
 0x494   : > { %vm2451_vm14 = vweird.f32 %v5534_v35  ;;  %v2535_v17 = vsub.s32 32, %v2534_v47  ;;  %v2539_v12 = vsub.s32 4294967266, %v2534_v47  ;;  %v2550_v51 = vsel %vm2465_vm5, %v2549_v32, %v5780_v15 }
 0x495   : > { %vm2600_vm11 = vcmp.lt.s32.totalorder %v2580_v61, 2  ;;  %v2536_v0 = vshll.u32 %v5794_v1, %v2534_v47  ;;  %v2613_v25 = vsel %vm2601_vm8, %v2595_v6, %v2612_v44  ;;  %v3550_v7 = vadd.s32 4294967169, %v2675_v42 }
 0x496   : > { %v2610_v41 = vsel %vm2600_vm11, %v2607_v20, %v2609_v53  ;;  %v2537_v58 = vshrl.u32 %v5792_v26, %v2535_v17  ;;  %v2540_v21 = vadd.s32 127, %v2539_v12  ;;  %v2606_v24 = vsel %vm2600_vm11, %v2603_v19, %v2605_v37 }
 0x497   : > { %v2614_v11 = vsel %vm2600_vm11, %v2611_v30, %v2613_v25  ;;  %v5850_v15 = vmul.u32.u64.low %v5800_v55, %v2610_v41  ;;  %v5851_v31 = vmul.u32.u64.high %v5800_v55, %v2610_v41, %v5850_v15  ;;  %v2681_v45 = vadd.s32 1, %v3550_v7 }
 0x498   : > { %v4146_v38 = vpop.eup %4145  ;;  %v5846_v57 = vmul.u32.u64.low %v5800_v55, %v2614_v11  ;;  %v5847_v14 = vmul.u32.u64.high %v5800_v55, %v2614_v11, %v5846_v57  ;;  %v2538_v61 = vor.u32 %v2537_v58, %v2536_v0  ;;  %v2541_v32 = vshll.u32 %v2540_v21, 23 }
 0x499   : > { %v4148_v1 = vpop.eup %4147  ;;  %v2459_v43 = vxor.u32 2147483648, %v4146_v38  ;;  %vm2458_vm2 = vcmp.eq.s32.totalorder %v5789_v40, 2  ;;  %v2552_v26 = vsel %vm5826_vm6, 0, %v2550_v51  ;;  %v2678_v6 = vand.u32 8388607, %v2671_v5 }
 0x49a   : > { %v2456_v33 = vxor.u32 2147483648, %v4148_v1  ;;  %v2542_v36 = vor.u32 4788187, %v2541_v32  ;;  %v2622_v9 = vmul.u32 %v5800_v55, %v2606_v24  ;;  %vm2682_vm1 = vcmp.gt.s32.totalorder %v2681_v45, 0 }
 0x49b   : > { %v2460_v8 = vsel %vm2458_vm2, %v2459_v43, %v4148_v1  ;;  %vm2624_vm0 = vc.u32 %v5847_v14, %v5850_v15  ;;  %v2625_v27 = vadd.s32 1, %v5851_v31  ;;  %v2778_v19 = vand.u32 2139095040, %v5798_v18 }
 0x49c   : > { %v2457_v42 = vsel %vm2455_vm12, %v4146_v38, %v2456_v33  ;;  %v2543_v34 = vand.u32 2147483647, %v2542_v36  ;;  %v2545_v50 = vcvt.s32.f32 %v2538_v61  ;;  %v2683_v30 = vsel %vm2682_vm1, %v2681_v45, 0 }
 0x49d   : > { %v2461_v20 = vsel %vm2454_vm13, %v2457_v42, %v2460_v8  ;;  %v2626_v47 = vsel %vm2624_vm0, %v2625_v27, %v5851_v31  ;;  %v2685_v37 = vand.u32 31, %v2683_v30  ;;  %v2556_v44 = vadd.s32 3, %v2552_v26 }
 0x49e   : > { %v2462_v55 = vsel %vm2451_vm14, nan, %v2461_v20  ;;  %v2546_v53 = vmul.f32 %v2545_v50, %v2543_v34  ;;  %v2627_v17 = vadd.s32 %v2626_v47, %v2622_v9  ;;  %v2679_v12 = vor.u32 8388608, %v2678_v6 }
 0x49f   : > { %3406 = vst.msk [vmem:[%s5359_s24 + $0x30] sm:$0xff] %vm3399_vm15, %v2462_v55  ;;  %v5873_v51 = vshrl.u32 %v2683_v30, 5  ;;  %v2686_v0 = vsub.s32 32, %v2685_v37  ;;  %v2688_v40 = vshll.u32 %v4231_v63, %v2685_v37  ;;  %v2779_v41 = vshrl.u32 %v2778_v19, 23 }
 0x4a0   : > { %v2547_v25 = vxor.u32 2147483648, %v2546_v53  ;;  %v2628_v7 = vadd.s32 536870912, %v2627_v17  ;;  %v2691_v35 = vshll.u32 %v4232_v48, %v2685_v37  ;;  %v2694_v58 = vshll.u32 %v4233_v2, %v2685_v37 }
 0x4a1   : > { %v2689_v21 = vshrl.u32 %v4232_v48, %v2686_v0  ;;  %v2692_v24 = vshrl.u32 %v4233_v2, %v2686_v0  ;;  %v2695_v11 = vshrl.u32 %v4234_v4, %v2686_v0  ;;  %v2697_v38 = vshll.u32 %v4234_v4, %v2685_v37 }
 0x4a2   : > { %v2548_v57 = vsel %vm2465_vm5, %v2547_v25, %v2546_v53  ;;  %v5884_v31 = vshrl.u32 %v2628_v7, 30  ;;  %v2698_v1 = vshrl.u32 %v4235_v3, %v2686_v0  ;;  %v2701_v43 = vshrl.u32 %v4236_v13, %v2686_v0 }
 0x4a3   : > { %v2551_v61 = vsel %vm5826_vm6, %v5592_v46, %v2548_v57  ;;  %v2690_v32 = vor.u32 %v2689_v21, %v2688_v40  ;;  %v2693_v45 = vor.u32 %v2692_v24, %v2691_v35  ;;  %v2700_v33 = vshll.u32 %v4235_v3, %v2685_v37 }
 0x4a4   : > { %4149 = vcosq.f32 %v2551_v61  ;;  %v2630_v26 = vshll.u32 %v5884_v31, 30  ;;  %v2699_v6 = vor.u32 %v2698_v1, %v2697_v38  ;;  %v2696_v8 = vor.u32 %v2695_v11, %v2694_v58 }
 0x4a5   : > { %4151 = vsinq.f32 %v2551_v61  ;;  %v2702_v36 = vor.u32 %v2701_v43, %v2700_v33  ;;  %v2557_v9 = vand.u32 3, %v2556_v44  ;;  %vm2703_vm3 = vcmp.lt.s32.totalorder %v5873_v51, 1 }
 0x4a6   : > { %v5893_v42 = vsub.s32 %v2627_v17, %v2630_v26  ;;  %vm2706_vm4 = vcmp.lt.s32.totalorder %v5873_v51, 4  ;;  %v2711_v22 = vsel %vm2703_vm3, %v2690_v32, %v2693_v45  ;;  %v2719_v27 = vshll.u32 %v2679_v12, 8 }
 0x4a7   : > { %v3554_v19 = vadd.s32 4294967169, %v2779_v41  ;;  %vm2569_vm5 = vcmp.lt.s32.totalorder %v5734_v28, 0  ;;  %vm2704_vm6 = vcmp.lt.s32.totalorder %v5873_v51, 2  ;;  %vm2705_vm7 = vcmp.lt.s32.totalorder %v5873_v51, 3 }
 0x4a8   : > { %v2633_v20 = vsub.s32 0, %v5893_v42  ;;  %v2712_v34 = vsel %vm2706_vm4, %v2699_v6, 920167782  ;;  %v2708_v50 = vsel %vm2706_vm4, %v2696_v8, 2102212464  ;;  %v2715_v55 = vsel %vm2703_vm3, %v2693_v45, %v2696_v8 }
 0x4a9   : > { %v2713_v30 = vsel %vm2705_vm7, %v2696_v8, %v2712_v34  ;;  %v2716_v47 = vsel %vm2706_vm4, %v2702_v36, 1326507024  ;;  %v2687_v53 = vshrl.u32 %v4231_v63, %v2686_v0  ;;  %vm2555_vm8 = vweird.f32 %v5592_v46 }
 0x4aa   : > { %v3547_v37 = vmin.u32 %v2633_v20, %v5893_v42  ;;  %v2714_v44 = vsel %vm2704_vm6, %v2711_v22, %v2713_v30  ;;  %v2717_v17 = vsel %vm2705_vm7, %v2699_v6, %v2716_v47  ;;  %v2775_v25 = vand.u32 2147483647, %v5798_v18 }
 0x4ab   : > { %v2718_v12 = vsel %vm2704_vm6, %v2715_v55, %v2717_v17  ;;  %v5916_v40 = vmul.u32.u64.low %v2719_v27, %v2714_v44  ;;  %v5917_v41 = vmul.u32.u64.high %v2719_v27, %v2714_v44, %v5916_v40  ;;  %vm2558_vm9 = vcmp.lt.s32.totalorder %v2557_v9, 2 }
 0x4ac   : > { %v2635_v7 = vclz %v3547_v37  ;;  %v2707_v0 = vsel %vm2703_vm3, %v2687_v53, %v2690_v32  ;;  %v2709_v35 = vsel %vm2705_vm7, %v2693_v45, %v2708_v50  ;;  %v2653_v58 = vsub.s32 4, %v5884_v31 }
 0x4ad   : > { %v5926_v21 = vmul.u32.u64.low %v2719_v27, %v2718_v12  ;;  %v5927_v24 = vmul.u32.u64.high %v2719_v27, %v2718_v12, %v5926_v21  ;;  %v2785_v11 = vadd.s32 1, %v3554_v19  ;;  %vm2559_vm12 = vcmp.eq.s32.totalorder %v2557_v9, 0 }
 0x4ae   : > { %v4150_v38 = vpop.eup %4149  ;;  %vm2562_vm10 = vcmp.eq.s32.totalorder %v2557_v9, 2  ;;  %v3548_v57 = vadd.s32 4294967294, %v2635_v7  ;;  %v5931_v1 = vadd.f32 %v5600_v52, %v5594_v49  ;;  %v2710_v32 = vsel %vm2704_vm6, %v2707_v0, %v2709_v35 }
 0x4af   : > { %v4152_v43 = vpop.eup %4151  ;;  %v2563_v61 = vxor.u32 2147483648, %v4150_v38  ;;  %v2729_v45 = vadd.s32 1, %v5917_v41  ;;  %vm2786_vm13 = vcmp.gt.s32.totalorder %v2785_v11, 0  ;;  %v2623_v26 = vadd.s32 %v5850_v15, %v5847_v14 }
 0x4b0   : > { %v2560_v33 = vxor.u32 2147483648, %v4152_v43  ;;  %vm3549_vm14 = vcmp.lt.s32.totalorder %v3548_v57, 0  ;;  %v2787_v6 = vsel %vm2786_vm13, %v2785_v11, 0  ;;  %v2654_v49 = vsel %vm2569_vm5, %v2653_v58, %v5884_v31 }
 0x4b1   : > { %v2564_v8 = vsel %vm2562_vm10, %v2563_v61, %v4152_v43  ;;  %v2638_v36 = vsel %vm3549_vm14, 0, %v3548_v57  ;;  %vm2728_vm11 = vc.u32 %v5927_v24, %v5916_v40  ;;  %v2726_v19 = vmul.u32 %v2719_v27, %v2710_v32 }
 0x4b2   : > { %v2561_v52 = vsel %vm2559_vm12, %v4150_v38, %v2560_v33  ;;  %v2639_v51 = vsub.s32 32, %v2638_v36  ;;  %v2643_v22 = vsub.s32 4294967266, %v2638_v36  ;;  %v2640_v14 = vshll.u32 %v5893_v42, %v2638_v36 }
 0x4b3   : > { %v2565_v20 = vsel %vm2558_vm9, %v2561_v52, %v2564_v8  ;;  %v2730_v15 = vsel %vm2728_vm11, %v2729_v45, %v5917_v41  ;;  %v2789_v34 = vand.u32 31, %v2787_v6  ;;  %vm5953_vm2 = vcmp.le.f32.partialorder %v2567_v56, 0.7853982 }
 0x4b4   : > { %v2566_v50 = vsel %vm2555_vm8, nan, %v2565_v20  ;;  %v2641_v30 = vshrl.u32 %v2623_v26, %v2639_v51  ;;  %v2644_v31 = vadd.s32 127, %v2643_v22  ;;  %v2731_v55 = vadd.s32 %v2730_v15, %v2726_v19 }
 0x4b5   : > { %3407 = vst.msk [vmem:[%s5359_s24 + $0x38] sm:$0xff] %vm3399_vm15, %v2566_v50  ;;  %v2790_v9 = vsub.s32 32, %v2789_v34  ;;  %v2782_v53 = vand.u32 8388607, %v2775_v25  ;;  %v2656_v46 = vsel %vm5953_vm2, 0, %v2654_v49  ;;  %v2792_v44 = vshll.u32 %v4231_v63, %v2789_v34 }
 0x4b6   : > { %v2642_v27 = vor.u32 %v2641_v30, %v2640_v14  ;;  %v2645_v42 = vshll.u32 %v2644_v31, 23  ;;  %v2732_v37 = vadd.s32 536870912, %v2731_v55  ;;  %v2788_v35 = vshrl.u32 %v2787_v6, 5 }
 0x4b7   : > { %v2793_v17 = vshrl.u32 %v4232_v48, %v2790_v9  ;;  %v2796_v12 = vshrl.u32 %v4233_v2, %v2790_v9  ;;  %v2799_v7 = vshrl.u32 %v4234_v4, %v2790_v9  ;;  %v2802_v0 = vshrl.u32 %v4235_v3, %v2790_v9 }
 0x4b8   : > { %v2646_v56 = vor.u32 4788187, %v2645_v42  ;;  %v2733_v41 = vshrl.u32 %v2732_v37, 30  ;;  %v2795_v58 = vshll.u32 %v4232_v48, %v2789_v34  ;;  %v2798_v21 = vshll.u32 %v4233_v2, %v2789_v34 }
 0x4b9   : > { %v2801_v11 = vshll.u32 %v4234_v4, %v2789_v34  ;;  %v2649_v57 = vcvt.s32.f32 %v2642_v27  ;;  %v2794_v61 = vor.u32 %v2793_v17, %v2792_v44  ;;  %v2804_v33 = vshll.u32 %v4235_v3, %v2789_v34 }
 0x4ba   : > { %v2647_v38 = vand.u32 2147483647, %v2646_v56  ;;  %v2734_v43 = vshll.u32 %v2733_v41, 30  ;;  %v2797_v32 = vor.u32 %v2796_v12, %v2795_v58  ;;  %v2805_v26 = vshrl.u32 %v4236_v13, %v2790_v9 }
 0x4bb   : > { %v2803_v45 = vor.u32 %v2802_v0, %v2801_v11  ;;  %v2660_v36 = vadd.s32 3, %v2656_v46  ;;  %v2800_v6 = vor.u32 %v2799_v7, %v2798_v21  ;;  %vm2673_vm1 = vcmp.lt.s32.totalorder %v5784_v16, 0 }
 0x4bc   : > { %v2650_v8 = vmul.f32 %v2649_v57, %v2647_v38  ;;  %v5971_v49 = vsub.s32 %v2731_v55, %v2734_v43  ;;  %v2783_v52 = vor.u32 8388608, %v2782_v53  ;;  %v2791_v51 = vshrl.u32 %v4231_v63, %v2790_v9 }
 0x4bd   : > { %v2806_v22 = vor.u32 %v2805_v26, %v2804_v33  ;;  %v5977_v19 = vadd.f32 %v5588_v59, %v5759_v54  ;;  %vm2807_vm0 = vcmp.lt.s32.totalorder %v2788_v35, 1  ;;  %vm2810_vm3 = vcmp.lt.s32.totalorder %v2788_v35, 4 }
 0x4be   : > { %v2651_v20 = vxor.u32 2147483648, %v2650_v8  ;;  %v2737_v14 = vsub.s32 0, %v5971_v49  ;;  %vm2808_vm4 = vcmp.lt.s32.totalorder %v2788_v35, 2  ;;  %vm2809_vm6 = vcmp.lt.s32.totalorder %v2788_v35, 3 }
 0x4bf   : > { %v2815_v15 = vsel %vm2807_vm0, %v2794_v61, %v2797_v32  ;;  %v2816_v34 = vsel %vm2810_vm3, %v2803_v45, 920167782  ;;  %vm5985_vm7 = vcmp.le.f32.partialorder %v2671_v5, 0.7853982  ;;  %v2812_v54 = vsel %vm2810_vm3, %v2800_v6, 2102212464 }
 0x4c0   : > { %v2652_v50 = vsel %vm2569_vm5, %v2651_v20, %v2650_v8  ;;  %v3551_v59 = vmin.u32 %v2737_v14, %v5971_v49  ;;  %v2817_v31 = vsel %vm2809_vm6, %v2800_v6, %v2816_v34  ;;  %v2819_v27 = vsel %vm2807_vm0, %v2797_v32, %v2800_v6 }
 0x4c1   : > { %v2655_v55 = vsel %vm5953_vm2, %v5734_v28, %v2652_v50  ;;  %v2818_v9 = vsel %vm2808_vm4, %v2815_v15, %v2817_v31  ;;  %v2820_v42 = vsel %vm2810_vm3, %v2806_v22, 1326507024  ;;  %v2757_v5 = vsub.s32 4, %v2733_v41 }
 0x4c2   : > { %4153 = vcosq.f32 %v2655_v55  ;;  %v2739_v37 = vclz %v3551_v59  ;;  %v2823_v53 = vshll.u32 %v2783_v52, 8  ;;  %v2811_v46 = vsel %vm2807_vm0, %v2791_v51, %v2794_v61 }
 0x4c3   : > { %4155 = vsinq.f32 %v2655_v55  ;;  %v2813_v44 = vsel %vm2809_vm6, %v2797_v32, %v2812_v54  ;;  %v2821_v17 = vsel %vm2809_vm6, %v2803_v45, %v2820_v42  ;;  %v2661_v0 = vand.u32 3, %v2660_v36  ;;  %v6033_v42 = vld [vmem:[%s6414_s8] ss:$0 sm:$0xff] }
 0x4c4   : > { %v3552_v12 = vadd.s32 4294967294, %v2739_v37  ;;  %v2822_v47 = vsel %vm2808_vm4, %v2819_v27, %v2821_v17  ;;  %v6000_v56 = vmul.u32.u64.low %v2823_v53, %v2818_v9  ;;  %v6001_v7 = vmul.u32.u64.high %v2823_v53, %v2818_v9, %v6000_v56 }
 0x4c5   : > { %v6003_v58 = vmul.u32.u64.low %v2823_v53, %v2822_v47  ;;  %v6004_v21 = vmul.u32.u64.high %v2823_v53, %v2822_v47, %v6003_v58  ;;  %v2882_v11 = vand.u32 2139095040, %v5977_v19  ;;  %v2758_v38 = vsel %vm2673_vm1, %v2757_v5, %v2733_v41 }
 0x4c6   : > { %vm3553_vm5 = vcmp.lt.s32.totalorder %v3552_v12, 0  ;;  %v2814_v57 = vsel %vm2808_vm4, %v2811_v46, %v2813_v44  ;;  %v2879_v43 = vand.u32 2147483647, %v5977_v19  ;;  %v6013_v45 = vadd.f32 %v5675_v29, %v5672_v60 }
 0x4c7   : > { %v2742_v61 = vsel %vm3553_vm5, 0, %v3552_v12  ;;  %v2883_v32 = vshrl.u32 %v2882_v11, 23  ;;  %v6017_v33 = vadd.f32 %v5770_v39, %v5766_v62  ;;  %v2727_v26 = vadd.s32 %v5916_v40, %v5927_v24 }
 0x4c8   : > { %v2743_v8 = vsub.s32 32, %v2742_v61  ;;  %v2747_v36 = vsub.s32 4294967266, %v2742_v61  ;;  %v2833_v41 = vadd.s32 1, %v6001_v7  ;;  %v2760_v35 = vsel %vm5985_vm7, 0, %v2758_v38 }
 0x4c9   : > { %v2830_v6 = vmul.u32 %v2823_v53, %v2814_v57  ;;  %vm2832_vm8 = vc.u32 %v6004_v21, %v6000_v56  ;;  %v3558_v52 = vadd.s32 4294967169, %v2883_v32  ;;  %v2744_v60 = vshll.u32 %v5971_v49, %v2742_v61 }
 0x4ca   : > { %v2745_v29 = vshrl.u32 %v2727_v26, %v2743_v8  ;;  %v2748_v51 = vadd.s32 127, %v2747_v36  ;;  %v2834_v62 = vsel %vm2832_vm8, %v2833_v41, %v6001_v7  ;;  %vm2659_vm9 = vweird.f32 %v5734_v28 }
 0x4cb   : > { %v2835_v39 = vadd.s32 %v2834_v62, %v2830_v6  ;;  %v2889_v40 = vadd.s32 1, %v3558_v52  ;;  %vm2663_vm12 = vcmp.eq.s32.totalorder %v2661_v0, 0  ;;  %vm2666_vm10 = vcmp.eq.s32.totalorder %v2661_v0, 2 }
 0x4cc   : > { %v4154_v24 = vpop.eup %4153  ;;  %v2746_v22 = vor.u32 %v2745_v29, %v2744_v60  ;;  %v2749_v20 = vshll.u32 %v2748_v51, 23  ;;  %v2764_v34 = vadd.s32 3, %v2760_v35  ;;  %v2886_v54 = vand.u32 8388607, %v2879_v43 }
 0x4cd   : > { %v4156_v14 = vpop.eup %4155  ;;  %v2667_v15 = vxor.u32 2147483648, %v4154_v24  ;;  %v2836_v50 = vadd.s32 536870912, %v2835_v39  ;;  %vm2890_vm13 = vcmp.gt.s32.totalorder %v2889_v40, 0  ;;  %v6037_v37 = vadd.f32 %v6033_v42, %v5931_v1 }
 0x4ce   : > { %v2664_v59 = vxor.u32 2147483648, %v4156_v14  ;;  %v2750_v49 = vor.u32 4788187, %v2749_v20  ;;  %v2891_v31 = vsel %vm2890_vm13, %v2889_v40, 0  ;;  %vm2662_vm14 = vcmp.lt.s32.totalorder %v2661_v0, 2 }
 0x4cf   : > { %v2668_v55 = vsel %vm2666_vm10, %v2667_v15, %v4156_v14  ;;  %v2837_v9 = vshrl.u32 %v2836_v50, 30  ;;  %v2893_v27 = vand.u32 31, %v2891_v31  ;;  %v2753_v46 = vcvt.s32.f32 %v2746_v22 }
 0x4d0   : > { %v2665_v5 = vsel %vm2663_vm12, %v4154_v24, %v2664_v59  ;;  %v2751_v53 = vand.u32 2147483647, %v2750_v49  ;;  %v6040_v17 = vand.u32 3, %v2764_v34  ;;  %vm2777_vm11 = vcmp.lt.s32.totalorder %v5798_v18, 0 }
 0x4d1   : > { %v2669_v44 = vsel %vm2662_vm14, %v2665_v5, %v2668_v55  ;;  %v2838_v12 = vshll.u32 %v2837_v9, 30  ;;  %v2894_v47 = vsub.s32 32, %v2893_v27  ;;  %v2831_v11 = vadd.s32 %v6000_v56, %v6004_v21 }
 0x4d2   : > { %v2670_v7 = vsel %vm2659_vm9, nan, %v2669_v44  ;;  %v2754_v58 = vmul.f32 %v2753_v46, %v2751_v53  ;;  %v2887_v1 = vor.u32 8388608, %v2886_v54  ;;  %v6050_v38 = vshrl.u32 %v2891_v31, 5 }
 0x4d3   : > { %3408 = vst.msk [vmem:[%s5359_s24 + $0x40] sm:$0xff] %vm3399_vm15, %v2670_v7  ;;  %v6048_v0 = vsub.s32 %v2835_v39, %v2838_v12  ;;  %v2897_v57 = vshrl.u32 %v4232_v48, %v2894_v47  ;;  %v2986_v61 = vand.u32 2139095040, %v6037_v37  ;;  %v2861_v26 = vsub.s32 4, %v2837_v9 }
 0x4d4   : > { %v2755_v32 = vxor.u32 2147483648, %v2754_v58  ;;  %v2896_v8 = vshll.u32 %v4231_v63, %v2893_v27  ;;  %v2900_v28 = vshrl.u32 %v4233_v2, %v2894_v47  ;;  %v2899_v56 = vshll.u32 %v4232_v48, %v2893_v27 }
 0x4d5   : > { %v2841_v36 = vsub.s32 0, %v6048_v0  ;;  %v2902_v21 = vshll.u32 %v4233_v2, %v2893_v27  ;;  %v2903_v41 = vshrl.u32 %v4234_v4, %v2894_v47  ;;  %v2905_v52 = vshll.u32 %v4234_v4, %v2893_v27 }
 0x4d6   : > { %v2756_v35 = vsel %vm2673_vm1, %v2755_v32, %v2754_v58  ;;  %v2898_v6 = vor.u32 %v2897_v57, %v2896_v8  ;;  %v2906_v60 = vshrl.u32 %v4235_v3, %v2894_v47  ;;  %v2901_v62 = vor.u32 %v2900_v28, %v2899_v56 }
 0x4d7   : > { %v2759_v29 = vsel %vm5985_vm7, %v5784_v16, %v2756_v35  ;;  %v3555_v51 = vmin.u32 %v2841_v36, %v6048_v0  ;;  %v2904_v39 = vor.u32 %v2903_v41, %v2902_v21  ;;  %v2908_v24 = vshll.u32 %v4235_v3, %v2893_v27 }
 0x4d8   : > { %4157 = vcosq.f32 %v2759_v29  ;;  %v2907_v40 = vor.u32 %v2906_v60, %v2905_v52  ;;  %v2909_v22 = vshrl.u32 %v4236_v13, %v2894_v47  ;;  %vm6072_vm2 = vcmp.le.f32.partialorder %v2775_v25, 0.7853982 }
 0x4d9   : > { %4159 = vsinq.f32 %v2759_v29  ;;  %v2843_v14 = vclz %v3555_v51  ;;  %v2927_v30 = vshll.u32 %v2887_v1, 8  ;;  %v2983_v15 = vand.u32 2147483647, %v6037_v37 }
 0x4da   : > { %v2862_v34 = vsel %vm2777_vm11, %v2861_v26, %v2837_v9  ;;  %v2895_v50 = vshrl.u32 %v4231_v63, %v2894_v47  ;;  %v2910_v59 = vor.u32 %v2909_v22, %v2908_v24  ;;  %v2987_v49 = vshrl.u32 %v2986_v61, 23 }
 0x4db   : > { %v3556_v54 = vadd.s32 4294967294, %v2843_v14  ;;  %vm2911_vm1 = vcmp.lt.s32.totalorder %v6050_v38, 1  ;;  %vm2913_vm0 = vcmp.lt.s32.totalorder %v6050_v38, 3  ;;  %vm2914_vm3 = vcmp.lt.s32.totalorder %v6050_v38, 4 }
 0x4dc   : > { %v2916_v25 = vsel %vm2914_vm3, %v2904_v39, 2102212464  ;;  %v2919_v31 = vsel %vm2911_vm1, %v2898_v6, %v2901_v62  ;;  %v2920_v55 = vsel %vm2914_vm3, %v2907_v40, 920167782  ;;  %v2923_v27 = vsel %vm2911_vm1, %v2901_v62, %v2904_v39 }
 0x4dd   : > { %vm3557_vm4 = vcmp.lt.s32.totalorder %v3556_v54, 0  ;;  %vm2912_vm6 = vcmp.lt.s32.totalorder %v6050_v38, 2  ;;  %v2921_v9 = vsel %vm2913_vm0, %v2904_v39, %v2920_v55  ;;  %v2924_v5 = vsel %vm2914_vm3, %v2910_v59, 1326507024 }
 0x4de   : > { %vm2766_vm7 = vcmp.lt.s32.totalorder %v6040_v17, 2  ;;  %v2846_v53 = vsel %vm3557_vm4, 0, %v3556_v54  ;;  %v2915_v46 = vsel %vm2911_vm1, %v2895_v50, %v2898_v6  ;;  %v2922_v44 = vsel %vm2912_vm6, %v2919_v31, %v2921_v9 }
 0x4df   : > { %v2925_v12 = vsel %vm2913_vm0, %v2907_v40, %v2924_v5  ;;  %vm2763_vm5 = vweird.f32 %v5784_v16  ;;  %v2847_v47 = vsub.s32 32, %v2846_v53  ;;  %v2851_v7 = vsub.s32 4294967266, %v2846_v53 }
 0x4e0   : > { %v2917_v58 = vsel %vm2913_vm0, %v2901_v62, %v2916_v25  ;;  %v2926_v1 = vsel %vm2912_vm6, %v2923_v27, %v2925_v12  ;;  %v6099_v32 = vmul.u32.u64.low %v2927_v30, %v2922_v44  ;;  %v6100_v26 = vmul.u32.u64.high %v2927_v30, %v2922_v44, %v6099_v32 }
 0x4e1   : > { %v6096_v57 = vmul.u32.u64.low %v2927_v30, %v2926_v1  ;;  %v6097_v61 = vmul.u32.u64.high %v2927_v30, %v2926_v1, %v6096_v57  ;;  %v2848_v8 = vshll.u32 %v6048_v0, %v2846_v53  ;;  %v2849_v28 = vshrl.u32 %v2831_v11, %v2847_v47 }
 0x4e2   : > { %v2852_v36 = vadd.s32 127, %v2851_v7  ;;  %v3562_v56 = vadd.s32 4294967169, %v2987_v49  ;;  %v4158_v21 = vpop.eup %4157  ;;  %vm2767_vm8 = vcmp.eq.s32.totalorder %v6040_v17, 0  ;;  %vm2770_vm9 = vcmp.eq.s32.totalorder %v6040_v17, 2 }
 0x4e3   : > { %v2864_v41 = vsel %vm6072_vm2, 0, %v2862_v34  ;;  %v2918_v35 = vsel %vm2912_vm6, %v2915_v46, %v2917_v58  ;;  %v4160_v6 = vpop.eup %4159  ;;  %v2771_v52 = vxor.u32 2147483648, %v4158_v21  ;;  %v2850_v60 = vor.u32 %v2849_v28, %v2848_v8 }
 0x4e4   : > { %v2853_v29 = vshll.u32 %v2852_v36, 23  ;;  %v2993_v51 = vadd.s32 1, %v3562_v56  ;;  %v2768_v0 = vxor.u32 2147483648, %v4160_v6  ;;  %vm2936_vm12 = vc.u32 %v6097_v61, %v6099_v32 }
 0x4e5   : > { %v2937_v11 = vadd.s32 1, %v6100_v26  ;;  %v6115_v62 = vand.u32 8388607, %v2983_v15  ;;  %v2772_v39 = vsel %vm2770_vm9, %v2771_v52, %v4160_v6  ;;  %v2934_v38 = vmul.u32 %v2927_v30, %v2918_v35 }
 0x4e6   : > { %v2854_v40 = vor.u32 4788187, %v2853_v29  ;;  %vm2994_vm10 = vcmp.gt.s32.totalorder %v2993_v51, 0  ;;  %v2769_v24 = vsel %vm2767_vm8, %v4158_v21, %v2768_v0  ;;  %v2868_v22 = vadd.s32 3, %v2864_v41 }
 0x4e7   : > { %v2938_v14 = vsel %vm2936_vm12, %v2937_v11, %v6100_v26  ;;  %v2995_v34 = vsel %vm2994_vm10, %v2993_v51, 0  ;;  %v2773_v50 = vsel %vm2766_vm7, %v2769_v24, %v2772_v39  ;;  %v2857_v49 = vcvt.s32.f32 %v2850_v60 }
 0x4e8   : > { %v2855_v59 = vand.u32 2147483647, %v2854_v40  ;;  %v2939_v54 = vadd.s32 %v2938_v14, %v2934_v38  ;;  %v2774_v25 = vsel %vm2763_vm5, nan, %v2773_v50  ;;  %v2997_v31 = vand.u32 31, %v2995_v34 }
 0x4e9   : > { %3409 = vst.msk [vmem:[%s5359_s24 + $0x48] sm:$0xff] %vm3399_vm15, %v2774_v25  ;;  %v6126_v27 = vand.u32 3, %v2868_v22  ;;  %v2991_v9 = vor.u32 8388608, %v6115_v62  ;;  %v2996_v5 = vshrl.u32 %v2995_v34, 5  ;;  %vm2881_vm13 = vcmp.lt.s32.totalorder %v5977_v19, 0 }
 0x4ea   : > { %v2858_v30 = vmul.f32 %v2857_v49, %v2855_v59  ;;  %v2940_v55 = vadd.s32 536870912, %v2939_v54  ;;  %v2998_v53 = vsub.s32 32, %v2997_v31  ;;  %v3000_v44 = vshll.u32 %v4231_v63, %v2997_v31 }
 0x4eb   : > { %v3003_v12 = vshll.u32 %v4232_v48, %v2997_v31  ;;  %v3006_v7 = vshll.u32 %v4233_v2, %v2997_v31  ;;  %v3009_v26 = vshll.u32 %v4234_v4, %v2997_v31  ;;  %v6147_v6 = vadd.f32 %v6033_v42, %v6013_v45 }
 0x4ec   : > { %v2859_v46 = vxor.u32 2147483648, %v2858_v30  ;;  %v2941_v17 = vshrl.u32 %v2940_v55, 30  ;;  %v3001_v16 = vshrl.u32 %v4232_v48, %v2998_v53  ;;  %v3004_v47 = vshrl.u32 %v4233_v2, %v2998_v53 }
 0x4ed   : > { %v3007_v58 = vshrl.u32 %v4234_v4, %v2998_v53  ;;  %v3010_v8 = vshrl.u32 %v4235_v3, %v2998_v53  ;;  %v3012_v52 = vshll.u32 %v4235_v3, %v2997_v31  ;;  %v3013_v60 = vshrl.u32 %v4236_v13, %v2998_v53 }
 0x4ee   : > { %v2860_v1 = vsel %vm2777_vm11, %v2859_v46, %v2858_v30  ;;  %v2942_v57 = vshll.u32 %v2941_v17, 30  ;;  %v3002_v36 = vor.u32 %v3001_v16, %v3000_v44  ;;  %v3005_v56 = vor.u32 %v3004_v47, %v3003_v12 }
 0x4ef   : > { %v2863_v28 = vsel %vm6072_vm2, %v5798_v18, %v2860_v1  ;;  %v3008_v21 = vor.u32 %v3007_v58, %v3006_v7  ;;  %v3011_v35 = vor.u32 %v3010_v8, %v3009_v26  ;;  %vm3015_vm14 = vcmp.lt.s32.totalorder %v2996_v5, 1 }
 0x4f0   : > { %4161 = vcosq.f32 %v2863_v28  ;;  %v6143_v41 = vsub.s32 %v2939_v54, %v2942_v57  ;;  %vm6153_vm11 = vcmp.le.f32.partialorder %v2879_v43, 0.7853982  ;;  %vm3016_vm2 = vcmp.lt.s32.totalorder %v2996_v5, 2 }
 0x4f1   : > { %4163 = vsinq.f32 %v2863_v28  ;;  %vm3017_vm1 = vcmp.lt.s32.totalorder %v2996_v5, 3  ;;  %vm3018_vm0 = vcmp.lt.s32.totalorder %v2996_v5, 4  ;;  %v3014_v51 = vor.u32 %v3013_v60, %v3012_v52 }
 0x4f2   : > { %v2945_v29 = vsub.s32 0, %v6143_v41  ;;  %v3020_v45 = vsel %vm3018_vm0, %v3008_v21, 2102212464  ;;  %v3023_v0 = vsel %vm3015_vm14, %v3002_v36, %v3005_v56  ;;  %v3024_v11 = vsel %vm3018_vm0, %v3011_v35, 920167782 }
 0x4f3   : > { %v2965_v39 = vsub.s32 4, %v2941_v17  ;;  %v2999_v40 = vshrl.u32 %v4231_v63, %v2998_v53  ;;  %v3025_v43 = vsel %vm3017_vm1, %v3008_v21, %v3024_v11  ;;  %v3027_v24 = vsel %vm3015_vm14, %v3005_v56, %v3008_v21 }
 0x4f4   : > { %v3559_v62 = vmin.u32 %v2945_v29, %v6143_v41  ;;  %v3026_v38 = vsel %vm3016_vm2, %v3023_v0, %v3025_v43  ;;  %v3028_v22 = vsel %vm3018_vm0, %v3014_v51, 1326507024  ;;  %v3031_v14 = vshll.u32 %v2991_v9, 8 }
 0x4f5   : > { %vm2870_vm3 = vcmp.lt.s32.totalorder %v6126_v27, 2  ;;  %v3019_v50 = vsel %vm3015_vm14, %v2999_v40, %v3002_v36  ;;  %v3021_v59 = vsel %vm3017_vm1, %v3005_v56, %v3020_v45  ;;  %vm2867_vm4 = vweird.f32 %v5798_v18 }
 0x4f6   : > { %v2947_v34 = vclz %v3559_v62  ;;  %vm2871_vm6 = vcmp.eq.s32.totalorder %v6126_v27, 0  ;;  %v3029_v49 = vsel %vm3017_vm1, %v3011_v35, %v3028_v22  ;;  %v2966_v30 = vsel %vm2881_vm13, %v2965_v39, %v2941_v17 }
 0x4f7   : > { %v6170_v54 = vmul.u32.u64.low %v3031_v14, %v3026_v38  ;;  %v6171_v25 = vmul.u32.u64.high %v3031_v14, %v3026_v38, %v6170_v54  ;;  %v3030_v55 = vsel %vm3016_vm2, %v3027_v24, %v3029_v49  ;;  %v3090_v9 = vand.u32 2139095040, %v6147_v6 }
 0x4f8   : > { %v3560_v31 = vadd.s32 4294967294, %v2947_v34  ;;  %vm2874_vm7 = vcmp.eq.s32.totalorder %v6126_v27, 2  ;;  %v3022_v53 = vsel %vm3016_vm2, %v3019_v50, %v3021_v59  ;;  %v2935_v16 = vadd.s32 %v6099_v32, %v6097_v61 }
 0x4f9   : > { %v6179_v46 = vmul.u32.u64.low %v3031_v14, %v3030_v55  ;;  %v6180_v44 = vmul.u32.u64.high %v3031_v14, %v3030_v55, %v6179_v46  ;;  %v3087_v47 = vand.u32 2147483647, %v6147_v6  ;;  %v3091_v7 = vshrl.u32 %v3090_v9, 23 }
 0x4fa   : > { %v4162_v12 = vpop.eup %4161  ;;  %vm3561_vm5 = vcmp.lt.s32.totalorder %v3560_v31, 0  ;;  %v2968_v57 = vsel %vm6153_vm11, 0, %v2966_v30  ;;  %v3041_v5 = vadd.s32 1, %v6171_v25  ;;  %v3038_v36 = vmul.u32 %v3031_v14, %v3022_v53 }
 0x4fb   : > { %v4164_v17 = vpop.eup %4163  ;;  %v2875_v58 = vxor.u32 2147483648, %v4162_v12  ;;  %v2950_v1 = vsel %vm3561_vm5, 0, %v3560_v31  ;;  %vm3040_vm8 = vc.u32 %v6180_v44, %v6170_v54  ;;  %v3566_v56 = vadd.s32 4294967169, %v3091_v7 }
 0x4fc   : > { %v2872_v26 = vxor.u32 2147483648, %v4164_v17  ;;  %v2951_v8 = vsub.s32 32, %v2950_v1  ;;  %v2955_v28 = vsub.s32 4294967266, %v2950_v1  ;;  %v2952_v32 = vshll.u32 %v6143_v41, %v2950_v1 }
 0x4fd   : > { %v2876_v61 = vsel %vm2874_vm7, %v2875_v58, %v4164_v17  ;;  %v3042_v60 = vsel %vm3040_vm8, %v3041_v5, %v6171_v25  ;;  %v3097_v45 = vadd.s32 1, %v3566_v56  ;;  %v6199_v0 = vadd.f32 %v6033_v42, %v6017_v33 }
 0x4fe   : > { %v2873_v21 = vsel %vm2871_vm6, %v4162_v12, %v2872_v26  ;;  %v2953_v35 = vshrl.u32 %v2935_v16, %v2951_v8  ;;  %v2956_v52 = vadd.s32 127, %v2955_v28  ;;  %v3043_v51 = vadd.s32 %v3042_v60, %v3038_v36 }
 0x4ff   : > { %v2877_v29 = vsel %vm2870_vm3, %v2873_v21, %v2876_v61  ;;  %v2972_v39 = vadd.s32 3, %v2968_v57  ;;  %vm3098_vm9 = vcmp.gt.s32.totalorder %v3097_v45, 0  ;;  %v3094_v27 = vand.u32 8388607, %v3087_v47 }
 0x500   : > { %v2878_v41 = vsel %vm2867_vm4, nan, %v2877_v29  ;;  %v2954_v11 = vor.u32 %v2953_v35, %v2952_v32  ;;  %v2957_v62 = vshll.u32 %v2956_v52, 23  ;;  %v3044_v40 = vadd.s32 536870912, %v3043_v51 }
 0x501   : > { %3410 = vst.msk [vmem:[%s5359_s24 + $0x50] sm:$0xff] %vm3399_vm15, %v2878_v41  ;;  %v3099_v38 = vsel %vm3098_vm9, %v3097_v45, 0  ;;  %v3194_v33 = vand.u32 2139095040, %v6199_v0  ;;  %v6210_v18 = vadd.f32 %v5840_v23, %v5834_v10  ;;  %v6212_v50 = vand.u32 3, %v2972_v39 }
 0x502   : > { %v2958_v43 = vor.u32 4788187, %v2957_v62  ;;  %v3045_v24 = vshrl.u32 %v3044_v40, 30  ;;  %v3101_v22 = vand.u32 31, %v3099_v38  ;;  %v2961_v34 = vcvt.s32.f32 %v2954_v11 }
 0x503   : > { %vm2985_vm12 = vcmp.lt.s32.totalorder %v6037_v37, 0  ;;  %v3039_v31 = vadd.s32 %v6170_v54, %v6180_v44  ;;  %v3095_v30 = vor.u32 8388608, %v3094_v27  ;;  %v3191_v55 = vand.u32 2147483647, %v6199_v0 }
 0x504   : > { %v2959_v14 = vand.u32 2147483647, %v2958_v43  ;;  %v3046_v59 = vshll.u32 %v3045_v24, 30  ;;  %v3102_v49 = vsub.s32 32, %v3101_v22  ;;  %v6219_v53 = vshrl.u32 %v3099_v38, 5 }
 0x505   : > { %v3195_v10 = vshrl.u32 %v3194_v33, 23  ;;  %v3104_v12 = vshll.u32 %v4231_v63, %v3101_v22  ;;  %v3107_v54 = vshll.u32 %v4232_v48, %v3101_v22  ;;  %v3110_v44 = vshll.u32 %v4233_v2, %v3101_v22 }
 0x506   : > { %v2962_v25 = vmul.f32 %v2961_v34, %v2959_v14  ;;  %v6217_v9 = vsub.s32 %v3043_v51, %v3046_v59  ;;  %v3105_v46 = vshrl.u32 %v4232_v48, %v3102_v49  ;;  %v3108_v16 = vshrl.u32 %v4233_v2, %v3102_v49 }
 0x507   : > { %v3111_v7 = vshrl.u32 %v4234_v4, %v3102_v49  ;;  %v3114_v58 = vshrl.u32 %v4235_v3, %v3102_v49  ;;  %v3069_v57 = vsub.s32 4, %v3045_v24  ;;  %v3113_v26 = vshll.u32 %v4234_v4, %v3101_v22 }
 0x508   : > { %v2963_v23 = vxor.u32 2147483648, %v2962_v25  ;;  %v3049_v17 = vsub.s32 0, %v6217_v9  ;;  %v3106_v5 = vor.u32 %v3105_v46, %v3104_v12  ;;  %v3109_v36 = vor.u32 %v3108_v16, %v3107_v54 }
 0x509   : > { %v3112_v61 = vor.u32 %v3111_v7, %v3110_v44  ;;  %v3115_v32 = vor.u32 %v3114_v58, %v3113_v26  ;;  %v3116_v56 = vshll.u32 %v4235_v3, %v3101_v22  ;;  %v3117_v21 = vshrl.u32 %v4236_v13, %v3102_v49 }
 0x50a   : > { %v2964_v1 = vsel %vm2881_vm13, %v2963_v23, %v2962_v25  ;;  %v3563_v28 = vmin.u32 %v3049_v17, %v6217_v9  ;;  %v3135_v52 = vshll.u32 %v3095_v30, 8  ;;  %v3570_v60 = vadd.s32 4294967169, %v3195_v10 }
 0x50b   : > { %v2967_v8 = vsel %vm6153_vm11, %v5977_v19, %v2964_v1  ;;  %v3070_v29 = vsel %vm2985_vm12, %v3069_v57, %v3045_v24  ;;  %v3103_v20 = vshrl.u32 %v4231_v63, %v3102_v49  ;;  %v3118_v51 = vor.u32 %v3117_v21, %v3116_v56 }
 0x50c   : > { %4165 = vcosq.f32 %v2967_v8  ;;  %v3051_v35 = vclz %v3563_v28  ;;  %vm3119_vm10 = vcmp.lt.s32.totalorder %v6219_v53, 1  ;;  %vm6244_vm13 = vcmp.le.f32.partialorder %v2983_v15, 0.7853982 }
 0x50d   : > { %4167 = vsinq.f32 %v2967_v8  ;;  %vm3121_vm14 = vcmp.lt.s32.totalorder %v6219_v53, 3  ;;  %vm3122_vm11 = vcmp.lt.s32.totalorder %v6219_v53, 4  ;;  %v3127_v11 = vsel %vm3119_vm10, %v3106_v5, %v3109_v36 }
 0x50e   : > { %v3564_v41 = vadd.s32 4294967294, %v3051_v35  ;;  %v3124_v62 = vsel %vm3122_vm11, %v3112_v61, 2102212464  ;;  %v3128_v39 = vsel %vm3122_vm11, %v3115_v32, 920167782  ;;  %v3131_v40 = vsel %vm3119_vm10, %v3109_v36, %v3112_v61 }
 0x50f   : > { %v3132_v43 = vsel %vm3122_vm11, %v3118_v51, 1326507024  ;;  %vm3120_vm1 = vcmp.lt.s32.totalorder %v6219_v53, 2  ;;  %v3129_v27 = vsel %vm3121_vm14, %v3112_v61, %v3128_v39  ;;  %v3123_v24 = vsel %vm3119_vm10, %v3103_v20, %v3106_v5 }
 0x510   : > { %vm3565_vm2 = vcmp.lt.s32.totalorder %v3564_v41, 0  ;;  %v3133_v15 = vsel %vm3121_vm14, %v3115_v32, %v3132_v43  ;;  %v3130_v22 = vsel %vm3120_vm1, %v3127_v11, %v3129_v27  ;;  %vm2971_vm0 = vweird.f32 %v5977_v19 }
 0x511   : > { %v3054_v38 = vsel %vm3565_vm2, 0, %v3564_v41  ;;  %v3134_v33 = vsel %vm3120_vm1, %v3131_v40, %v3133_v15  ;;  %v3125_v59 = vsel %vm3121_vm14, %v3109_v36, %v3124_v62  ;;  %v3201_v49 = vadd.s32 1, %v3570_v60 }
 0x512   : > { %v3055_v14 = vsub.s32 32, %v3054_v38  ;;  %v3059_v34 = vsub.s32 4294967266, %v3054_v38  ;;  %v6262_v25 = vmul.u32.u64.low %v3135_v52, %v3134_v33  ;;  %v6263_v30 = vmul.u32.u64.high %v3135_v52, %v3134_v33, %v6262_v25 }
 0x513   : > { %v6265_v46 = vmul.u32.u64.low %v3135_v52, %v3130_v22  ;;  %v6266_v10 = vmul.u32.u64.high %v3135_v52, %v3130_v22, %v6265_v46  ;;  %v3056_v23 = vshll.u32 %v6217_v9, %v3054_v38  ;;  %vm3202_vm3 = vcmp.gt.s32.totalorder %v3201_v49, 0 }
 0x514   : > { %v3057_v12 = vshrl.u32 %v3039_v31, %v3055_v14  ;;  %v3060_v16 = vadd.s32 127, %v3059_v34  ;;  %vm2975_vm4 = vcmp.eq.s32.totalorder %v6212_v50, 0  ;;  %vm2978_vm6 = vcmp.eq.s32.totalorder %v6212_v50, 2 }
 0x515   : > { %v3126_v17 = vsel %vm3120_vm1, %v3123_v24, %v3125_v59  ;;  %v3203_v54 = vsel %vm3202_vm3, %v3201_v49, 0  ;;  %v3198_v5 = vand.u32 8388607, %v3191_v55  ;;  %v3072_v31 = vsel %vm6244_vm13, 0, %v3070_v29 }
 0x516   : > { %v4166_v7 = vpop.eup %4165  ;;  %v3058_v1 = vor.u32 %v3057_v12, %v3056_v23  ;;  %v3061_v57 = vshll.u32 %v3060_v16, 23  ;;  %vm3144_vm7 = vc.u32 %v6263_v30, %v6265_v46  ;;  %v3145_v26 = vadd.s32 1, %v6266_v10 }
 0x517   : > { %v4168_v44 = vpop.eup %4167  ;;  %v2979_v58 = vxor.u32 2147483648, %v4166_v7  ;;  %v3142_v28 = vmul.u32 %v3135_v52, %v3126_v17  ;;  %v3205_v36 = vand.u32 31, %v3203_v54  ;;  %vm2974_vm5 = vcmp.lt.s32.totalorder %v6212_v50, 2 }
 0x518   : > { %v2976_v9 = vxor.u32 2147483648, %v4168_v44  ;;  %v3062_v53 = vor.u32 4788187, %v3061_v57  ;;  %v3065_v32 = vcvt.s32.f32 %v3058_v1  ;;  %v3146_v56 = vsel %vm3144_vm7, %v3145_v26, %v6266_v10 }
 0x519   : > { %v2980_v8 = vsel %vm2978_vm6, %v2979_v58, %v4168_v44  ;;  %v3147_v60 = vadd.s32 %v3146_v56, %v3142_v28  ;;  %v3206_v29 = vsub.s32 32, %v3205_v36  ;;  %v3076_v51 = vadd.s32 3, %v3072_v31 }
 0x51a   : > { %v2977_v61 = vsel %vm2975_vm4, %v4166_v7, %v2976_v9  ;;  %v3063_v35 = vand.u32 2147483647, %v3062_v53  ;;  %v3199_v41 = vor.u32 8388608, %v3198_v5  ;;  %v3204_v11 = vshrl.u32 %v3203_v54, 5 }
 0x51b   : > { %v2981_v21 = vsel %vm2974_vm5, %v2977_v61, %v2980_v8  ;;  %v3148_v62 = vadd.s32 536870912, %v3147_v60  ;;  %v3208_v50 = vshll.u32 %v4231_v63, %v3205_v36  ;;  %v3209_v39 = vshrl.u32 %v4232_v48, %v3206_v29 }
 0x51c   : > { %v2982_v20 = vsel %vm2971_vm0, nan, %v2981_v21  ;;  %v3066_v52 = vmul.f32 %v3065_v32, %v3063_v35  ;;  %v3211_v40 = vshll.u32 %v4232_v48, %v3205_v36  ;;  %v3212_v43 = vshrl.u32 %v4233_v2, %v3206_v29 }
 0x51d   : > { %3411 = vst.msk [vmem:[%s5359_s24 + $0x58] sm:$0xff] %vm3399_vm15, %v2982_v20  ;;  %v3215_v27 = vshrl.u32 %v4234_v4, %v3206_v29  ;;  %v3218_v19 = vshrl.u32 %v4235_v3, %v3206_v29  ;;  %v6295_v38 = vshrl.u32 %v3148_v62, 30  ;;  %v3214_v24 = vshll.u32 %v4233_v2, %v3205_v36 }
 0x51e   : > { %v3067_v15 = vxor.u32 2147483648, %v3066_v52  ;;  %v3217_v22 = vshll.u32 %v4234_v4, %v3205_v36  ;;  %v3210_v33 = vor.u32 %v3209_v39, %v3208_v50  ;;  %v3213_v14 = vor.u32 %v3212_v43, %v3211_v40 }
 0x51f   : > { %v3220_v34 = vshll.u32 %v4235_v3, %v3205_v36  ;;  %v3221_v59 = vshrl.u32 %v4236_v13, %v3206_v29  ;;  %v3150_v25 = vshll.u32 %v6295_v38, 30  ;;  %v3216_v10 = vor.u32 %v3215_v27, %v3214_v24 }
 0x520   : > { %v3068_v49 = vsel %vm2985_vm12, %v3067_v15, %v3066_v52  ;;  %v3219_v23 = vor.u32 %v3218_v19, %v3217_v22  ;;  %v3077_v16 = vand.u32 3, %v3076_v51  ;;  %v3239_v17 = vshll.u32 %v3199_v41, 8 }
 0x521   : > { %v3071_v12 = vsel %vm6244_vm13, %v6037_v37, %v3068_v49  ;;  %v3222_v7 = vor.u32 %v3221_v59, %v3220_v34  ;;  %v3151_v54 = vsub.s32 %v3147_v60, %v3150_v25  ;;  %vm3223_vm8 = vcmp.lt.s32.totalorder %v3204_v11, 1 }
 0x522   : > { %4169 = vcosq.f32 %v3071_v12  ;;  %v6309_v44 = vadd.f32 %v6033_v42, %v6210_v18  ;;  %v3207_v58 = vshrl.u32 %v4231_v63, %v3206_v29  ;;  %vm3226_vm9 = vcmp.lt.s32.totalorder %v3204_v11, 4 }
 0x523   : > { %4171 = vsinq.f32 %v3071_v12  ;;  %v3231_v1 = vsel %vm3223_vm8, %v3210_v33, %v3213_v14  ;;  %v3153_v57 = vsub.s32 0, %v3151_v54  ;;  %vm3225_vm12 = vcmp.lt.s32.totalorder %v3204_v11, 3 }
 0x524   : > { %v3228_v5 = vsel %vm3226_vm9, %v3216_v10, 2102212464  ;;  %v3232_v45 = vsel %vm3226_vm9, %v3219_v23, 920167782  ;;  %vm3224_vm10 = vcmp.lt.s32.totalorder %v3204_v11, 2  ;;  %v3235_v31 = vsel %vm3223_vm8, %v3213_v14, %v3216_v10 }
 0x525   : > { %v3233_v9 = vsel %vm3225_vm12, %v3216_v10, %v3232_v45  ;;  %v3236_v26 = vsel %vm3226_vm9, %v3222_v7, 1326507024  ;;  %v3567_v8 = vmin.u32 %v3153_v57, %v3151_v54  ;;  %v3227_v53 = vsel %vm3223_vm8, %v3207_v58, %v3210_v33 }
 0x526   : > { %v3234_v28 = vsel %vm3224_vm10, %v3231_v1, %v3233_v9  ;;  %v3237_v36 = vsel %vm3225_vm12, %v3219_v23, %v3236_v26  ;;  %v3229_v61 = vsel %vm3225_vm12, %v3213_v14, %v3228_v5  ;;  %v3298_v20 = vand.u32 2139095040, %v6309_v44 }
 0x527   : > { %v3238_v42 = vsel %vm3224_vm10, %v3235_v31, %v3237_v36  ;;  %v6312_v18 = vmul.u32.u64.low %v3239_v17, %v3234_v28  ;;  %v6313_v32 = vmul.u32.u64.high %v3239_v17, %v3234_v28, %v6312_v18  ;;  %v3155_v56 = vclz %v3567_v8 }
 0x528   : > { %v6316_v21 = vmul.u32.u64.low %v3239_v17, %v3238_v42  ;;  %v6317_v35 = vmul.u32.u64.high %v3239_v17, %v3238_v42, %v6316_v21  ;;  %v3230_v29 = vsel %vm3224_vm10, %v3227_v53, %v3229_v61  ;;  %vm3078_vm13 = vcmp.lt.s32.totalorder %v3077_v16, 2 }
 0x529   : > { %v3568_v60 = vadd.s32 4294967294, %v3155_v56  ;;  %vm3079_vm14 = vcmp.eq.s32.totalorder %v3077_v16, 0  ;;  %v3249_v51 = vadd.s32 1, %v6313_v32  ;;  %vm3082_vm11 = vcmp.eq.s32.totalorder %v3077_v16, 2 }
 0x52a   : > { %v3143_v11 = vadd.s32 %v6265_v46, %v6263_v30  ;;  %v3299_v52 = vshrl.u32 %v3298_v20, 23  ;;  %v3246_v40 = vmul.u32 %v3239_v17, %v3230_v29  ;;  %vm3248_vm1 = vc.u32 %v6317_v35, %v6312_v18 }
 0x52b   : > { %vm3569_vm2 = vcmp.lt.s32.totalorder %v3568_v60, 0  ;;  %v3295_v15 = vand.u32 2147483647, %v6309_v44  ;;  %v3250_v33 = vsel %vm3248_vm1, %v3249_v51, %v6313_v32  ;;  %vm3075_vm0 = vweird.f32 %v6037_v37 }
 0x52c   : > { %v4170_v41 = vpop.eup %4169  ;;  %v3158_v39 = vsel %vm3569_vm2, 0, %v3568_v60  ;;  %v3574_v30 = vadd.s32 4294967169, %v3299_v52  ;;  %v3251_v59 = vadd.s32 %v3250_v33, %v3246_v40  ;;  %v3173_v25 = vsub.s32 4, %v6295_v38 }
 0x52d   : > { %v4172_v62 = vpop.eup %4171  ;;  %v3083_v50 = vxor.u32 2147483648, %v4170_v41  ;;  %v3159_v27 = vsub.s32 32, %v3158_v39  ;;  %v3163_v19 = vsub.s32 4294967266, %v3158_v39  ;;  %v3160_v22 = vshll.u32 %v3151_v54, %v3158_v39 }
 0x52e   : > { %v3080_v43 = vxor.u32 2147483648, %v4172_v62  ;;  %v3305_v10 = vadd.s32 1, %v3574_v30  ;;  %v3252_v17 = vadd.s32 536870912, %v3251_v59  ;;  %vm3089_vm3 = vcmp.lt.s32.totalorder %v6147_v6, 0 }
 0x52f   : > { %v3084_v24 = vsel %vm3082_vm11, %v3083_v50, %v4172_v62  ;;  %v3161_v14 = vshrl.u32 %v3143_v11, %v3159_v27  ;;  %v3164_v34 = vadd.s32 127, %v3163_v19  ;;  %v3302_v37 = vand.u32 8388607, %v3295_v15 }
 0x530   : > { %v3081_v46 = vsel %vm3079_vm14, %v4170_v41, %v3080_v43  ;;  %vm3306_vm4 = vcmp.gt.s32.totalorder %v3305_v10, 0  ;;  %v6334_v58 = vshrl.u32 %v3252_v17, 30  ;;  %v3174_v1 = vsel %vm3089_vm3, %v3173_v25, %v6295_v38 }
 0x531   : > { %v3085_v49 = vsel %vm3078_vm13, %v3081_v46, %v3084_v24  ;;  %v3162_v12 = vor.u32 %v3161_v14, %v3160_v22  ;;  %v3165_v7 = vshll.u32 %v3164_v34, 23  ;;  %v3307_v16 = vsel %vm3306_vm4, %v3305_v10, 0 }
 0x532   : > { %v3086_v23 = vsel %vm3075_vm0, nan, %v3085_v49  ;;  %v3309_v57 = vand.u32 31, %v3307_v16  ;;  %v3254_v9 = vshll.u32 %v6334_v58, 30  ;;  %vm6344_vm6 = vcmp.le.f32.partialorder %v3087_v47, 0.7853982 }
 0x533   : > { %3412 = vst.msk [vmem:[%s5359_s24 + $0x60] sm:$0xff] %vm3399_vm15, %v3086_v23  ;;  %v3166_v54 = vor.u32 4788187, %v3165_v7  ;;  %v3169_v45 = vcvt.s32.f32 %v3162_v12  ;;  %v3176_v53 = vsel %vm6344_vm6, 0, %v3174_v1  ;;  %v3303_v36 = vor.u32 8388608, %v3302_v37 }
 0x534   : > { %v3310_v26 = vsub.s32 32, %v3309_v57  ;;  %v3255_v28 = vsub.s32 %v3251_v59, %v3254_v9  ;;  %v3308_v61 = vshrl.u32 %v3307_v16, 5  ;;  %v3312_v38 = vshll.u32 %v4231_v63, %v3309_v57 }
 0x535   : > { %v3167_v5 = vand.u32 2147483647, %v3166_v54  ;;  %v3315_v47 = vshll.u32 %v4232_v48, %v3309_v57  ;;  %v3318_v20 = vshll.u32 %v4233_v2, %v3309_v57  ;;  %v3321_v51 = vshll.u32 %v4234_v4, %v3309_v57 }
 0x536   : > { %v3313_v42 = vshrl.u32 %v4232_v48, %v3310_v26  ;;  %v3316_v32 = vshrl.u32 %v4233_v2, %v3310_v26  ;;  %v3257_v21 = vsub.s32 0, %v3255_v28  ;;  %v3319_v60 = vshrl.u32 %v4234_v4, %v3310_v26 }
 0x537   : > { %v3170_v8 = vmul.f32 %v3169_v45, %v3167_v5  ;;  %v3322_v41 = vshrl.u32 %v4235_v3, %v3310_v26  ;;  %v3324_v50 = vshll.u32 %v4235_v3, %v3309_v57  ;;  %v3325_v43 = vshrl.u32 %v4236_v13, %v3310_v26 }
 0x538   : > { %v3314_v29 = vor.u32 %v3313_v42, %v3312_v38  ;;  %v3571_v52 = vmin.u32 %v3257_v21, %v3255_v28  ;;  %v3317_v62 = vor.u32 %v3316_v32, %v3315_v47  ;;  %v3320_v39 = vor.u32 %v3319_v60, %v3318_v20 }
 0x539   : > { %v3171_v56 = vxor.u32 2147483648, %v3170_v8  ;;  %v3323_v40 = vor.u32 %v3322_v41, %v3321_v51  ;;  %v3180_v2 = vadd.s32 3, %v3176_v53  ;;  %v3247_v4 = vadd.s32 %v6312_v18, %v6317_v35 }
 0x53a   : > { %v3259_v27 = vclz %v3571_v52  ;;  %v3311_v19 = vshrl.u32 %v4231_v63, %v3310_v26  ;;  %v3326_v24 = vor.u32 %v3325_v43, %v3324_v50  ;;  %v3343_v22 = vshll.u32 %v3303_v36, 8 }
 0x53b   : > { %v3172_v11 = vsel %vm3089_vm3, %v3171_v56, %v3170_v8  ;;  %vm3327_vm7 = vcmp.lt.s32.totalorder %v3308_v61, 1  ;;  %vm3329_vm5 = vcmp.lt.s32.totalorder %v3308_v61, 3  ;;  %vm3330_vm8 = vcmp.lt.s32.totalorder %v3308_v61, 4 }
 0x53c   : > { %v3175_v48 = vsel %vm6344_vm6, %v6147_v6, %v3172_v11  ;;  %v3572_v3 = vadd.s32 4294967294, %v3259_v27  ;;  %v3332_v33 = vsel %vm3330_vm8, %v3320_v39, 2102212464  ;;  %v3335_v30 = vsel %vm3327_vm7, %v3314_v29, %v3317_v62 }
 0x53d   : > { %4173 = vcosq.f32 %v3175_v48  ;;  %v3336_v46 = vsel %vm3330_vm8, %v3323_v40, 920167782  ;;  %v3339_v14 = vsel %vm3327_vm7, %v3317_v62, %v3320_v39  ;;  %vm3328_vm12 = vcmp.lt.s32.totalorder %v3308_v61, 2 }
 0x53e   : > { %4175 = vsinq.f32 %v3175_v48  ;;  %vm3573_vm9 = vcmp.lt.s32.totalorder %v3572_v3, 0  ;;  %v3337_v13 = vsel %vm3329_vm5, %v3320_v39, %v3336_v46  ;;  %v3340_v34 = vsel %vm3330_vm8, %v3326_v24, 1326507024 }
 0x53f   : > { %v3262_v18 = vsel %vm3573_vm9, 0, %v3572_v3  ;;  %v3331_v35 = vsel %vm3327_vm7, %v3311_v19, %v3314_v29  ;;  %v3338_v59 = vsel %vm3328_vm12, %v3335_v30, %v3337_v13  ;;  %v3341_v63 = vsel %vm3329_vm5, %v3323_v40, %v3340_v34 }
 0x540   : > { %v3263_v49 = vsub.s32 32, %v3262_v18  ;;  %v3267_v25 = vsub.s32 4294967266, %v3262_v18  ;;  %v3333_v10 = vsel %vm3329_vm5, %v3317_v62, %v3332_v33  ;;  %v3342_v23 = vsel %vm3328_vm12, %v3339_v14, %v3341_v63 }
 0x541   : > { %v6373_v12 = vmul.u32.u64.low %v3343_v22, %v3342_v23  ;;  %v6374_v7 = vmul.u32.u64.high %v3343_v22, %v3342_v23, %v6373_v12  ;;  %v6376_v17 = vmul.u32.u64.low %v3343_v22, %v3338_v59  ;;  %v6377_v54 = vmul.u32.u64.high %v3343_v22, %v3338_v59, %v6376_v17 }
 0x542   : > { %v3181_v37 = vand.u32 3, %v3180_v2  ;;  %v3264_v16 = vshll.u32 %v3255_v28, %v3262_v18  ;;  %v3265_v1 = vshrl.u32 %v3247_v4, %v3263_v49  ;;  %v3268_v57 = vadd.s32 127, %v3267_v25 }
 0x543   : > { %v3334_v5 = vsel %vm3328_vm12, %v3331_v35, %v3333_v10  ;;  %vm3352_vm10 = vc.u32 %v6374_v7, %v6376_v17  ;;  %v3353_v53 = vadd.s32 1, %v6377_v54  ;;  %vm3179_vm2 = vweird.f32 %v6147_v6 }
 0x544   : > { %v3266_v9 = vor.u32 %v3265_v1, %v3264_v16  ;;  %v3269_v31 = vshll.u32 %v3268_v57, 23  ;;  %vm3186_vm13 = vcmp.eq.s32.totalorder %v3181_v37, 2  ;;  %v3350_v42 = vmul.u32 %v3343_v22, %v3334_v5 }
 0x545   : > { %vm3182_vm14 = vcmp.lt.s32.totalorder %v3181_v37, 2  ;;  %vm3183_vm11 = vcmp.eq.s32.totalorder %v3181_v37, 0  ;;  %v3354_v61 = vsel %vm3352_vm10, %v3353_v53, %v6377_v54  ;;  %v3277_v29 = vsub.s32 4, %v6334_v58 }
 0x546   : > { %v3270_v38 = vor.u32 4788187, %v3269_v31  ;;  %v3273_v21 = vcvt.s32.f32 %v3266_v9  ;;  %v3355_v47 = vadd.s32 %v3354_v61, %v3350_v42  ;;  %vm3193_vm1 = vcmp.lt.s32.totalorder %v6199_v0, 0 }
 0x547   : > { %v4174_v45 = vpop.eup %4173  ;;  %v3278_v62 = vsel %vm3193_vm1, %v3277_v29, %v6334_v58  ;;  %vm3192_vm0 = vcmp.le.f32.partialorder %v3191_v55, 0.7853982  ;;  %v3351_v30 = vadd.s32 %v6376_v17, %v6374_v7  ;;  %vm3283_vm5 = vweird.f32 %v6199_v0 }
 0x548   : > { %v4176_v26 = vpop.eup %4175  ;;  %v3187_v8 = vxor.u32 2147483648, %v4174_v45  ;;  %v3271_v56 = vand.u32 2147483647, %v3270_v38  ;;  %v3356_v41 = vadd.s32 536870912, %v3355_v47  ;;  %v3280_v39 = vsel %vm3192_vm0, 0, %v3278_v62 }
 0x549   : > { %v3184_v36 = vxor.u32 2147483648, %v4176_v26  ;;  %v3284_v2 = vadd.s32 3, %v3280_v39  ;;  %vm3297_vm8 = vcmp.lt.s32.totalorder %v6309_v44, 0  ;;  %vm3296_vm9 = vcmp.le.f32.partialorder %v3295_v15, 0.7853982 }
 0x54a   : > { %v3188_v28 = vsel %vm3186_vm13, %v3187_v8, %v4176_v26  ;;  %v3274_v51 = vmul.f32 %v3273_v21, %v3271_v56  ;;  %v3357_v52 = vshrl.u32 %v3356_v41, 30 }
 0x54b   : > { %v3185_v32 = vsel %vm3183_vm11, %v4174_v45, %v3184_v36  ;;  %v3285_v19 = vand.u32 3, %v3284_v2 }
 0x54c   : > { %v3189_v60 = vsel %vm3182_vm14, %v3185_v32, %v3188_v28  ;;  %v3275_v11 = vxor.u32 2147483648, %v3274_v51  ;;  %v3358_v48 = vshll.u32 %v3357_v52, 30  ;;  %v3381_v54 = vsub.s32 4, %v3357_v52 }
 0x54d   : > { %v3190_v20 = vsel %vm3179_vm2, nan, %v3189_v60  ;;  %vm3290_vm4 = vcmp.eq.s32.totalorder %v3285_v19, 2  ;;  %vm3286_vm6 = vcmp.lt.s32.totalorder %v3285_v19, 2  ;;  %vm3287_vm7 = vcmp.eq.s32.totalorder %v3285_v19, 0 }
 0x54e   : > { %3413 = vst.msk [vmem:[%s5359_s24 + $0x68] sm:$0xff] %vm3399_vm15, %v3190_v20  ;;  %v3276_v50 = vsel %vm3193_vm1, %v3275_v11, %v3274_v51  ;;  %v3359_v40 = vsub.s32 %v3355_v47, %v3358_v48  ;;  %v3382_v1 = vsel %vm3297_vm8, %v3381_v54, %v3357_v52  ;;  %vm3387_vm14 = vweird.f32 %v6309_v44 }
 0x54f   : > { %v3279_v6 = vsel %vm3192_vm0, %v6199_v0, %v3276_v50  ;;  %v3384_v57 = vsel %vm3296_vm9, 0, %v3382_v1 }
 0x550   : > { %4177 = vcosq.f32 %v3279_v6  ;;  %v3361_v43 = vsub.s32 0, %v3359_v40  ;;  %v3388_v5 = vadd.s32 3, %v3384_v57 }
 0x551   : > { %4179 = vsinq.f32 %v3279_v6 }
 0x552   : > { %v3575_v4 = vmin.u32 %v3361_v43, %v3359_v40  ;;  %v3389_v45 = vand.u32 3, %v3388_v5 }
 0x554   : > { %v3363_v27 = vclz %v3575_v4  ;;  %vm3394_vm12 = vcmp.eq.s32.totalorder %v3389_v45, 2  ;;  %vm3391_vm10 = vcmp.eq.s32.totalorder %v3389_v45, 0  ;;  %vm3390_vm13 = vcmp.lt.s32.totalorder %v3389_v45, 2 }
 0x556   : > { %v3576_v24 = vadd.s32 4294967294, %v3363_v27 }
 0x558   : > { %vm3577_vm3 = vcmp.lt.s32.totalorder %v3576_v24, 0 }
 0x559   : > { %v3366_v55 = vsel %vm3577_vm3, 0, %v3576_v24 }
 0x55a   : > { %v4178_v22 = vpop.eup %4177  ;;  %v3367_v46 = vsub.s32 32, %v3366_v55  ;;  %v3371_v14 = vsub.s32 4294967266, %v3366_v55  ;;  %v3368_v18 = vshll.u32 %v3359_v40, %v3366_v55 }
 0x55b   : > { %v4180_v58 = vpop.eup %4179  ;;  %v3291_v3 = vxor.u32 2147483648, %v4178_v22 }
 0x55c   : > { %v3288_v33 = vxor.u32 2147483648, %v4180_v58  ;;  %v3369_v35 = vshrl.u32 %v3351_v30, %v3367_v46  ;;  %v3372_v59 = vadd.s32 127, %v3371_v14 }
 0x55d   : > { %v3292_v13 = vsel %vm3290_vm4, %v3291_v3, %v4180_v58 }
 0x55e   : > { %v3289_v34 = vsel %vm3287_vm7, %v4178_v22, %v3288_v33  ;;  %v3370_v25 = vor.u32 %v3369_v35, %v3368_v18  ;;  %v3373_v10 = vshll.u32 %v3372_v59, 23 }
 0x55f   : > { %v3293_v63 = vsel %vm3286_vm6, %v3289_v34, %v3292_v13 }
 0x560   : > { %v3294_v49 = vsel %vm3283_vm5, nan, %v3293_v63  ;;  %v3374_v23 = vor.u32 4788187, %v3373_v10  ;;  %v3377_v7 = vcvt.s32.f32 %v3370_v25 }
 0x561   : > { %3414 = vst.msk [vmem:[%s5359_s24 + $0x70] sm:$0xff] %vm3399_vm15, %v3294_v49 }
 0x562   : > { %v3375_v12 = vand.u32 2147483647, %v3374_v23 }
 0x564   : > { %v3378_v17 = vmul.f32 %v3377_v7, %v3375_v12 }
 0x566   : > { %v3379_v37 = vxor.u32 2147483648, %v3378_v17 }
 0x568   : > { %v3380_v16 = vsel %vm3297_vm8, %v3379_v37, %v3378_v17 }
 0x569   : > { %v3383_v0 = vsel %vm3296_vm9, %v6309_v44, %v3380_v16 }
 0x56a   : > { %4181 = vcosq.f32 %v3383_v0 }
 0x56b   : > { %4183 = vsinq.f32 %v3383_v0 }
 0x574   : > { %v4182_v9 = vpop.eup %4181 }
 0x575   : > { %v4184_v31 = vpop.eup %4183  ;;  %v3395_v26 = vxor.u32 2147483648, %v4182_v9 }
 0x576   : > { %v3392_v8 = vxor.u32 2147483648, %v4184_v31 }
 0x577   : > { %v3396_v53 = vsel %vm3394_vm12, %v3395_v26, %v4184_v31 }
 0x578   : > { %v3393_v36 = vsel %vm3391_vm10, %v4182_v9, %v3392_v8 }
 0x579   : > { %v3397_v15 = vsel %vm3390_vm13, %v3393_v36, %v3396_v53 }
 0x57a   : > { %v3398_v38 = vsel %vm3387_vm14, nan, %v3397_v15 }
 0x57b   : > { %3415 = vst.msk [vmem:[%s5359_s24 + $0x78] sm:$0xff] %vm3399_vm15, %v3398_v38 }
 0x57c PF: > { %s20_s30 = sadd.s32 1, %s4225_s30  }
 0x57d   : > { %p17_p3 = scmp.ge.s32.totalorder %s20_s30, 4  }
 0x57f   :  { %19 = sbr.rel (!%p17_p3) target bundleno = 1 (0x1), region = 91 }
 0x586   :  { %3438 = vsyncpa [#allocation3], 1 }
 0x587   :  { %3440 = vsyncpa [#allocation3 + $0x1], 1 }

</bundles_post_ra>
